<compile_context>
chip_gen: v5e
topology: v5e:2x2
jax: 0.10.0
libtpu: 0.0.40
codegen_flags: <defaults>
</compile_context>

<pallas_src>
import functools
import math

import jax
import jax.numpy as jnp
from jax import lax
from jax.experimental import pallas as pl
from jax.experimental.pallas import tpu as pltpu

LN_EPS = 1e-5
NEG_INF = -1e30


# ----------------------------------------------------------------------------
# Fused decoder-stack kernel: one grid step == one decoder layer.
# ----------------------------------------------------------------------------
def _decoder_stack_kernel(
    # inputs
    x_in_ref, mem_ref,
    sa_wqkv_ref, sa_bqkv_ref, sa_wo_ref, sa_bo_ref, ln1_g_ref, ln1_b_ref,
    ca_wq_ref, ca_bq_ref, ca_wkv_ref, ca_bkv_ref, ca_wo_ref, ca_bo_ref,
    ln2_g_ref, ln2_b_ref,
    ff_w1_ref, ff_b1_ref, ff_w2_ref, ff_b2_ref, ln3_g_ref, ln3_b_ref,
    fc_w_ref, fc_b_ref,
    # output
    logits_ref,
    # scratch (persists across grid iterations)
    x_sc,
    *, B, L, S, S_pad, nH, Dh, H):

  def mm(a_f32, w_bf16):
    # bf16 MXU matmul, f32 accumulation.
    return jnp.dot(a_f32.astype(jnp.bfloat16), w_bf16,
                   preferred_element_type=jnp.float32)

  def layer_norm(z, g, b):
    mu = jnp.mean(z, axis=-1, keepdims=True)
    d = z - mu
    var = jnp.mean(d * d, axis=-1, keepdims=True)   # biased (PyTorch semantics)
    return d * lax.rsqrt(var + LN_EPS) * g + b

  def softmax_rows(s):
    m = jnp.max(s, axis=-1, keepdims=True)
    e = jnp.exp(s - m)
    return e * pl.reciprocal(jnp.sum(e, axis=-1, keepdims=True), approx=True)

  scale = 1.0 / math.sqrt(Dh)

  # ---- first layer: load residual stream into the VMEM carry ----
  @pl.when(pl.program_id(0) == 0)
  def _():
    x_sc[...] = x_in_ref[...]

  x = x_sc[...]                                         # (B*L, H) f32

  def multihead(q_all, kv_all, kv_rows, kv_dim_off, kmask):
    """q_all: (B*L, >=H) queries; kv_all: (B*kv_rows, kv_dim_off+H or 2H)."""
    ctx_rows = []
    for b in range(B):
      r0 = b * L
      m0 = b * kv_rows
      head_parts = []
      for h in range(nH):
        c0 = h * Dh
        qh = q_all[r0:r0 + L, c0:c0 + Dh].astype(jnp.bfloat16)
        kh = kv_all[m0:m0 + kv_rows, c0:c0 + Dh].astype(jnp.bfloat16)
        vh = kv_all[m0:m0 + kv_rows,
                    kv_dim_off + c0:kv_dim_off + c0 + Dh].astype(jnp.bfloat16)
        s = lax.dot_general(qh, kh, (((1,), (1,)), ((), ())),
                            preferred_element_type=jnp.float32) * scale
        if kmask is not None:
          s = jnp.where(kmask, s, NEG_INF)
        p = softmax_rows(s)
        head_parts.append(jnp.dot(p.astype(jnp.bfloat16), vh,
                                  preferred_element_type=jnp.float32))
      ctx_rows.append(jnp.concatenate(head_parts, axis=-1))   # (L, H)
    return jnp.concatenate(ctx_rows, axis=0)                  # (B*L, H)

  # ---------------- self-attention (post-norm, unmasked) ----------------
  qkv = mm(x, sa_wqkv_ref[0]) + sa_bqkv_ref[0]          # (B*L, 3H)
  # q at cols [0,H), k at [H,2H), v at [2H,3H)
  sa_ctx = multihead(qkv, qkv[:, H:], kv_rows=L, kv_dim_off=H, kmask=None)
  sa_out = mm(sa_ctx, sa_wo_ref[0]) + sa_bo_ref[0]
  x = layer_norm(x + sa_out, ln1_g_ref[0], ln1_b_ref[0])

  # ---------------- cross-attention (post-norm) ----------------
  q = mm(x, ca_wq_ref[0]) + ca_bq_ref[0]                # (B*L, H)
  kv = mm(mem_ref[...], ca_wkv_ref[0]) + ca_bkv_ref[0]  # (B*S_pad, 2H)
  kmask = None
  if S_pad > S:  # mask the padded memory keys
    kmask = lax.broadcasted_iota(jnp.int32, (L, S_pad), 1) < S
  ca_ctx = multihead(q, kv, kv_rows=S_pad, kv_dim_off=H, kmask=kmask)
  ca_out = mm(ca_ctx, ca_wo_ref[0]) + ca_bo_ref[0]
  x = layer_norm(x + ca_out, ln2_g_ref[0], ln2_b_ref[0])

  # ---------------- feed-forward (post-norm, ReLU) ----------------
  hid = jnp.maximum(mm(x, ff_w1_ref[0]) + ff_b1_ref[0], 0.0)
  ff = mm(hid, ff_w2_ref[0]) + ff_b2_ref[0]
  x = layer_norm(x + ff, ln3_g_ref[0], ln3_b_ref[0])
  x_sc[...] = x

  # ---- last layer: fused fc_out into a lane-dense (B*L, Vpad) slab ----
  @pl.when(pl.program_id(0) == pl.num_programs(0) - 1)
  def _():
    logits_ref[...] = mm(x, fc_w_ref[...]) + fc_b_ref[...]


# ----------------------------------------------------------------------------
# Parameters: stacked per-layer weights (leading layer dim), matmul weights bf16.
# ----------------------------------------------------------------------------
def init_params(key, vocab_size, hidden_size, num_layers, num_heads,
                dim_ff=2048, max_pos=512):
  H = hidden_size
  NL = num_layers
  Vp = ((vocab_size + 127) // 128) * 128   # lane-dense padded vocab width
  cnt = [0]

  def nrm(shape, scale=0.02, dtype=jnp.float32):
    cnt[0] += 1
    k = jax.random.fold_in(key, cnt[0])
    return (scale * jax.random.normal(k, shape, dtype=jnp.float32)).astype(dtype)

  fc_w = nrm((H, vocab_size))
  fc_b = nrm((1, vocab_size))
  params = {
      'vocab_size': vocab_size,
      'embedding': nrm((vocab_size, H)),
      'pos': nrm((max_pos, H)),
      # self-attention: fused QKV
      'sa_wqkv': nrm((NL, H, 3 * H), dtype=jnp.bfloat16),
      'sa_bqkv': nrm((NL, 1, 3 * H)),
      'sa_wo': nrm((NL, H, H), dtype=jnp.bfloat16),
      'sa_bo': nrm((NL, 1, H)),
      # cross-attention: Q from tgt, fused K|V from memory
      'ca_wq': nrm((NL, H, H), dtype=jnp.bfloat16),
      'ca_bq': nrm((NL, 1, H)),
      'ca_wkv': nrm((NL, H, 2 * H), dtype=jnp.bfloat16),
      'ca_bkv': nrm((NL, 1, 2 * H)),
      'ca_wo': nrm((NL, H, H), dtype=jnp.bfloat16),
      'ca_bo': nrm((NL, 1, H)),
      # feed-forward
      'ff_w1': nrm((NL, H, dim_ff), dtype=jnp.bfloat16),
      'ff_b1': nrm((NL, 1, dim_ff)),
      'ff_w2': nrm((NL, dim_ff, H), dtype=jnp.bfloat16),
      'ff_b2': nrm((NL, 1, H)),
      # layer norms
      'ln1_g': jnp.ones((NL, 1, H), jnp.float32),
      'ln1_b': jnp.zeros((NL, 1, H), jnp.float32),
      'ln2_g': jnp.ones((NL, 1, H), jnp.float32),
      'ln2_b': jnp.zeros((NL, 1, H), jnp.float32),
      'ln3_g': jnp.ones((NL, 1, H), jnp.float32),
      'ln3_b': jnp.zeros((NL, 1, H), jnp.float32),
      # fc_out, padded to lane-dense width (zero columns sliced away in wrapper)
      'fc_w': jnp.pad(fc_w, ((0, 0), (0, Vp - vocab_size))).astype(jnp.bfloat16),
      'fc_b': jnp.pad(fc_b, ((0, 0), (0, Vp - vocab_size))),
  }
  return params


# ----------------------------------------------------------------------------
# Forward pass: one pallas_call for the whole stack (+ tiny JAX glue).
# ----------------------------------------------------------------------------
def schema_decoder_forward(params, tgt_ids, memory, num_heads):
  """tgt_ids: (B, L) int32.  memory: (S, B, H) f32 (seq-first, PyTorch layout).
  Returns logits of shape (L, B, vocab_size) — matches the PyTorch module."""
  B, L = tgt_ids.shape
  S, Bm, H = memory.shape
  assert Bm == B
  nH = num_heads
  Dh = H // nH
  NL = params['sa_wqkv'].shape[0]
  F = params['ff_w1'].shape[2]
  Vp = params['fc_w'].shape[1]
  V = params['vocab_size']

  # embedding + positional embedding
  # TODO(synk): the token-id / position gather stays in plain JAX glue (no clean
  # Pallas gather at this scale); everything downstream runs in the fused kernel.
  tgt_emb = params['embedding'][tgt_ids] + params['pos'][:L][None, :, :]
  x2d = tgt_emb.reshape(B * L, H).astype(jnp.float32)

  # memory: (S, B, H) seq-first -> batch-first, pad S to a sublane multiple
  S_pad = ((S + 7) // 8) * 8
  mem_bf = jnp.transpose(memory, (1, 0, 2)).astype(jnp.float32)
  mem_bf = jnp.pad(mem_bf, ((0, 0), (0, S_pad - S), (0, 0)))
  mem2d = mem_bf.reshape(B * S_pad, H)

  def full_spec(d0, d1):
    return pl.BlockSpec((d0, d1), lambda l: (0, 0))

  def layer_spec(d1, d2):
    return pl.BlockSpec((1, d1, d2), lambda l: (l, 0, 0))

  grid_spec = pltpu.PrefetchScalarGridSpec(
      num_scalar_prefetch=0,
      grid=(NL,),
      in_specs=[
          full_spec(B * L, H), full_spec(B * S_pad, H),
          layer_spec(H, 3 * H), layer_spec(1, 3 * H),
          layer_spec(H, H), layer_spec(1, H),
          layer_spec(1, H), layer_spec(1, H),
          layer_spec(H, H), layer_spec(1, H),
          layer_spec(H, 2 * H), layer_spec(1, 2 * H),
          layer_spec(H, H), layer_spec(1, H),
          layer_spec(1, H), layer_spec(1, H),
          layer_spec(H, F), layer_spec(1, F),
          layer_spec(F, H), layer_spec(1, H),
          layer_spec(1, H), layer_spec(1, H),
          full_spec(H, Vp), full_spec(1, Vp),
      ],
      out_specs=full_spec(B * L, Vp),
      scratch_shapes=[pltpu.VMEM((B * L, H), jnp.float32)],   # residual carry
  )

  kernel = functools.partial(_decoder_stack_kernel,
                             B=B, L=L, S=S, S_pad=S_pad, nH=nH, Dh=Dh, H=H)

  logits_pad = pl.pallas_call(
      kernel,
      out_shape=jax.ShapeDtypeStruct((B * L, Vp), jnp.float32),
      grid_spec=grid_spec,
      compiler_params=pltpu.CompilerParams(
          dimension_semantics=("arbitrary",)),   # layers are a sequential carry
  )(x2d, mem2d,
    params['sa_wqkv'], params['sa_bqkv'], params['sa_wo'], params['sa_bo'],
    params['ln1_g'], params['ln1_b'],
    params['ca_wq'], params['ca_bq'], params['ca_wkv'], params['ca_bkv'],
    params['ca_wo'], params['ca_bo'], params['ln2_g'], params['ln2_b'],
    params['ff_w1'], params['ff_b1'], params['ff_w2'], params['ff_b2'],
    params['ln3_g'], params['ln3_b'],
    params['fc_w'], params['fc_b'])

  # un-pad vocab and return PyTorch seq-first layout (L, B, V)
  logits = logits_pad[:, :V].reshape(B, L, V)
  return jnp.transpose(logits, (1, 0, 2))


# ----------------------------------------------------------------------------
if __name__ == "__main__":
  vocab_size, hidden_size, num_layers, num_heads = 50, 32, 2, 4
  B, L, S = 2, 8, 6

  key = jax.random.PRNGKey(0)
  k_par, k_tgt, k_mem = jax.random.split(key, 3)

  params = init_params(k_par, vocab_size, hidden_size, num_layers, num_heads)
  tgt = jax.random.randint(k_tgt, (B, L), 0, vocab_size, dtype=jnp.int32)
  # memory in nn.TransformerDecoder's default layout: (S, B, hidden)
  memory = jax.random.normal(k_mem, (S, B, hidden_size), dtype=jnp.float32)

  logits = schema_decoder_forward(params, tgt, memory, num_heads)
  logits = jax.block_until_ready(logits)

  assert logits.shape == (L, B, vocab_size)
  assert bool(jnp.all(jnp.isfinite(logits)))
  print("KERNEL_OK")
</pallas_src>

<mosaic_0001>
module attributes {stable_mosaic.version = 11 : i64} {
  func.func @_decoder_stack_kernel(%arg0: i32, %arg1: memref<16x32xf32, #tpu.memory_space<vmem>>, %arg2: memref<16x32xf32, #tpu.memory_space<vmem>>, %arg3: memref<1x32x96xbf16, #tpu.memory_space<vmem>>, %arg4: memref<1x1x96xf32, #tpu.memory_space<vmem>>, %arg5: memref<1x32x32xbf16, #tpu.memory_space<vmem>>, %arg6: memref<1x1x32xf32, #tpu.memory_space<vmem>>, %arg7: memref<1x1x32xf32, #tpu.memory_space<vmem>>, %arg8: memref<1x1x32xf32, #tpu.memory_space<vmem>>, %arg9: memref<1x32x32xbf16, #tpu.memory_space<vmem>>, %arg10: memref<1x1x32xf32, #tpu.memory_space<vmem>>, %arg11: memref<1x32x64xbf16, #tpu.memory_space<vmem>>, %arg12: memref<1x1x64xf32, #tpu.memory_space<vmem>>, %arg13: memref<1x32x32xbf16, #tpu.memory_space<vmem>>, %arg14: memref<1x1x32xf32, #tpu.memory_space<vmem>>, %arg15: memref<1x1x32xf32, #tpu.memory_space<vmem>>, %arg16: memref<1x1x32xf32, #tpu.memory_space<vmem>>, %arg17: memref<1x32x2048xbf16, #tpu.memory_space<vmem>>, %arg18: memref<1x1x2048xf32, #tpu.memory_space<vmem>>, %arg19: memref<1x2048x32xbf16, #tpu.memory_space<vmem>>, %arg20: memref<1x1x32xf32, #tpu.memory_space<vmem>>, %arg21: memref<1x1x32xf32, #tpu.memory_space<vmem>>, %arg22: memref<1x1x32xf32, #tpu.memory_space<vmem>>, %arg23: memref<32x128xbf16, #tpu.memory_space<vmem>>, %arg24: memref<1x128xf32, #tpu.memory_space<vmem>>, %arg25: memref<16x128xf32, #tpu.memory_space<vmem>>, %arg26: memref<16x32xf32, #tpu.memory_space<vmem>>) attributes {dimension_semantics = [#tpu.dimension_semantics<arbitrary>], iteration_bounds = array<i64: 2>, scalar_prefetch = 0 : i64, scratch_operands = 1 : i64, tpu.core_type = #tpu.core_type<tc>, window_params = [{pipeline_mode = #tpu.pipeline_mode<synchronous>, transform_indices = @transform_0, window_bounds = array<i64: 16, 32>}, {pipeline_mode = #tpu.pipeline_mode<synchronous>, transform_indices = @transform_1, window_bounds = array<i64: 16, 32>}, {transform_indices = @transform_2, window_bounds = array<i64: 1, 32, 96>}, {transform_indices = @transform_3, window_bounds = array<i64: 1, 1, 96>}, {transform_indices = @transform_4, window_bounds = array<i64: 1, 32, 32>}, {transform_indices = @transform_5, window_bounds = array<i64: 1, 1, 32>}, {transform_indices = @transform_6, window_bounds = array<i64: 1, 1, 32>}, {transform_indices = @transform_7, window_bounds = array<i64: 1, 1, 32>}, {transform_indices = @transform_8, window_bounds = array<i64: 1, 32, 32>}, {transform_indices = @transform_9, window_bounds = array<i64: 1, 1, 32>}, {transform_indices = @transform_10, window_bounds = array<i64: 1, 32, 64>}, {transform_indices = @transform_11, window_bounds = array<i64: 1, 1, 64>}, {transform_indices = @transform_12, window_bounds = array<i64: 1, 32, 32>}, {transform_indices = @transform_13, window_bounds = array<i64: 1, 1, 32>}, {transform_indices = @transform_14, window_bounds = array<i64: 1, 1, 32>}, {transform_indices = @transform_15, window_bounds = array<i64: 1, 1, 32>}, {transform_indices = @transform_16, window_bounds = array<i64: 1, 32, 2048>}, {transform_indices = @transform_17, window_bounds = array<i64: 1, 1, 2048>}, {transform_indices = @transform_18, window_bounds = array<i64: 1, 2048, 32>}, {transform_indices = @transform_19, window_bounds = array<i64: 1, 1, 32>}, {transform_indices = @transform_20, window_bounds = array<i64: 1, 1, 32>}, {transform_indices = @transform_21, window_bounds = array<i64: 1, 1, 32>}, {pipeline_mode = #tpu.pipeline_mode<synchronous>, transform_indices = @transform_22, window_bounds = array<i64: 32, 128>}, {pipeline_mode = #tpu.pipeline_mode<synchronous>, transform_indices = @transform_23, window_bounds = array<i64: 1, 128>}, {pipeline_mode = #tpu.pipeline_mode<synchronous>, transform_indices = @transform_24, window_bounds = array<i64: 16, 128>}]} {
    %c0_i32 = arith.constant 0 : i32
    %0 = arith.cmpi eq, %arg0, %c0_i32 : i32
    %1 = arith.extui %0 : i1 to i32
    %c0_i32_0 = arith.constant 0 : i32
    %2 = arith.cmpi ne, %1, %c0_i32_0 : i32
    scf.if %2 {
      %c0_177 = arith.constant 0 : index
      %c0_178 = arith.constant 0 : index
      %504 = vector.load %arg1[%c0_177, %c0_178] : memref<16x32xf32, #tpu.memory_space<vmem>>, vector<16x32xf32>
      %c0_179 = arith.constant 0 : index
      %c0_180 = arith.constant 0 : index
      %505 = vector.load %arg26[%c0_179, %c0_180] : memref<16x32xf32, #tpu.memory_space<vmem>>, vector<16x32xf32>
      tpu.vector_store %arg26[%c0_179, %c0_180], %504 {strides = array<i32>} : memref<16x32xf32, #tpu.memory_space<vmem>>, vector<16x32xf32>,
    } else {
    }
    %c0 = arith.constant 0 : index
    %c0_1 = arith.constant 0 : index
    %3 = vector.load %arg26[%c0, %c0_1] : memref<16x32xf32, #tpu.memory_space<vmem>>, vector<16x32xf32>
    %c0_2 = arith.constant 0 : index
    %c0_3 = arith.constant 0 : index
    %c0_4 = arith.constant 0 : index
    %4 = vector.load %arg3[%c0_2, %c0_3, %c0_4] : memref<1x32x96xbf16, #tpu.memory_space<vmem>>, vector<1x32x96xbf16>
    %5 = vector.shape_cast %4 : vector<1x32x96xbf16> to vector<32x96xbf16>
    %6 = arith.truncf %3 : vector<16x32xf32> to vector<16x32xbf16>
    %cst = arith.constant dense<0.000000e+00> : vector<16x96xf32>
    %7 = tpu.matmul %6, %5, %cst {dimension_numbers = #tpu.dot_dimension_numbers<[1], [0], [0], [1], [0, 0, 1, 1], [], []>} : vector<16x32xbf16>, vector<32x96xbf16>, vector<16x96xf32> -> vector<16x96xf32>
    %c0_5 = arith.constant 0 : index
    %c0_6 = arith.constant 0 : index
    %c0_7 = arith.constant 0 : index
    %8 = vector.load %arg4[%c0_5, %c0_6, %c0_7] : memref<1x1x96xf32, #tpu.memory_space<vmem>>, vector<1x1x96xf32>
    %9 = vector.shape_cast %8 : vector<1x1x96xf32> to vector<1x96xf32>
    %10 = vector.broadcast %9 : vector<1x96xf32> to vector<16x96xf32>
    %11 = arith.addf %7, %10 : vector<16x96xf32>
    %12 = vector.extract_strided_slice %11 {offsets = [0, 32], sizes = [16, 64], strides = [1, 1]} : vector<16x96xf32> to vector<16x64xf32>
    %13 = vector.extract_strided_slice %11 {offsets = [0, 0], sizes = [8, 8], strides = [1, 1]} : vector<16x96xf32> to vector<8x8xf32>
    %14 = arith.truncf %13 : vector<8x8xf32> to vector<8x8xbf16>
    %15 = vector.extract_strided_slice %12 {offsets = [0, 0], sizes = [8, 8], strides = [1, 1]} : vector<16x64xf32> to vector<8x8xf32>
    %16 = arith.truncf %15 : vector<8x8xf32> to vector<8x8xbf16>
    %17 = vector.extract_strided_slice %12 {offsets = [0, 32], sizes = [8, 8], strides = [1, 1]} : vector<16x64xf32> to vector<8x8xf32>
    %18 = arith.truncf %17 : vector<8x8xf32> to vector<8x8xbf16>
    %cst_8 = arith.constant dense<0.000000e+00> : vector<8x8xf32>
    %19 = tpu.matmul %14, %16, %cst_8 {dimension_numbers = #tpu.dot_dimension_numbers<[1], [1], [0], [0], [0, 0, 1, 0], [], []>} : vector<8x8xbf16>, vector<8x8xbf16>, vector<8x8xf32> -> vector<8x8xf32>
    %cst_9 = arith.constant 0.353553385 : f32
    %20 = vector.broadcast %cst_9 : f32 to vector<8x8xf32>
    %21 = arith.mulf %19, %20 : vector<8x8xf32>
    %cst_10 = arith.constant dense<0xFF800000> : vector<8xf32>
    %22 = vector.multi_reduction <maximumf>, %21, %cst_10 [1] : vector<8x8xf32> to vector<8xf32>
    %23 = vector.shape_cast %22 : vector<8xf32> to vector<8x1xf32>
    %24 = vector.broadcast %23 : vector<8x1xf32> to vector<8x8xf32>
    %25 = arith.subf %21, %24 : vector<8x8xf32>
    %26 = math.exp %25 : vector<8x8xf32>
    %cst_11 = arith.constant dense<0.000000e+00> : vector<8xf32>
    %27 = vector.multi_reduction <add>, %26, %cst_11 [1] : vector<8x8xf32> to vector<8xf32>
    %28 = vector.shape_cast %27 : vector<8xf32> to vector<8x1xf32>
    %29 = tpu.reciprocal %28 {approx = true} : vector<8x1xf32> -> vector<8x1xf32>
    %30 = vector.broadcast %29 : vector<8x1xf32> to vector<8x8xf32>
    %31 = arith.mulf %26, %30 : vector<8x8xf32>
    %32 = arith.truncf %31 : vector<8x8xf32> to vector<8x8xbf16>
    %cst_12 = arith.constant dense<0.000000e+00> : vector<8x8xf32>
    %33 = tpu.matmul %32, %18, %cst_12 {dimension_numbers = #tpu.dot_dimension_numbers<[1], [0], [0], [1], [0, 0, 1, 1], [], []>} : vector<8x8xbf16>, vector<8x8xbf16>, vector<8x8xf32> -> vector<8x8xf32>
    %34 = vector.extract_strided_slice %11 {offsets = [0, 8], sizes = [8, 8], strides = [1, 1]} : vector<16x96xf32> to vector<8x8xf32>
    %35 = arith.truncf %34 : vector<8x8xf32> to vector<8x8xbf16>
    %36 = vector.extract_strided_slice %12 {offsets = [0, 8], sizes = [8, 8], strides = [1, 1]} : vector<16x64xf32> to vector<8x8xf32>
    %37 = arith.truncf %36 : vector<8x8xf32> to vector<8x8xbf16>
    %38 = vector.extract_strided_slice %12 {offsets = [0, 40], sizes = [8, 8], strides = [1, 1]} : vector<16x64xf32> to vector<8x8xf32>
    %39 = arith.truncf %38 : vector<8x8xf32> to vector<8x8xbf16>
    %cst_13 = arith.constant dense<0.000000e+00> : vector<8x8xf32>
    %40 = tpu.matmul %35, %37, %cst_13 {dimension_numbers = #tpu.dot_dimension_numbers<[1], [1], [0], [0], [0, 0, 1, 0], [], []>} : vector<8x8xbf16>, vector<8x8xbf16>, vector<8x8xf32> -> vector<8x8xf32>
    %cst_14 = arith.constant 0.353553385 : f32
    %41 = vector.broadcast %cst_14 : f32 to vector<8x8xf32>
    %42 = arith.mulf %40, %41 : vector<8x8xf32>
    %cst_15 = arith.constant dense<0xFF800000> : vector<8xf32>
    %43 = vector.multi_reduction <maximumf>, %42, %cst_15 [1] : vector<8x8xf32> to vector<8xf32>
    %44 = vector.shape_cast %43 : vector<8xf32> to vector<8x1xf32>
    %45 = vector.broadcast %44 : vector<8x1xf32> to vector<8x8xf32>
    %46 = arith.subf %42, %45 : vector<8x8xf32>
    %47 = math.exp %46 : vector<8x8xf32>
    %cst_16 = arith.constant dense<0.000000e+00> : vector<8xf32>
    %48 = vector.multi_reduction <add>, %47, %cst_16 [1] : vector<8x8xf32> to vector<8xf32>
    %49 = vector.shape_cast %48 : vector<8xf32> to vector<8x1xf32>
    %50 = tpu.reciprocal %49 {approx = true} : vector<8x1xf32> -> vector<8x1xf32>
    %51 = vector.broadcast %50 : vector<8x1xf32> to vector<8x8xf32>
    %52 = arith.mulf %47, %51 : vector<8x8xf32>
    %53 = arith.truncf %52 : vector<8x8xf32> to vector<8x8xbf16>
    %cst_17 = arith.constant dense<0.000000e+00> : vector<8x8xf32>
    %54 = tpu.matmul %53, %39, %cst_17 {dimension_numbers = #tpu.dot_dimension_numbers<[1], [0], [0], [1], [0, 0, 1, 1], [], []>} : vector<8x8xbf16>, vector<8x8xbf16>, vector<8x8xf32> -> vector<8x8xf32>
    %55 = vector.extract_strided_slice %11 {offsets = [0, 16], sizes = [8, 8], strides = [1, 1]} : vector<16x96xf32> to vector<8x8xf32>
    %56 = arith.truncf %55 : vector<8x8xf32> to vector<8x8xbf16>
    %57 = vector.extract_strided_slice %12 {offsets = [0, 16], sizes = [8, 8], strides = [1, 1]} : vector<16x64xf32> to vector<8x8xf32>
    %58 = arith.truncf %57 : vector<8x8xf32> to vector<8x8xbf16>
    %59 = vector.extract_strided_slice %12 {offsets = [0, 48], sizes = [8, 8], strides = [1, 1]} : vector<16x64xf32> to vector<8x8xf32>
    %60 = arith.truncf %59 : vector<8x8xf32> to vector<8x8xbf16>
    %cst_18 = arith.constant dense<0.000000e+00> : vector<8x8xf32>
    %61 = tpu.matmul %56, %58, %cst_18 {dimension_numbers = #tpu.dot_dimension_numbers<[1], [1], [0], [0], [0, 0, 1, 0], [], []>} : vector<8x8xbf16>, vector<8x8xbf16>, vector<8x8xf32> -> vector<8x8xf32>
    %cst_19 = arith.constant 0.353553385 : f32
    %62 = vector.broadcast %cst_19 : f32 to vector<8x8xf32>
    %63 = arith.mulf %61, %62 : vector<8x8xf32>
    %cst_20 = arith.constant dense<0xFF800000> : vector<8xf32>
    %64 = vector.multi_reduction <maximumf>, %63, %cst_20 [1] : vector<8x8xf32> to vector<8xf32>
    %65 = vector.shape_cast %64 : vector<8xf32> to vector<8x1xf32>
    %66 = vector.broadcast %65 : vector<8x1xf32> to vector<8x8xf32>
    %67 = arith.subf %63, %66 : vector<8x8xf32>
    %68 = math.exp %67 : vector<8x8xf32>
    %cst_21 = arith.constant dense<0.000000e+00> : vector<8xf32>
    %69 = vector.multi_reduction <add>, %68, %cst_21 [1] : vector<8x8xf32> to vector<8xf32>
    %70 = vector.shape_cast %69 : vector<8xf32> to vector<8x1xf32>
    %71 = tpu.reciprocal %70 {approx = true} : vector<8x1xf32> -> vector<8x1xf32>
    %72 = vector.broadcast %71 : vector<8x1xf32> to vector<8x8xf32>
    %73 = arith.mulf %68, %72 : vector<8x8xf32>
    %74 = arith.truncf %73 : vector<8x8xf32> to vector<8x8xbf16>
    %cst_22 = arith.constant dense<0.000000e+00> : vector<8x8xf32>
    %75 = tpu.matmul %74, %60, %cst_22 {dimension_numbers = #tpu.dot_dimension_numbers<[1], [0], [0], [1], [0, 0, 1, 1], [], []>} : vector<8x8xbf16>, vector<8x8xbf16>, vector<8x8xf32> -> vector<8x8xf32>
    %76 = vector.extract_strided_slice %11 {offsets = [0, 24], sizes = [8, 8], strides = [1, 1]} : vector<16x96xf32> to vector<8x8xf32>
    %77 = arith.truncf %76 : vector<8x8xf32> to vector<8x8xbf16>
    %78 = vector.extract_strided_slice %12 {offsets = [0, 24], sizes = [8, 8], strides = [1, 1]} : vector<16x64xf32> to vector<8x8xf32>
    %79 = arith.truncf %78 : vector<8x8xf32> to vector<8x8xbf16>
    %80 = vector.extract_strided_slice %12 {offsets = [0, 56], sizes = [8, 8], strides = [1, 1]} : vector<16x64xf32> to vector<8x8xf32>
    %81 = arith.truncf %80 : vector<8x8xf32> to vector<8x8xbf16>
    %cst_23 = arith.constant dense<0.000000e+00> : vector<8x8xf32>
    %82 = tpu.matmul %77, %79, %cst_23 {dimension_numbers = #tpu.dot_dimension_numbers<[1], [1], [0], [0], [0, 0, 1, 0], [], []>} : vector<8x8xbf16>, vector<8x8xbf16>, vector<8x8xf32> -> vector<8x8xf32>
    %cst_24 = arith.constant 0.353553385 : f32
    %83 = vector.broadcast %cst_24 : f32 to vector<8x8xf32>
    %84 = arith.mulf %82, %83 : vector<8x8xf32>
    %cst_25 = arith.constant dense<0xFF800000> : vector<8xf32>
    %85 = vector.multi_reduction <maximumf>, %84, %cst_25 [1] : vector<8x8xf32> to vector<8xf32>
    %86 = vector.shape_cast %85 : vector<8xf32> to vector<8x1xf32>
    %87 = vector.broadcast %86 : vector<8x1xf32> to vector<8x8xf32>
    %88 = arith.subf %84, %87 : vector<8x8xf32>
    %89 = math.exp %88 : vector<8x8xf32>
    %cst_26 = arith.constant dense<0.000000e+00> : vector<8xf32>
    %90 = vector.multi_reduction <add>, %89, %cst_26 [1] : vector<8x8xf32> to vector<8xf32>
    %91 = vector.shape_cast %90 : vector<8xf32> to vector<8x1xf32>
    %92 = tpu.reciprocal %91 {approx = true} : vector<8x1xf32> -> vector<8x1xf32>
    %93 = vector.broadcast %92 : vector<8x1xf32> to vector<8x8xf32>
    %94 = arith.mulf %89, %93 : vector<8x8xf32>
    %95 = arith.truncf %94 : vector<8x8xf32> to vector<8x8xbf16>
    %cst_27 = arith.constant dense<0.000000e+00> : vector<8x8xf32>
    %96 = tpu.matmul %95, %81, %cst_27 {dimension_numbers = #tpu.dot_dimension_numbers<[1], [0], [0], [1], [0, 0, 1, 1], [], []>} : vector<8x8xbf16>, vector<8x8xbf16>, vector<8x8xf32> -> vector<8x8xf32>
    %97 = tpu.concatenate %33, %54, %75, %96 in 1 : vector<8x8xf32>, vector<8x8xf32>, vector<8x8xf32>, vector<8x8xf32> -> vector<8x32xf32>
    %98 = vector.extract_strided_slice %11 {offsets = [8, 0], sizes = [8, 8], strides = [1, 1]} : vector<16x96xf32> to vector<8x8xf32>
    %99 = arith.truncf %98 : vector<8x8xf32> to vector<8x8xbf16>
    %100 = vector.extract_strided_slice %12 {offsets = [8, 0], sizes = [8, 8], strides = [1, 1]} : vector<16x64xf32> to vector<8x8xf32>
    %101 = arith.truncf %100 : vector<8x8xf32> to vector<8x8xbf16>
    %102 = vector.extract_strided_slice %12 {offsets = [8, 32], sizes = [8, 8], strides = [1, 1]} : vector<16x64xf32> to vector<8x8xf32>
    %103 = arith.truncf %102 : vector<8x8xf32> to vector<8x8xbf16>
    %cst_28 = arith.constant dense<0.000000e+00> : vector<8x8xf32>
    %104 = tpu.matmul %99, %101, %cst_28 {dimension_numbers = #tpu.dot_dimension_numbers<[1], [1], [0], [0], [0, 0, 1, 0], [], []>} : vector<8x8xbf16>, vector<8x8xbf16>, vector<8x8xf32> -> vector<8x8xf32>
    %cst_29 = arith.constant 0.353553385 : f32
    %105 = vector.broadcast %cst_29 : f32 to vector<8x8xf32>
    %106 = arith.mulf %104, %105 : vector<8x8xf32>
    %cst_30 = arith.constant dense<0xFF800000> : vector<8xf32>
    %107 = vector.multi_reduction <maximumf>, %106, %cst_30 [1] : vector<8x8xf32> to vector<8xf32>
    %108 = vector.shape_cast %107 : vector<8xf32> to vector<8x1xf32>
    %109 = vector.broadcast %108 : vector<8x1xf32> to vector<8x8xf32>
    %110 = arith.subf %106, %109 : vector<8x8xf32>
    %111 = math.exp %110 : vector<8x8xf32>
    %cst_31 = arith.constant dense<0.000000e+00> : vector<8xf32>
    %112 = vector.multi_reduction <add>, %111, %cst_31 [1] : vector<8x8xf32> to vector<8xf32>
    %113 = vector.shape_cast %112 : vector<8xf32> to vector<8x1xf32>
    %114 = tpu.reciprocal %113 {approx = true} : vector<8x1xf32> -> vector<8x1xf32>
    %115 = vector.broadcast %114 : vector<8x1xf32> to vector<8x8xf32>
    %116 = arith.mulf %111, %115 : vector<8x8xf32>
    %117 = arith.truncf %116 : vector<8x8xf32> to vector<8x8xbf16>
    %cst_32 = arith.constant dense<0.000000e+00> : vector<8x8xf32>
    %118 = tpu.matmul %117, %103, %cst_32 {dimension_numbers = #tpu.dot_dimension_numbers<[1], [0], [0], [1], [0, 0, 1, 1], [], []>} : vector<8x8xbf16>, vector<8x8xbf16>, vector<8x8xf32> -> vector<8x8xf32>
    %119 = vector.extract_strided_slice %11 {offsets = [8, 8], sizes = [8, 8], strides = [1, 1]} : vector<16x96xf32> to vector<8x8xf32>
    %120 = arith.truncf %119 : vector<8x8xf32> to vector<8x8xbf16>
    %121 = vector.extract_strided_slice %12 {offsets = [8, 8], sizes = [8, 8], strides = [1, 1]} : vector<16x64xf32> to vector<8x8xf32>
    %122 = arith.truncf %121 : vector<8x8xf32> to vector<8x8xbf16>
    %123 = vector.extract_strided_slice %12 {offsets = [8, 40], sizes = [8, 8], strides = [1, 1]} : vector<16x64xf32> to vector<8x8xf32>
    %124 = arith.truncf %123 : vector<8x8xf32> to vector<8x8xbf16>
    %cst_33 = arith.constant dense<0.000000e+00> : vector<8x8xf32>
    %125 = tpu.matmul %120, %122, %cst_33 {dimension_numbers = #tpu.dot_dimension_numbers<[1], [1], [0], [0], [0, 0, 1, 0], [], []>} : vector<8x8xbf16>, vector<8x8xbf16>, vector<8x8xf32> -> vector<8x8xf32>
    %cst_34 = arith.constant 0.353553385 : f32
    %126 = vector.broadcast %cst_34 : f32 to vector<8x8xf32>
    %127 = arith.mulf %125, %126 : vector<8x8xf32>
    %cst_35 = arith.constant dense<0xFF800000> : vector<8xf32>
    %128 = vector.multi_reduction <maximumf>, %127, %cst_35 [1] : vector<8x8xf32> to vector<8xf32>
    %129 = vector.shape_cast %128 : vector<8xf32> to vector<8x1xf32>
    %130 = vector.broadcast %129 : vector<8x1xf32> to vector<8x8xf32>
    %131 = arith.subf %127, %130 : vector<8x8xf32>
    %132 = math.exp %131 : vector<8x8xf32>
    %cst_36 = arith.constant dense<0.000000e+00> : vector<8xf32>
    %133 = vector.multi_reduction <add>, %132, %cst_36 [1] : vector<8x8xf32> to vector<8xf32>
    %134 = vector.shape_cast %133 : vector<8xf32> to vector<8x1xf32>
    %135 = tpu.reciprocal %134 {approx = true} : vector<8x1xf32> -> vector<8x1xf32>
    %136 = vector.broadcast %135 : vector<8x1xf32> to vector<8x8xf32>
    %137 = arith.mulf %132, %136 : vector<8x8xf32>
    %138 = arith.truncf %137 : vector<8x8xf32> to vector<8x8xbf16>
    %cst_37 = arith.constant dense<0.000000e+00> : vector<8x8xf32>
    %139 = tpu.matmul %138, %124, %cst_37 {dimension_numbers = #tpu.dot_dimension_numbers<[1], [0], [0], [1], [0, 0, 1, 1], [], []>} : vector<8x8xbf16>, vector<8x8xbf16>, vector<8x8xf32> -> vector<8x8xf32>
    %140 = vector.extract_strided_slice %11 {offsets = [8, 16], sizes = [8, 8], strides = [1, 1]} : vector<16x96xf32> to vector<8x8xf32>
    %141 = arith.truncf %140 : vector<8x8xf32> to vector<8x8xbf16>
    %142 = vector.extract_strided_slice %12 {offsets = [8, 16], sizes = [8, 8], strides = [1, 1]} : vector<16x64xf32> to vector<8x8xf32>
    %143 = arith.truncf %142 : vector<8x8xf32> to vector<8x8xbf16>
    %144 = vector.extract_strided_slice %12 {offsets = [8, 48], sizes = [8, 8], strides = [1, 1]} : vector<16x64xf32> to vector<8x8xf32>
    %145 = arith.truncf %144 : vector<8x8xf32> to vector<8x8xbf16>
    %cst_38 = arith.constant dense<0.000000e+00> : vector<8x8xf32>
    %146 = tpu.matmul %141, %143, %cst_38 {dimension_numbers = #tpu.dot_dimension_numbers<[1], [1], [0], [0], [0, 0, 1, 0], [], []>} : vector<8x8xbf16>, vector<8x8xbf16>, vector<8x8xf32> -> vector<8x8xf32>
    %cst_39 = arith.constant 0.353553385 : f32
    %147 = vector.broadcast %cst_39 : f32 to vector<8x8xf32>
    %148 = arith.mulf %146, %147 : vector<8x8xf32>
    %cst_40 = arith.constant dense<0xFF800000> : vector<8xf32>
    %149 = vector.multi_reduction <maximumf>, %148, %cst_40 [1] : vector<8x8xf32> to vector<8xf32>
    %150 = vector.shape_cast %149 : vector<8xf32> to vector<8x1xf32>
    %151 = vector.broadcast %150 : vector<8x1xf32> to vector<8x8xf32>
    %152 = arith.subf %148, %151 : vector<8x8xf32>
    %153 = math.exp %152 : vector<8x8xf32>
    %cst_41 = arith.constant dense<0.000000e+00> : vector<8xf32>
    %154 = vector.multi_reduction <add>, %153, %cst_41 [1] : vector<8x8xf32> to vector<8xf32>
    %155 = vector.shape_cast %154 : vector<8xf32> to vector<8x1xf32>
    %156 = tpu.reciprocal %155 {approx = true} : vector<8x1xf32> -> vector<8x1xf32>
    %157 = vector.broadcast %156 : vector<8x1xf32> to vector<8x8xf32>
    %158 = arith.mulf %153, %157 : vector<8x8xf32>
    %159 = arith.truncf %158 : vector<8x8xf32> to vector<8x8xbf16>
    %cst_42 = arith.constant dense<0.000000e+00> : vector<8x8xf32>
    %160 = tpu.matmul %159, %145, %cst_42 {dimension_numbers = #tpu.dot_dimension_numbers<[1], [0], [0], [1], [0, 0, 1, 1], [], []>} : vector<8x8xbf16>, vector<8x8xbf16>, vector<8x8xf32> -> vector<8x8xf32>
    %161 = vector.extract_strided_slice %11 {offsets = [8, 24], sizes = [8, 8], strides = [1, 1]} : vector<16x96xf32> to vector<8x8xf32>
    %162 = arith.truncf %161 : vector<8x8xf32> to vector<8x8xbf16>
    %163 = vector.extract_strided_slice %12 {offsets = [8, 24], sizes = [8, 8], strides = [1, 1]} : vector<16x64xf32> to vector<8x8xf32>
    %164 = arith.truncf %163 : vector<8x8xf32> to vector<8x8xbf16>
    %165 = vector.extract_strided_slice %12 {offsets = [8, 56], sizes = [8, 8], strides = [1, 1]} : vector<16x64xf32> to vector<8x8xf32>
    %166 = arith.truncf %165 : vector<8x8xf32> to vector<8x8xbf16>
    %cst_43 = arith.constant dense<0.000000e+00> : vector<8x8xf32>
    %167 = tpu.matmul %162, %164, %cst_43 {dimension_numbers = #tpu.dot_dimension_numbers<[1], [1], [0], [0], [0, 0, 1, 0], [], []>} : vector<8x8xbf16>, vector<8x8xbf16>, vector<8x8xf32> -> vector<8x8xf32>
    %cst_44 = arith.constant 0.353553385 : f32
    %168 = vector.broadcast %cst_44 : f32 to vector<8x8xf32>
    %169 = arith.mulf %167, %168 : vector<8x8xf32>
    %cst_45 = arith.constant dense<0xFF800000> : vector<8xf32>
    %170 = vector.multi_reduction <maximumf>, %169, %cst_45 [1] : vector<8x8xf32> to vector<8xf32>
    %171 = vector.shape_cast %170 : vector<8xf32> to vector<8x1xf32>
    %172 = vector.broadcast %171 : vector<8x1xf32> to vector<8x8xf32>
    %173 = arith.subf %169, %172 : vector<8x8xf32>
    %174 = math.exp %173 : vector<8x8xf32>
    %cst_46 = arith.constant dense<0.000000e+00> : vector<8xf32>
    %175 = vector.multi_reduction <add>, %174, %cst_46 [1] : vector<8x8xf32> to vector<8xf32>
    %176 = vector.shape_cast %175 : vector<8xf32> to vector<8x1xf32>
    %177 = tpu.reciprocal %176 {approx = true} : vector<8x1xf32> -> vector<8x1xf32>
    %178 = vector.broadcast %177 : vector<8x1xf32> to vector<8x8xf32>
    %179 = arith.mulf %174, %178 : vector<8x8xf32>
    %180 = arith.truncf %179 : vector<8x8xf32> to vector<8x8xbf16>
    %cst_47 = arith.constant dense<0.000000e+00> : vector<8x8xf32>
    %181 = tpu.matmul %180, %166, %cst_47 {dimension_numbers = #tpu.dot_dimension_numbers<[1], [0], [0], [1], [0, 0, 1, 1], [], []>} : vector<8x8xbf16>, vector<8x8xbf16>, vector<8x8xf32> -> vector<8x8xf32>
    %182 = tpu.concatenate %118, %139, %160, %181 in 1 : vector<8x8xf32>, vector<8x8xf32>, vector<8x8xf32>, vector<8x8xf32> -> vector<8x32xf32>
    %183 = tpu.concatenate %97, %182 in 0 : vector<8x32xf32>, vector<8x32xf32> -> vector<16x32xf32>
    %c0_48 = arith.constant 0 : index
    %c0_49 = arith.constant 0 : index
    %c0_50 = arith.constant 0 : index
    %184 = vector.load %arg5[%c0_48, %c0_49, %c0_50] : memref<1x32x32xbf16, #tpu.memory_space<vmem>>, vector<1x32x32xbf16>
    %185 = vector.shape_cast %184 : vector<1x32x32xbf16> to vector<32x32xbf16>
    %186 = arith.truncf %183 : vector<16x32xf32> to vector<16x32xbf16>
    %cst_51 = arith.constant dense<0.000000e+00> : vector<16x32xf32>
    %187 = tpu.matmul %186, %185, %cst_51 {dimension_numbers = #tpu.dot_dimension_numbers<[1], [0], [0], [1], [0, 0, 1, 1], [], []>} : vector<16x32xbf16>, vector<32x32xbf16>, vector<16x32xf32> -> vector<16x32xf32>
    %c0_52 = arith.constant 0 : index
    %c0_53 = arith.constant 0 : index
    %c0_54 = arith.constant 0 : index
    %188 = vector.load %arg6[%c0_52, %c0_53, %c0_54] : memref<1x1x32xf32, #tpu.memory_space<vmem>>, vector<1x1x32xf32>
    %189 = vector.shape_cast %188 : vector<1x1x32xf32> to vector<1x32xf32>
    %190 = vector.broadcast %189 : vector<1x32xf32> to vector<16x32xf32>
    %191 = arith.addf %187, %190 : vector<16x32xf32>
    %192 = arith.addf %3, %191 : vector<16x32xf32>
    %c0_55 = arith.constant 0 : index
    %c0_56 = arith.constant 0 : index
    %c0_57 = arith.constant 0 : index
    %193 = vector.load %arg7[%c0_55, %c0_56, %c0_57] : memref<1x1x32xf32, #tpu.memory_space<vmem>>, vector<1x1x32xf32>
    %194 = vector.shape_cast %193 : vector<1x1x32xf32> to vector<1x32xf32>
    %c0_58 = arith.constant 0 : index
    %c0_59 = arith.constant 0 : index
    %c0_60 = arith.constant 0 : index
    %195 = vector.load %arg8[%c0_58, %c0_59, %c0_60] : memref<1x1x32xf32, #tpu.memory_space<vmem>>, vector<1x1x32xf32>
    %196 = vector.shape_cast %195 : vector<1x1x32xf32> to vector<1x32xf32>
    %cst_61 = arith.constant dense<0.000000e+00> : vector<16xf32>
    %197 = vector.multi_reduction <add>, %192, %cst_61 [1] : vector<16x32xf32> to vector<16xf32>
    %198 = vector.shape_cast %197 : vector<16xf32> to vector<16x1xf32>
    %cst_62 = arith.constant 3.200000e+01 : f32
    %199 = vector.broadcast %cst_62 : f32 to vector<16x1xf32>
    %200 = arith.divf %198, %199 : vector<16x1xf32>
    %201 = vector.broadcast %200 : vector<16x1xf32> to vector<16x32xf32>
    %202 = arith.subf %192, %201 : vector<16x32xf32>
    %203 = arith.mulf %202, %202 : vector<16x32xf32>
    %cst_63 = arith.constant dense<0.000000e+00> : vector<16xf32>
    %204 = vector.multi_reduction <add>, %203, %cst_63 [1] : vector<16x32xf32> to vector<16xf32>
    %205 = vector.shape_cast %204 : vector<16xf32> to vector<16x1xf32>
    %cst_64 = arith.constant 3.200000e+01 : f32
    %206 = vector.broadcast %cst_64 : f32 to vector<16x1xf32>
    %207 = arith.divf %205, %206 : vector<16x1xf32>
    %cst_65 = arith.constant 9.99999974E-6 : f32
    %208 = vector.broadcast %cst_65 : f32 to vector<16x1xf32>
    %209 = arith.addf %207, %208 : vector<16x1xf32>
    %210 = math.rsqrt %209 : vector<16x1xf32>
    %211 = vector.broadcast %210 : vector<16x1xf32> to vector<16x32xf32>
    %212 = arith.mulf %202, %211 : vector<16x32xf32>
    %213 = vector.broadcast %194 : vector<1x32xf32> to vector<16x32xf32>
    %214 = arith.mulf %212, %213 : vector<16x32xf32>
    %215 = vector.broadcast %196 : vector<1x32xf32> to vector<16x32xf32>
    %216 = arith.addf %214, %215 : vector<16x32xf32>
    %c0_66 = arith.constant 0 : index
    %c0_67 = arith.constant 0 : index
    %c0_68 = arith.constant 0 : index
    %217 = vector.load %arg9[%c0_66, %c0_67, %c0_68] : memref<1x32x32xbf16, #tpu.memory_space<vmem>>, vector<1x32x32xbf16>
    %218 = vector.shape_cast %217 : vector<1x32x32xbf16> to vector<32x32xbf16>
    %219 = arith.truncf %216 : vector<16x32xf32> to vector<16x32xbf16>
    %cst_69 = arith.constant dense<0.000000e+00> : vector<16x32xf32>
    %220 = tpu.matmul %219, %218, %cst_69 {dimension_numbers = #tpu.dot_dimension_numbers<[1], [0], [0], [1], [0, 0, 1, 1], [], []>} : vector<16x32xbf16>, vector<32x32xbf16>, vector<16x32xf32> -> vector<16x32xf32>
    %c0_70 = arith.constant 0 : index
    %c0_71 = arith.constant 0 : index
    %c0_72 = arith.constant 0 : index
    %221 = vector.load %arg10[%c0_70, %c0_71, %c0_72] : memref<1x1x32xf32, #tpu.memory_space<vmem>>, vector<1x1x32xf32>
    %222 = vector.shape_cast %221 : vector<1x1x32xf32> to vector<1x32xf32>
    %223 = vector.broadcast %222 : vector<1x32xf32> to vector<16x32xf32>
    %224 = arith.addf %220, %223 : vector<16x32xf32>
    %c0_73 = arith.constant 0 : index
    %c0_74 = arith.constant 0 : index
    %225 = vector.load %arg2[%c0_73, %c0_74] : memref<16x32xf32, #tpu.memory_space<vmem>>, vector<16x32xf32>
    %c0_75 = arith.constant 0 : index
    %c0_76 = arith.constant 0 : index
    %c0_77 = arith.constant 0 : index
    %226 = vector.load %arg11[%c0_75, %c0_76, %c0_77] : memref<1x32x64xbf16, #tpu.memory_space<vmem>>, vector<1x32x64xbf16>
    %227 = vector.shape_cast %226 : vector<1x32x64xbf16> to vector<32x64xbf16>
    %228 = arith.truncf %225 : vector<16x32xf32> to vector<16x32xbf16>
    %cst_78 = arith.constant dense<0.000000e+00> : vector<16x64xf32>
    %229 = tpu.matmul %228, %227, %cst_78 {dimension_numbers = #tpu.dot_dimension_numbers<[1], [0], [0], [1], [0, 0, 1, 1], [], []>} : vector<16x32xbf16>, vector<32x64xbf16>, vector<16x64xf32> -> vector<16x64xf32>
    %c0_79 = arith.constant 0 : index
    %c0_80 = arith.constant 0 : index
    %c0_81 = arith.constant 0 : index
    %230 = vector.load %arg12[%c0_79, %c0_80, %c0_81] : memref<1x1x64xf32, #tpu.memory_space<vmem>>, vector<1x1x64xf32>
    %231 = vector.shape_cast %230 : vector<1x1x64xf32> to vector<1x64xf32>
    %232 = vector.broadcast %231 : vector<1x64xf32> to vector<16x64xf32>
    %233 = arith.addf %229, %232 : vector<16x64xf32>
    %234 = tpu.iota {dimensions = array<i32: 1>} : vector<8x8xi32>
    %c6_i32 = arith.constant 6 : i32
    %235 = vector.broadcast %c6_i32 : i32 to vector<8x8xi32>
    %236 = arith.cmpi slt, %234, %235 : vector<8x8xi32>
    %237 = vector.extract_strided_slice %224 {offsets = [0, 0], sizes = [8, 8], strides = [1, 1]} : vector<16x32xf32> to vector<8x8xf32>
    %238 = arith.truncf %237 : vector<8x8xf32> to vector<8x8xbf16>
    %239 = vector.extract_strided_slice %233 {offsets = [0, 0], sizes = [8, 8], strides = [1, 1]} : vector<16x64xf32> to vector<8x8xf32>
    %240 = arith.truncf %239 : vector<8x8xf32> to vector<8x8xbf16>
    %241 = vector.extract_strided_slice %233 {offsets = [0, 32], sizes = [8, 8], strides = [1, 1]} : vector<16x64xf32> to vector<8x8xf32>
    %242 = arith.truncf %241 : vector<8x8xf32> to vector<8x8xbf16>
    %cst_82 = arith.constant dense<0.000000e+00> : vector<8x8xf32>
    %243 = tpu.matmul %238, %240, %cst_82 {dimension_numbers = #tpu.dot_dimension_numbers<[1], [1], [0], [0], [0, 0, 1, 0], [], []>} : vector<8x8xbf16>, vector<8x8xbf16>, vector<8x8xf32> -> vector<8x8xf32>
    %cst_83 = arith.constant 0.353553385 : f32
    %244 = vector.broadcast %cst_83 : f32 to vector<8x8xf32>
    %245 = arith.mulf %243, %244 : vector<8x8xf32>
    %cst_84 = arith.constant -1.000000e+30 : f32
    %246 = vector.broadcast %cst_84 : f32 to vector<8x8xf32>
    %247 = arith.select %236, %245, %246 : vector<8x8xi1>, vector<8x8xf32>
    %cst_85 = arith.constant dense<0xFF800000> : vector<8xf32>
    %248 = vector.multi_reduction <maximumf>, %247, %cst_85 [1] : vector<8x8xf32> to vector<8xf32>
    %249 = vector.shape_cast %248 : vector<8xf32> to vector<8x1xf32>
    %250 = vector.broadcast %249 : vector<8x1xf32> to vector<8x8xf32>
    %251 = arith.subf %247, %250 : vector<8x8xf32>
    %252 = math.exp %251 : vector<8x8xf32>
    %cst_86 = arith.constant dense<0.000000e+00> : vector<8xf32>
    %253 = vector.multi_reduction <add>, %252, %cst_86 [1] : vector<8x8xf32> to vector<8xf32>
    %254 = vector.shape_cast %253 : vector<8xf32> to vector<8x1xf32>
    %255 = tpu.reciprocal %254 {approx = true} : vector<8x1xf32> -> vector<8x1xf32>
    %256 = vector.broadcast %255 : vector<8x1xf32> to vector<8x8xf32>
    %257 = arith.mulf %252, %256 : vector<8x8xf32>
    %258 = arith.truncf %257 : vector<8x8xf32> to vector<8x8xbf16>
    %cst_87 = arith.constant dense<0.000000e+00> : vector<8x8xf32>
    %259 = tpu.matmul %258, %242, %cst_87 {dimension_numbers = #tpu.dot_dimension_numbers<[1], [0], [0], [1], [0, 0, 1, 1], [], []>} : vector<8x8xbf16>, vector<8x8xbf16>, vector<8x8xf32> -> vector<8x8xf32>
    %260 = vector.extract_strided_slice %224 {offsets = [0, 8], sizes = [8, 8], strides = [1, 1]} : vector<16x32xf32> to vector<8x8xf32>
    %261 = arith.truncf %260 : vector<8x8xf32> to vector<8x8xbf16>
    %262 = vector.extract_strided_slice %233 {offsets = [0, 8], sizes = [8, 8], strides = [1, 1]} : vector<16x64xf32> to vector<8x8xf32>
    %263 = arith.truncf %262 : vector<8x8xf32> to vector<8x8xbf16>
    %264 = vector.extract_strided_slice %233 {offsets = [0, 40], sizes = [8, 8], strides = [1, 1]} : vector<16x64xf32> to vector<8x8xf32>
    %265 = arith.truncf %264 : vector<8x8xf32> to vector<8x8xbf16>
    %cst_88 = arith.constant dense<0.000000e+00> : vector<8x8xf32>
    %266 = tpu.matmul %261, %263, %cst_88 {dimension_numbers = #tpu.dot_dimension_numbers<[1], [1], [0], [0], [0, 0, 1, 0], [], []>} : vector<8x8xbf16>, vector<8x8xbf16>, vector<8x8xf32> -> vector<8x8xf32>
    %cst_89 = arith.constant 0.353553385 : f32
    %267 = vector.broadcast %cst_89 : f32 to vector<8x8xf32>
    %268 = arith.mulf %266, %267 : vector<8x8xf32>
    %cst_90 = arith.constant -1.000000e+30 : f32
    %269 = vector.broadcast %cst_90 : f32 to vector<8x8xf32>
    %270 = arith.select %236, %268, %269 : vector<8x8xi1>, vector<8x8xf32>
    %cst_91 = arith.constant dense<0xFF800000> : vector<8xf32>
    %271 = vector.multi_reduction <maximumf>, %270, %cst_91 [1] : vector<8x8xf32> to vector<8xf32>
    %272 = vector.shape_cast %271 : vector<8xf32> to vector<8x1xf32>
    %273 = vector.broadcast %272 : vector<8x1xf32> to vector<8x8xf32>
    %274 = arith.subf %270, %273 : vector<8x8xf32>
    %275 = math.exp %274 : vector<8x8xf32>
    %cst_92 = arith.constant dense<0.000000e+00> : vector<8xf32>
    %276 = vector.multi_reduction <add>, %275, %cst_92 [1] : vector<8x8xf32> to vector<8xf32>
    %277 = vector.shape_cast %276 : vector<8xf32> to vector<8x1xf32>
    %278 = tpu.reciprocal %277 {approx = true} : vector<8x1xf32> -> vector<8x1xf32>
    %279 = vector.broadcast %278 : vector<8x1xf32> to vector<8x8xf32>
    %280 = arith.mulf %275, %279 : vector<8x8xf32>
    %281 = arith.truncf %280 : vector<8x8xf32> to vector<8x8xbf16>
    %cst_93 = arith.constant dense<0.000000e+00> : vector<8x8xf32>
    %282 = tpu.matmul %281, %265, %cst_93 {dimension_numbers = #tpu.dot_dimension_numbers<[1], [0], [0], [1], [0, 0, 1, 1], [], []>} : vector<8x8xbf16>, vector<8x8xbf16>, vector<8x8xf32> -> vector<8x8xf32>
    %283 = vector.extract_strided_slice %224 {offsets = [0, 16], sizes = [8, 8], strides = [1, 1]} : vector<16x32xf32> to vector<8x8xf32>
    %284 = arith.truncf %283 : vector<8x8xf32> to vector<8x8xbf16>
    %285 = vector.extract_strided_slice %233 {offsets = [0, 16], sizes = [8, 8], strides = [1, 1]} : vector<16x64xf32> to vector<8x8xf32>
    %286 = arith.truncf %285 : vector<8x8xf32> to vector<8x8xbf16>
    %287 = vector.extract_strided_slice %233 {offsets = [0, 48], sizes = [8, 8], strides = [1, 1]} : vector<16x64xf32> to vector<8x8xf32>
    %288 = arith.truncf %287 : vector<8x8xf32> to vector<8x8xbf16>
    %cst_94 = arith.constant dense<0.000000e+00> : vector<8x8xf32>
    %289 = tpu.matmul %284, %286, %cst_94 {dimension_numbers = #tpu.dot_dimension_numbers<[1], [1], [0], [0], [0, 0, 1, 0], [], []>} : vector<8x8xbf16>, vector<8x8xbf16>, vector<8x8xf32> -> vector<8x8xf32>
    %cst_95 = arith.constant 0.353553385 : f32
    %290 = vector.broadcast %cst_95 : f32 to vector<8x8xf32>
    %291 = arith.mulf %289, %290 : vector<8x8xf32>
    %cst_96 = arith.constant -1.000000e+30 : f32
    %292 = vector.broadcast %cst_96 : f32 to vector<8x8xf32>
    %293 = arith.select %236, %291, %292 : vector<8x8xi1>, vector<8x8xf32>
    %cst_97 = arith.constant dense<0xFF800000> : vector<8xf32>
    %294 = vector.multi_reduction <maximumf>, %293, %cst_97 [1] : vector<8x8xf32> to vector<8xf32>
    %295 = vector.shape_cast %294 : vector<8xf32> to vector<8x1xf32>
    %296 = vector.broadcast %295 : vector<8x1xf32> to vector<8x8xf32>
    %297 = arith.subf %293, %296 : vector<8x8xf32>
    %298 = math.exp %297 : vector<8x8xf32>
    %cst_98 = arith.constant dense<0.000000e+00> : vector<8xf32>
    %299 = vector.multi_reduction <add>, %298, %cst_98 [1] : vector<8x8xf32> to vector<8xf32>
    %300 = vector.shape_cast %299 : vector<8xf32> to vector<8x1xf32>
    %301 = tpu.reciprocal %300 {approx = true} : vector<8x1xf32> -> vector<8x1xf32>
    %302 = vector.broadcast %301 : vector<8x1xf32> to vector<8x8xf32>
    %303 = arith.mulf %298, %302 : vector<8x8xf32>
    %304 = arith.truncf %303 : vector<8x8xf32> to vector<8x8xbf16>
    %cst_99 = arith.constant dense<0.000000e+00> : vector<8x8xf32>
    %305 = tpu.matmul %304, %288, %cst_99 {dimension_numbers = #tpu.dot_dimension_numbers<[1], [0], [0], [1], [0, 0, 1, 1], [], []>} : vector<8x8xbf16>, vector<8x8xbf16>, vector<8x8xf32> -> vector<8x8xf32>
    %306 = vector.extract_strided_slice %224 {offsets = [0, 24], sizes = [8, 8], strides = [1, 1]} : vector<16x32xf32> to vector<8x8xf32>
    %307 = arith.truncf %306 : vector<8x8xf32> to vector<8x8xbf16>
    %308 = vector.extract_strided_slice %233 {offsets = [0, 24], sizes = [8, 8], strides = [1, 1]} : vector<16x64xf32> to vector<8x8xf32>
    %309 = arith.truncf %308 : vector<8x8xf32> to vector<8x8xbf16>
    %310 = vector.extract_strided_slice %233 {offsets = [0, 56], sizes = [8, 8], strides = [1, 1]} : vector<16x64xf32> to vector<8x8xf32>
    %311 = arith.truncf %310 : vector<8x8xf32> to vector<8x8xbf16>
    %cst_100 = arith.constant dense<0.000000e+00> : vector<8x8xf32>
    %312 = tpu.matmul %307, %309, %cst_100 {dimension_numbers = #tpu.dot_dimension_numbers<[1], [1], [0], [0], [0, 0, 1, 0], [], []>} : vector<8x8xbf16>, vector<8x8xbf16>, vector<8x8xf32> -> vector<8x8xf32>
    %cst_101 = arith.constant 0.353553385 : f32
    %313 = vector.broadcast %cst_101 : f32 to vector<8x8xf32>
    %314 = arith.mulf %312, %313 : vector<8x8xf32>
    %cst_102 = arith.constant -1.000000e+30 : f32
    %315 = vector.broadcast %cst_102 : f32 to vector<8x8xf32>
    %316 = arith.select %236, %314, %315 : vector<8x8xi1>, vector<8x8xf32>
    %cst_103 = arith.constant dense<0xFF800000> : vector<8xf32>
    %317 = vector.multi_reduction <maximumf>, %316, %cst_103 [1] : vector<8x8xf32> to vector<8xf32>
    %318 = vector.shape_cast %317 : vector<8xf32> to vector<8x1xf32>
    %319 = vector.broadcast %318 : vector<8x1xf32> to vector<8x8xf32>
    %320 = arith.subf %316, %319 : vector<8x8xf32>
    %321 = math.exp %320 : vector<8x8xf32>
    %cst_104 = arith.constant dense<0.000000e+00> : vector<8xf32>
    %322 = vector.multi_reduction <add>, %321, %cst_104 [1] : vector<8x8xf32> to vector<8xf32>
    %323 = vector.shape_cast %322 : vector<8xf32> to vector<8x1xf32>
    %324 = tpu.reciprocal %323 {approx = true} : vector<8x1xf32> -> vector<8x1xf32>
    %325 = vector.broadcast %324 : vector<8x1xf32> to vector<8x8xf32>
    %326 = arith.mulf %321, %325 : vector<8x8xf32>
    %327 = arith.truncf %326 : vector<8x8xf32> to vector<8x8xbf16>
    %cst_105 = arith.constant dense<0.000000e+00> : vector<8x8xf32>
    %328 = tpu.matmul %327, %311, %cst_105 {dimension_numbers = #tpu.dot_dimension_numbers<[1], [0], [0], [1], [0, 0, 1, 1], [], []>} : vector<8x8xbf16>, vector<8x8xbf16>, vector<8x8xf32> -> vector<8x8xf32>
    %329 = tpu.concatenate %259, %282, %305, %328 in 1 : vector<8x8xf32>, vector<8x8xf32>, vector<8x8xf32>, vector<8x8xf32> -> vector<8x32xf32>
    %330 = vector.extract_strided_slice %224 {offsets = [8, 0], sizes = [8, 8], strides = [1, 1]} : vector<16x32xf32> to vector<8x8xf32>
    %331 = arith.truncf %330 : vector<8x8xf32> to vector<8x8xbf16>
    %332 = vector.extract_strided_slice %233 {offsets = [8, 0], sizes = [8, 8], strides = [1, 1]} : vector<16x64xf32> to vector<8x8xf32>
    %333 = arith.truncf %332 : vector<8x8xf32> to vector<8x8xbf16>
    %334 = vector.extract_strided_slice %233 {offsets = [8, 32], sizes = [8, 8], strides = [1, 1]} : vector<16x64xf32> to vector<8x8xf32>
    %335 = arith.truncf %334 : vector<8x8xf32> to vector<8x8xbf16>
    %cst_106 = arith.constant dense<0.000000e+00> : vector<8x8xf32>
    %336 = tpu.matmul %331, %333, %cst_106 {dimension_numbers = #tpu.dot_dimension_numbers<[1], [1], [0], [0], [0, 0, 1, 0], [], []>} : vector<8x8xbf16>, vector<8x8xbf16>, vector<8x8xf32> -> vector<8x8xf32>
    %cst_107 = arith.constant 0.353553385 : f32
    %337 = vector.broadcast %cst_107 : f32 to vector<8x8xf32>
    %338 = arith.mulf %336, %337 : vector<8x8xf32>
    %cst_108 = arith.constant -1.000000e+30 : f32
    %339 = vector.broadcast %cst_108 : f32 to vector<8x8xf32>
    %340 = arith.select %236, %338, %339 : vector<8x8xi1>, vector<8x8xf32>
    %cst_109 = arith.constant dense<0xFF800000> : vector<8xf32>
    %341 = vector.multi_reduction <maximumf>, %340, %cst_109 [1] : vector<8x8xf32> to vector<8xf32>
    %342 = vector.shape_cast %341 : vector<8xf32> to vector<8x1xf32>
    %343 = vector.broadcast %342 : vector<8x1xf32> to vector<8x8xf32>
    %344 = arith.subf %340, %343 : vector<8x8xf32>
    %345 = math.exp %344 : vector<8x8xf32>
    %cst_110 = arith.constant dense<0.000000e+00> : vector<8xf32>
    %346 = vector.multi_reduction <add>, %345, %cst_110 [1] : vector<8x8xf32> to vector<8xf32>
    %347 = vector.shape_cast %346 : vector<8xf32> to vector<8x1xf32>
    %348 = tpu.reciprocal %347 {approx = true} : vector<8x1xf32> -> vector<8x1xf32>
    %349 = vector.broadcast %348 : vector<8x1xf32> to vector<8x8xf32>
    %350 = arith.mulf %345, %349 : vector<8x8xf32>
    %351 = arith.truncf %350 : vector<8x8xf32> to vector<8x8xbf16>
    %cst_111 = arith.constant dense<0.000000e+00> : vector<8x8xf32>
    %352 = tpu.matmul %351, %335, %cst_111 {dimension_numbers = #tpu.dot_dimension_numbers<[1], [0], [0], [1], [0, 0, 1, 1], [], []>} : vector<8x8xbf16>, vector<8x8xbf16>, vector<8x8xf32> -> vector<8x8xf32>
    %353 = vector.extract_strided_slice %224 {offsets = [8, 8], sizes = [8, 8], strides = [1, 1]} : vector<16x32xf32> to vector<8x8xf32>
    %354 = arith.truncf %353 : vector<8x8xf32> to vector<8x8xbf16>
    %355 = vector.extract_strided_slice %233 {offsets = [8, 8], sizes = [8, 8], strides = [1, 1]} : vector<16x64xf32> to vector<8x8xf32>
    %356 = arith.truncf %355 : vector<8x8xf32> to vector<8x8xbf16>
    %357 = vector.extract_strided_slice %233 {offsets = [8, 40], sizes = [8, 8], strides = [1, 1]} : vector<16x64xf32> to vector<8x8xf32>
    %358 = arith.truncf %357 : vector<8x8xf32> to vector<8x8xbf16>
    %cst_112 = arith.constant dense<0.000000e+00> : vector<8x8xf32>
    %359 = tpu.matmul %354, %356, %cst_112 {dimension_numbers = #tpu.dot_dimension_numbers<[1], [1], [0], [0], [0, 0, 1, 0], [], []>} : vector<8x8xbf16>, vector<8x8xbf16>, vector<8x8xf32> -> vector<8x8xf32>
    %cst_113 = arith.constant 0.353553385 : f32
    %360 = vector.broadcast %cst_113 : f32 to vector<8x8xf32>
    %361 = arith.mulf %359, %360 : vector<8x8xf32>
    %cst_114 = arith.constant -1.000000e+30 : f32
    %362 = vector.broadcast %cst_114 : f32 to vector<8x8xf32>
    %363 = arith.select %236, %361, %362 : vector<8x8xi1>, vector<8x8xf32>
    %cst_115 = arith.constant dense<0xFF800000> : vector<8xf32>
    %364 = vector.multi_reduction <maximumf>, %363, %cst_115 [1] : vector<8x8xf32> to vector<8xf32>
    %365 = vector.shape_cast %364 : vector<8xf32> to vector<8x1xf32>
    %366 = vector.broadcast %365 : vector<8x1xf32> to vector<8x8xf32>
    %367 = arith.subf %363, %366 : vector<8x8xf32>
    %368 = math.exp %367 : vector<8x8xf32>
    %cst_116 = arith.constant dense<0.000000e+00> : vector<8xf32>
    %369 = vector.multi_reduction <add>, %368, %cst_116 [1] : vector<8x8xf32> to vector<8xf32>
    %370 = vector.shape_cast %369 : vector<8xf32> to vector<8x1xf32>
    %371 = tpu.reciprocal %370 {approx = true} : vector<8x1xf32> -> vector<8x1xf32>
    %372 = vector.broadcast %371 : vector<8x1xf32> to vector<8x8xf32>
    %373 = arith.mulf %368, %372 : vector<8x8xf32>
    %374 = arith.truncf %373 : vector<8x8xf32> to vector<8x8xbf16>
    %cst_117 = arith.constant dense<0.000000e+00> : vector<8x8xf32>
    %375 = tpu.matmul %374, %358, %cst_117 {dimension_numbers = #tpu.dot_dimension_numbers<[1], [0], [0], [1], [0, 0, 1, 1], [], []>} : vector<8x8xbf16>, vector<8x8xbf16>, vector<8x8xf32> -> vector<8x8xf32>
    %376 = vector.extract_strided_slice %224 {offsets = [8, 16], sizes = [8, 8], strides = [1, 1]} : vector<16x32xf32> to vector<8x8xf32>
    %377 = arith.truncf %376 : vector<8x8xf32> to vector<8x8xbf16>
    %378 = vector.extract_strided_slice %233 {offsets = [8, 16], sizes = [8, 8], strides = [1, 1]} : vector<16x64xf32> to vector<8x8xf32>
    %379 = arith.truncf %378 : vector<8x8xf32> to vector<8x8xbf16>
    %380 = vector.extract_strided_slice %233 {offsets = [8, 48], sizes = [8, 8], strides = [1, 1]} : vector<16x64xf32> to vector<8x8xf32>
    %381 = arith.truncf %380 : vector<8x8xf32> to vector<8x8xbf16>
    %cst_118 = arith.constant dense<0.000000e+00> : vector<8x8xf32>
    %382 = tpu.matmul %377, %379, %cst_118 {dimension_numbers = #tpu.dot_dimension_numbers<[1], [1], [0], [0], [0, 0, 1, 0], [], []>} : vector<8x8xbf16>, vector<8x8xbf16>, vector<8x8xf32> -> vector<8x8xf32>
    %cst_119 = arith.constant 0.353553385 : f32
    %383 = vector.broadcast %cst_119 : f32 to vector<8x8xf32>
    %384 = arith.mulf %382, %383 : vector<8x8xf32>
    %cst_120 = arith.constant -1.000000e+30 : f32
    %385 = vector.broadcast %cst_120 : f32 to vector<8x8xf32>
    %386 = arith.select %236, %384, %385 : vector<8x8xi1>, vector<8x8xf32>
    %cst_121 = arith.constant dense<0xFF800000> : vector<8xf32>
    %387 = vector.multi_reduction <maximumf>, %386, %cst_121 [1] : vector<8x8xf32> to vector<8xf32>
    %388 = vector.shape_cast %387 : vector<8xf32> to vector<8x1xf32>
    %389 = vector.broadcast %388 : vector<8x1xf32> to vector<8x8xf32>
    %390 = arith.subf %386, %389 : vector<8x8xf32>
    %391 = math.exp %390 : vector<8x8xf32>
    %cst_122 = arith.constant dense<0.000000e+00> : vector<8xf32>
    %392 = vector.multi_reduction <add>, %391, %cst_122 [1] : vector<8x8xf32> to vector<8xf32>
    %393 = vector.shape_cast %392 : vector<8xf32> to vector<8x1xf32>
    %394 = tpu.reciprocal %393 {approx = true} : vector<8x1xf32> -> vector<8x1xf32>
    %395 = vector.broadcast %394 : vector<8x1xf32> to vector<8x8xf32>
    %396 = arith.mulf %391, %395 : vector<8x8xf32>
    %397 = arith.truncf %396 : vector<8x8xf32> to vector<8x8xbf16>
    %cst_123 = arith.constant dense<0.000000e+00> : vector<8x8xf32>
    %398 = tpu.matmul %397, %381, %cst_123 {dimension_numbers = #tpu.dot_dimension_numbers<[1], [0], [0], [1], [0, 0, 1, 1], [], []>} : vector<8x8xbf16>, vector<8x8xbf16>, vector<8x8xf32> -> vector<8x8xf32>
    %399 = vector.extract_strided_slice %224 {offsets = [8, 24], sizes = [8, 8], strides = [1, 1]} : vector<16x32xf32> to vector<8x8xf32>
    %400 = arith.truncf %399 : vector<8x8xf32> to vector<8x8xbf16>
    %401 = vector.extract_strided_slice %233 {offsets = [8, 24], sizes = [8, 8], strides = [1, 1]} : vector<16x64xf32> to vector<8x8xf32>
    %402 = arith.truncf %401 : vector<8x8xf32> to vector<8x8xbf16>
    %403 = vector.extract_strided_slice %233 {offsets = [8, 56], sizes = [8, 8], strides = [1, 1]} : vector<16x64xf32> to vector<8x8xf32>
    %404 = arith.truncf %403 : vector<8x8xf32> to vector<8x8xbf16>
    %cst_124 = arith.constant dense<0.000000e+00> : vector<8x8xf32>
    %405 = tpu.matmul %400, %402, %cst_124 {dimension_numbers = #tpu.dot_dimension_numbers<[1], [1], [0], [0], [0, 0, 1, 0], [], []>} : vector<8x8xbf16>, vector<8x8xbf16>, vector<8x8xf32> -> vector<8x8xf32>
    %cst_125 = arith.constant 0.353553385 : f32
    %406 = vector.broadcast %cst_125 : f32 to vector<8x8xf32>
    %407 = arith.mulf %405, %406 : vector<8x8xf32>
    %cst_126 = arith.constant -1.000000e+30 : f32
    %408 = vector.broadcast %cst_126 : f32 to vector<8x8xf32>
    %409 = arith.select %236, %407, %408 : vector<8x8xi1>, vector<8x8xf32>
    %cst_127 = arith.constant dense<0xFF800000> : vector<8xf32>
    %410 = vector.multi_reduction <maximumf>, %409, %cst_127 [1] : vector<8x8xf32> to vector<8xf32>
    %411 = vector.shape_cast %410 : vector<8xf32> to vector<8x1xf32>
    %412 = vector.broadcast %411 : vector<8x1xf32> to vector<8x8xf32>
    %413 = arith.subf %409, %412 : vector<8x8xf32>
    %414 = math.exp %413 : vector<8x8xf32>
    %cst_128 = arith.constant dense<0.000000e+00> : vector<8xf32>
    %415 = vector.multi_reduction <add>, %414, %cst_128 [1] : vector<8x8xf32> to vector<8xf32>
    %416 = vector.shape_cast %415 : vector<8xf32> to vector<8x1xf32>
    %417 = tpu.reciprocal %416 {approx = true} : vector<8x1xf32> -> vector<8x1xf32>
    %418 = vector.broadcast %417 : vector<8x1xf32> to vector<8x8xf32>
    %419 = arith.mulf %414, %418 : vector<8x8xf32>
    %420 = arith.truncf %419 : vector<8x8xf32> to vector<8x8xbf16>
    %cst_129 = arith.constant dense<0.000000e+00> : vector<8x8xf32>
    %421 = tpu.matmul %420, %404, %cst_129 {dimension_numbers = #tpu.dot_dimension_numbers<[1], [0], [0], [1], [0, 0, 1, 1], [], []>} : vector<8x8xbf16>, vector<8x8xbf16>, vector<8x8xf32> -> vector<8x8xf32>
    %422 = tpu.concatenate %352, %375, %398, %421 in 1 : vector<8x8xf32>, vector<8x8xf32>, vector<8x8xf32>, vector<8x8xf32> -> vector<8x32xf32>
    %423 = tpu.concatenate %329, %422 in 0 : vector<8x32xf32>, vector<8x32xf32> -> vector<16x32xf32>
    %c0_130 = arith.constant 0 : index
    %c0_131 = arith.constant 0 : index
    %c0_132 = arith.constant 0 : index
    %424 = vector.load %arg13[%c0_130, %c0_131, %c0_132] : memref<1x32x32xbf16, #tpu.memory_space<vmem>>, vector<1x32x32xbf16>
    %425 = vector.shape_cast %424 : vector<1x32x32xbf16> to vector<32x32xbf16>
    %426 = arith.truncf %423 : vector<16x32xf32> to vector<16x32xbf16>
    %cst_133 = arith.constant dense<0.000000e+00> : vector<16x32xf32>
    %427 = tpu.matmul %426, %425, %cst_133 {dimension_numbers = #tpu.dot_dimension_numbers<[1], [0], [0], [1], [0, 0, 1, 1], [], []>} : vector<16x32xbf16>, vector<32x32xbf16>, vector<16x32xf32> -> vector<16x32xf32>
    %c0_134 = arith.constant 0 : index
    %c0_135 = arith.constant 0 : index
    %c0_136 = arith.constant 0 : index
    %428 = vector.load %arg14[%c0_134, %c0_135, %c0_136] : memref<1x1x32xf32, #tpu.memory_space<vmem>>, vector<1x1x32xf32>
    %429 = vector.shape_cast %428 : vector<1x1x32xf32> to vector<1x32xf32>
    %430 = vector.broadcast %429 : vector<1x32xf32> to vector<16x32xf32>
    %431 = arith.addf %427, %430 : vector<16x32xf32>
    %432 = arith.addf %216, %431 : vector<16x32xf32>
    %c0_137 = arith.constant 0 : index
    %c0_138 = arith.constant 0 : index
    %c0_139 = arith.constant 0 : index
    %433 = vector.load %arg15[%c0_137, %c0_138, %c0_139] : memref<1x1x32xf32, #tpu.memory_space<vmem>>, vector<1x1x32xf32>
    %434 = vector.shape_cast %433 : vector<1x1x32xf32> to vector<1x32xf32>
    %c0_140 = arith.constant 0 : index
    %c0_141 = arith.constant 0 : index
    %c0_142 = arith.constant 0 : index
    %435 = vector.load %arg16[%c0_140, %c0_141, %c0_142] : memref<1x1x32xf32, #tpu.memory_space<vmem>>, vector<1x1x32xf32>
    %436 = vector.shape_cast %435 : vector<1x1x32xf32> to vector<1x32xf32>
    %cst_143 = arith.constant dense<0.000000e+00> : vector<16xf32>
    %437 = vector.multi_reduction <add>, %432, %cst_143 [1] : vector<16x32xf32> to vector<16xf32>
    %438 = vector.shape_cast %437 : vector<16xf32> to vector<16x1xf32>
    %cst_144 = arith.constant 3.200000e+01 : f32
    %439 = vector.broadcast %cst_144 : f32 to vector<16x1xf32>
    %440 = arith.divf %438, %439 : vector<16x1xf32>
    %441 = vector.broadcast %440 : vector<16x1xf32> to vector<16x32xf32>
    %442 = arith.subf %432, %441 : vector<16x32xf32>
    %443 = arith.mulf %442, %442 : vector<16x32xf32>
    %cst_145 = arith.constant dense<0.000000e+00> : vector<16xf32>
    %444 = vector.multi_reduction <add>, %443, %cst_145 [1] : vector<16x32xf32> to vector<16xf32>
    %445 = vector.shape_cast %444 : vector<16xf32> to vector<16x1xf32>
    %cst_146 = arith.constant 3.200000e+01 : f32
    %446 = vector.broadcast %cst_146 : f32 to vector<16x1xf32>
    %447 = arith.divf %445, %446 : vector<16x1xf32>
    %cst_147 = arith.constant 9.99999974E-6 : f32
    %448 = vector.broadcast %cst_147 : f32 to vector<16x1xf32>
    %449 = arith.addf %447, %448 : vector<16x1xf32>
    %450 = math.rsqrt %449 : vector<16x1xf32>
    %451 = vector.broadcast %450 : vector<16x1xf32> to vector<16x32xf32>
    %452 = arith.mulf %442, %451 : vector<16x32xf32>
    %453 = vector.broadcast %434 : vector<1x32xf32> to vector<16x32xf32>
    %454 = arith.mulf %452, %453 : vector<16x32xf32>
    %455 = vector.broadcast %436 : vector<1x32xf32> to vector<16x32xf32>
    %456 = arith.addf %454, %455 : vector<16x32xf32>
    %c0_148 = arith.constant 0 : index
    %c0_149 = arith.constant 0 : index
    %c0_150 = arith.constant 0 : index
    %457 = vector.load %arg17[%c0_148, %c0_149, %c0_150] : memref<1x32x2048xbf16, #tpu.memory_space<vmem>>, vector<1x32x2048xbf16>
    %458 = vector.shape_cast %457 : vector<1x32x2048xbf16> to vector<32x2048xbf16>
    %459 = arith.truncf %456 : vector<16x32xf32> to vector<16x32xbf16>
    %cst_151 = arith.constant dense<0.000000e+00> : vector<16x2048xf32>
    %460 = tpu.matmul %459, %458, %cst_151 {dimension_numbers = #tpu.dot_dimension_numbers<[1], [0], [0], [1], [0, 0, 1, 1], [], []>} : vector<16x32xbf16>, vector<32x2048xbf16>, vector<16x2048xf32> -> vector<16x2048xf32>
    %c0_152 = arith.constant 0 : index
    %c0_153 = arith.constant 0 : index
    %c0_154 = arith.constant 0 : index
    %461 = vector.load %arg18[%c0_152, %c0_153, %c0_154] : memref<1x1x2048xf32, #tpu.memory_space<vmem>>, vector<1x1x2048xf32>
    %462 = vector.shape_cast %461 : vector<1x1x2048xf32> to vector<1x2048xf32>
    %463 = vector.broadcast %462 : vector<1x2048xf32> to vector<16x2048xf32>
    %464 = arith.addf %460, %463 : vector<16x2048xf32>
    %cst_155 = arith.constant 0.000000e+00 : f32
    %465 = vector.broadcast %cst_155 : f32 to vector<16x2048xf32>
    %466 = arith.maximumf %464, %465 : vector<16x2048xf32>
    %c0_156 = arith.constant 0 : index
    %c0_157 = arith.constant 0 : index
    %c0_158 = arith.constant 0 : index
    %467 = vector.load %arg19[%c0_156, %c0_157, %c0_158] : memref<1x2048x32xbf16, #tpu.memory_space<vmem>>, vector<1x2048x32xbf16>
    %468 = vector.shape_cast %467 : vector<1x2048x32xbf16> to vector<2048x32xbf16>
    %469 = arith.truncf %466 : vector<16x2048xf32> to vector<16x2048xbf16>
    %cst_159 = arith.constant dense<0.000000e+00> : vector<16x32xf32>
    %470 = tpu.matmul %469, %468, %cst_159 {dimension_numbers = #tpu.dot_dimension_numbers<[1], [0], [0], [1], [0, 0, 1, 1], [], []>} : vector<16x2048xbf16>, vector<2048x32xbf16>, vector<16x32xf32> -> vector<16x32xf32>
    %c0_160 = arith.constant 0 : index
    %c0_161 = arith.constant 0 : index
    %c0_162 = arith.constant 0 : index
    %471 = vector.load %arg20[%c0_160, %c0_161, %c0_162] : memref<1x1x32xf32, #tpu.memory_space<vmem>>, vector<1x1x32xf32>
    %472 = vector.shape_cast %471 : vector<1x1x32xf32> to vector<1x32xf32>
    %473 = vector.broadcast %472 : vector<1x32xf32> to vector<16x32xf32>
    %474 = arith.addf %470, %473 : vector<16x32xf32>
    %475 = arith.addf %456, %474 : vector<16x32xf32>
    %c0_163 = arith.constant 0 : index
    %c0_164 = arith.constant 0 : index
    %c0_165 = arith.constant 0 : index
    %476 = vector.load %arg21[%c0_163, %c0_164, %c0_165] : memref<1x1x32xf32, #tpu.memory_space<vmem>>, vector<1x1x32xf32>
    %477 = vector.shape_cast %476 : vector<1x1x32xf32> to vector<1x32xf32>
    %c0_166 = arith.constant 0 : index
    %c0_167 = arith.constant 0 : index
    %c0_168 = arith.constant 0 : index
    %478 = vector.load %arg22[%c0_166, %c0_167, %c0_168] : memref<1x1x32xf32, #tpu.memory_space<vmem>>, vector<1x1x32xf32>
    %479 = vector.shape_cast %478 : vector<1x1x32xf32> to vector<1x32xf32>
    %cst_169 = arith.constant dense<0.000000e+00> : vector<16xf32>
    %480 = vector.multi_reduction <add>, %475, %cst_169 [1] : vector<16x32xf32> to vector<16xf32>
    %481 = vector.shape_cast %480 : vector<16xf32> to vector<16x1xf32>
    %cst_170 = arith.constant 3.200000e+01 : f32
    %482 = vector.broadcast %cst_170 : f32 to vector<16x1xf32>
    %483 = arith.divf %481, %482 : vector<16x1xf32>
    %484 = vector.broadcast %483 : vector<16x1xf32> to vector<16x32xf32>
    %485 = arith.subf %475, %484 : vector<16x32xf32>
    %486 = arith.mulf %485, %485 : vector<16x32xf32>
    %cst_171 = arith.constant dense<0.000000e+00> : vector<16xf32>
    %487 = vector.multi_reduction <add>, %486, %cst_171 [1] : vector<16x32xf32> to vector<16xf32>
    %488 = vector.shape_cast %487 : vector<16xf32> to vector<16x1xf32>
    %cst_172 = arith.constant 3.200000e+01 : f32
    %489 = vector.broadcast %cst_172 : f32 to vector<16x1xf32>
    %490 = arith.divf %488, %489 : vector<16x1xf32>
    %cst_173 = arith.constant 9.99999974E-6 : f32
    %491 = vector.broadcast %cst_173 : f32 to vector<16x1xf32>
    %492 = arith.addf %490, %491 : vector<16x1xf32>
    %493 = math.rsqrt %492 : vector<16x1xf32>
    %494 = vector.broadcast %493 : vector<16x1xf32> to vector<16x32xf32>
    %495 = arith.mulf %485, %494 : vector<16x32xf32>
    %496 = vector.broadcast %477 : vector<1x32xf32> to vector<16x32xf32>
    %497 = arith.mulf %495, %496 : vector<16x32xf32>
    %498 = vector.broadcast %479 : vector<1x32xf32> to vector<16x32xf32>
    %499 = arith.addf %497, %498 : vector<16x32xf32>
    %c0_174 = arith.constant 0 : index
    %c0_175 = arith.constant 0 : index
    %500 = vector.load %arg26[%c0_174, %c0_175] : memref<16x32xf32, #tpu.memory_space<vmem>>, vector<16x32xf32>
    tpu.vector_store %arg26[%c0_174, %c0_175], %499 {strides = array<i32>} : memref<16x32xf32, #tpu.memory_space<vmem>>, vector<16x32xf32>,
    %c1_i32 = arith.constant 1 : i32
    %501 = arith.cmpi eq, %arg0, %c1_i32 : i32
    %502 = arith.extui %501 : i1 to i32
    %c0_i32_176 = arith.constant 0 : i32
    %503 = arith.cmpi ne, %502, %c0_i32_176 : i32
    scf.if %503 {
      %c0_177 = arith.constant 0 : index
      %c0_178 = arith.constant 0 : index
      %504 = vector.load %arg23[%c0_177, %c0_178] : memref<32x128xbf16, #tpu.memory_space<vmem>>, vector<32x128xbf16>
      %505 = arith.truncf %499 : vector<16x32xf32> to vector<16x32xbf16>
      %cst_179 = arith.constant dense<0.000000e+00> : vector<16x128xf32>
      %506 = tpu.matmul %505, %504, %cst_179 {dimension_numbers = #tpu.dot_dimension_numbers<[1], [0], [0], [1], [0, 0, 1, 1], [], []>} : vector<16x32xbf16>, vector<32x128xbf16>, vector<16x128xf32> -> vector<16x128xf32>
      %c0_180 = arith.constant 0 : index
      %c0_181 = arith.constant 0 : index
      %507 = vector.load %arg24[%c0_180, %c0_181] : memref<1x128xf32, #tpu.memory_space<vmem>>, vector<1x128xf32>
      %508 = vector.broadcast %507 : vector<1x128xf32> to vector<16x128xf32>
      %509 = arith.addf %506, %508 : vector<16x128xf32>
      %c0_182 = arith.constant 0 : index
      %c0_183 = arith.constant 0 : index
      %510 = vector.load %arg25[%c0_182, %c0_183] : memref<16x128xf32, #tpu.memory_space<vmem>>, vector<16x128xf32>
      tpu.vector_store %arg25[%c0_182, %c0_183], %509 {strides = array<i32>} : memref<16x128xf32, #tpu.memory_space<vmem>>, vector<16x128xf32>,
    } else {
    }
    return
  }
  func.func @transform_0(%arg0: i32) -> (i32, i32) {
    %c0_i32 = arith.constant 0 : i32
    %c0_i32_0 = arith.constant 0 : i32
    %c0_i32_1 = arith.constant 0 : i32
    return %c0_i32, %c0_i32_0 : i32, i32
  }
  func.func @transform_1(%arg0: i32) -> (i32, i32) {
    %c0_i32 = arith.constant 0 : i32
    %c0_i32_0 = arith.constant 0 : i32
    %c0_i32_1 = arith.constant 0 : i32
    return %c0_i32, %c0_i32_0 : i32, i32
  }
  func.func @transform_2(%arg0: i32) -> (i32, i32, i32) {
    %c0_i32 = arith.constant 0 : i32
    %c0_i32_0 = arith.constant 0 : i32
    %c0_i32_1 = arith.constant 0 : i32
    return %arg0, %c0_i32, %c0_i32_0 : i32, i32, i32
  }
  func.func @transform_3(%arg0: i32) -> (i32, i32, i32) {
    %c0_i32 = arith.constant 0 : i32
    %c0_i32_0 = arith.constant 0 : i32
    %c0_i32_1 = arith.constant 0 : i32
    return %arg0, %c0_i32, %c0_i32_0 : i32, i32, i32
  }
  func.func @transform_4(%arg0: i32) -> (i32, i32, i32) {
    %c0_i32 = arith.constant 0 : i32
    %c0_i32_0 = arith.constant 0 : i32
    %c0_i32_1 = arith.constant 0 : i32
    return %arg0, %c0_i32, %c0_i32_0 : i32, i32, i32
  }
  func.func @transform_5(%arg0: i32) -> (i32, i32, i32) {
    %c0_i32 = arith.constant 0 : i32
    %c0_i32_0 = arith.constant 0 : i32
    %c0_i32_1 = arith.constant 0 : i32
    return %arg0, %c0_i32, %c0_i32_0 : i32, i32, i32
  }
  func.func @transform_6(%arg0: i32) -> (i32, i32, i32) {
    %c0_i32 = arith.constant 0 : i32
    %c0_i32_0 = arith.constant 0 : i32
    %c0_i32_1 = arith.constant 0 : i32
    return %arg0, %c0_i32, %c0_i32_0 : i32, i32, i32
  }
  func.func @transform_7(%arg0: i32) -> (i32, i32, i32) {
    %c0_i32 = arith.constant 0 : i32
    %c0_i32_0 = arith.constant 0 : i32
    %c0_i32_1 = arith.constant 0 : i32
    return %arg0, %c0_i32, %c0_i32_0 : i32, i32, i32
  }
  func.func @transform_8(%arg0: i32) -> (i32, i32, i32) {
    %c0_i32 = arith.constant 0 : i32
    %c0_i32_0 = arith.constant 0 : i32
    %c0_i32_1 = arith.constant 0 : i32
    return %arg0, %c0_i32, %c0_i32_0 : i32, i32, i32
  }
  func.func @transform_9(%arg0: i32) -> (i32, i32, i32) {
    %c0_i32 = arith.constant 0 : i32
    %c0_i32_0 = arith.constant 0 : i32
    %c0_i32_1 = arith.constant 0 : i32
    return %arg0, %c0_i32, %c0_i32_0 : i32, i32, i32
  }
  func.func @transform_10(%arg0: i32) -> (i32, i32, i32) {
    %c0_i32 = arith.constant 0 : i32
    %c0_i32_0 = arith.constant 0 : i32
    %c0_i32_1 = arith.constant 0 : i32
    return %arg0, %c0_i32, %c0_i32_0 : i32, i32, i32
  }
  func.func @transform_11(%arg0: i32) -> (i32, i32, i32) {
    %c0_i32 = arith.constant 0 : i32
    %c0_i32_0 = arith.constant 0 : i32
    %c0_i32_1 = arith.constant 0 : i32
    return %arg0, %c0_i32, %c0_i32_0 : i32, i32, i32
  }
  func.func @transform_12(%arg0: i32) -> (i32, i32, i32) {
    %c0_i32 = arith.constant 0 : i32
    %c0_i32_0 = arith.constant 0 : i32
    %c0_i32_1 = arith.constant 0 : i32
    return %arg0, %c0_i32, %c0_i32_0 : i32, i32, i32
  }
  func.func @transform_13(%arg0: i32) -> (i32, i32, i32) {
    %c0_i32 = arith.constant 0 : i32
    %c0_i32_0 = arith.constant 0 : i32
    %c0_i32_1 = arith.constant 0 : i32
    return %arg0, %c0_i32, %c0_i32_0 : i32, i32, i32
  }
  func.func @transform_14(%arg0: i32) -> (i32, i32, i32) {
    %c0_i32 = arith.constant 0 : i32
    %c0_i32_0 = arith.constant 0 : i32
    %c0_i32_1 = arith.constant 0 : i32
    return %arg0, %c0_i32, %c0_i32_0 : i32, i32, i32
  }
  func.func @transform_15(%arg0: i32) -> (i32, i32, i32) {
    %c0_i32 = arith.constant 0 : i32
    %c0_i32_0 = arith.constant 0 : i32
    %c0_i32_1 = arith.constant 0 : i32
    return %arg0, %c0_i32, %c0_i32_0 : i32, i32, i32
  }
  func.func @transform_16(%arg0: i32) -> (i32, i32, i32) {
    %c0_i32 = arith.constant 0 : i32
    %c0_i32_0 = arith.constant 0 : i32
    %c0_i32_1 = arith.constant 0 : i32
    return %arg0, %c0_i32, %c0_i32_0 : i32, i32, i32
  }
  func.func @transform_17(%arg0: i32) -> (i32, i32, i32) {
    %c0_i32 = arith.constant 0 : i32
    %c0_i32_0 = arith.constant 0 : i32
    %c0_i32_1 = arith.constant 0 : i32
    return %arg0, %c0_i32, %c0_i32_0 : i32, i32, i32
  }
  func.func @transform_18(%arg0: i32) -> (i32, i32, i32) {
    %c0_i32 = arith.constant 0 : i32
    %c0_i32_0 = arith.constant 0 : i32
    %c0_i32_1 = arith.constant 0 : i32
    return %arg0, %c0_i32, %c0_i32_0 : i32, i32, i32
  }
  func.func @transform_19(%arg0: i32) -> (i32, i32, i32) {
    %c0_i32 = arith.constant 0 : i32
    %c0_i32_0 = arith.constant 0 : i32
    %c0_i32_1 = arith.constant 0 : i32
    return %arg0, %c0_i32, %c0_i32_0 : i32, i32, i32
  }
  func.func @transform_20(%arg0: i32) -> (i32, i32, i32) {
    %c0_i32 = arith.constant 0 : i32
    %c0_i32_0 = arith.constant 0 : i32
    %c0_i32_1 = arith.constant 0 : i32
    return %arg0, %c0_i32, %c0_i32_0 : i32, i32, i32
  }
  func.func @transform_21(%arg0: i32) -> (i32, i32, i32) {
    %c0_i32 = arith.constant 0 : i32
    %c0_i32_0 = arith.constant 0 : i32
    %c0_i32_1 = arith.constant 0 : i32
    return %arg0, %c0_i32, %c0_i32_0 : i32, i32, i32
  }
  func.func @transform_22(%arg0: i32) -> (i32, i32) {
    %c0_i32 = arith.constant 0 : i32
    %c0_i32_0 = arith.constant 0 : i32
    %c0_i32_1 = arith.constant 0 : i32
    return %c0_i32, %c0_i32_0 : i32, i32
  }
  func.func @transform_23(%arg0: i32) -> (i32, i32) {
    %c0_i32 = arith.constant 0 : i32
    %c0_i32_0 = arith.constant 0 : i32
    %c0_i32_1 = arith.constant 0 : i32
    return %c0_i32, %c0_i32_0 : i32, i32
  }
  func.func @transform_24(%arg0: i32) -> (i32, i32) {
    %c0_i32 = arith.constant 0 : i32
    %c0_i32_0 = arith.constant 0 : i32
    %c0_i32_1 = arith.constant 0 : i32
    return %c0_i32, %c0_i32_0 : i32, i32
  }
}

</mosaic_0001>

<bundles_post_ra>
// kernel: tpu_custom_call.1
= control target key start
LH: loop header
LB: loop body
LE: loop exit
PB: predicated region body
PF: predicated region fallthrough
CT: control target
= control target key end

     0   :  { %s6520_s0 = inlined_call_operand.vmem [shape: f32[16,32], index: 0, kind: input, shape index: {}]   ;;  %s6521_s1 = inlined_call_operand.vmem [shape: f32[16,32], index: 1, kind: input, shape index: {}]   ;;  %s6522_s2 = inlined_call_operand.vmem [shape: bf16[2,32,96], index: 2, kind: input, shape index: {}]   ;;  %s6523_s3 = inlined_call_operand.vmem [shape: f32[2,1,96], index: 3, kind: input, shape index: {}]   ;;  %s6524_s4 = inlined_call_operand.vmem [shape: bf16[2,32,32], index: 4, kind: input, shape index: {}]   ;;  %s6525_s5 = inlined_call_operand.vmem [shape: f32[2,1,32], index: 5, kind: input, shape index: {}]   ;;  %s6526_s6 = inlined_call_operand.vmem [shape: f32[2,1,32], index: 6, kind: input, shape index: {}]   ;;  %s6527_s7 = inlined_call_operand.vmem [shape: f32[2,1,32], index: 7, kind: input, shape index: {}]   ;;  %s6528_s8 = inlined_call_operand.vmem [shape: bf16[2,32,32], index: 8, kind: input, shape index: {}]   ;;  %s6529_s9 = inlined_call_operand.vmem [shape: f32[2,1,32], index: 9, kind: input, shape index: {}]   ;;  %s6530_s10 = inlined_call_operand.vmem [shape: bf16[2,32,64], index: 10, kind: input, shape index: {}]   ;;  %s6531_s11 = inlined_call_operand.vmem [shape: f32[2,1,64], index: 11, kind: input, shape index: {}]   ;;  %s6532_s12 = inlined_call_operand.vmem [shape: bf16[2,32,32], index: 12, kind: input, shape index: {}]   ;;  %s6533_s13 = inlined_call_operand.vmem [shape: f32[2,1,32], index: 13, kind: input, shape index: {}]   ;;  %s6534_s14 = inlined_call_operand.vmem [shape: f32[2,1,32], index: 14, kind: input, shape index: {}]   ;;  %s6535_s15 = inlined_call_operand.vmem [shape: f32[2,1,32], index: 15, kind: input, shape index: {}]   ;;  %s6536_s16 = inlined_call_operand.vmem [shape: bf16[2,32,2048], index: 16, kind: input, shape index: {}]   ;;  %s6537_s17 = inlined_call_operand.vmem [shape: f32[2,1,2048], index: 17, kind: input, shape index: {}]   ;;  %s6538_s18 = inlined_call_operand.vmem [shape: bf16[2,2048,32], index: 18, kind: input, shape index: {}]   ;;  %s6539_s19 = inlined_call_operand.vmem [shape: f32[2,1,32], index: 19, kind: input, shape index: {}]   ;;  %s6540_s20 = inlined_call_operand.vmem [shape: f32[2,1,32], index: 20, kind: input, shape index: {}]   ;;  %s6541_s21 = inlined_call_operand.vmem [shape: f32[2,1,32], index: 21, kind: input, shape index: {}]   ;;  %s6542_s22 = inlined_call_operand.vmem [shape: bf16[32,128], index: 22, kind: input, shape index: {}]   ;;  %s6543_s23 = inlined_call_operand.vmem [shape: f32[1,128], index: 23, kind: input, shape index: {}]   ;;  %s6544_s24 = inlined_call_operand.hbm [shape: f32[16,128], index: 24, kind: output, shape index: {}]  }
   0x1   :  { %6551 = sst [smem:[#allocation9_spill]] %s6520_s0 }
   0x2   :  { %6552 = sst [smem:[#allocation10_spill]] %s6521_s1 }
   0x3   :  { %6553 = sst [smem:[#allocation11_spill]] %s6522_s2 }
   0x4   :  { %6554 = sst [smem:[#allocation12_spill]] %s6523_s3 }
   0x5   :  { %6555 = sst [smem:[#allocation13_spill]] %s6524_s4 }
   0x6   :  { %6556 = sst [smem:[#allocation14_spill]] %s6525_s5 }
   0x7   :  { %6557 = sst [smem:[#allocation15_spill]] %s6526_s6 }
   0x8   :  { %6558 = sst [smem:[#allocation16_spill]] %s6527_s7 }
   0x9   :  { %6559 = sst [smem:[#allocation17_spill]] %s6528_s8 }
   0xa   :  { %6560 = sst [smem:[#allocation18_spill]] %s6530_s10 }
   0xb   :  { %6561 = sst [smem:[#allocation19_spill]] %s6532_s12 }
   0xc   :  { %6562 = sst [smem:[#allocation20_spill]] %s6535_s15 }
   0xd   :  { %6563 = sst [smem:[#allocation21_spill]] %s6536_s16 }
   0xe   :  { %6564 = sst [smem:[#allocation22_spill]] %s6537_s17 }
   0xf   :  { %6565 = sst [smem:[#allocation23_spill]] %s6538_s18 }
  0x10   :  { %6566 = sst [smem:[#allocation24_spill]] %s6540_s20 }
  0x11   :  { %6567 = sst [smem:[#allocation25_spill]] %s6541_s21 }
  0x12   :  { %6568 = sst [smem:[#allocation26_spill]] %s6542_s22 }
  0x13   :  { %6569 = sst [smem:[#allocation27_spill]] %s6543_s23 }
  0x14   :  { %6570 = sst [smem:[#allocation28_spill]] %s6544_s24 }
  0x15   :  { %29 = vsyncpa [#allocation4], 0  ;;  %s5726_s5 = smov 0  }
  0x16 LB: > { %6571 = sst [smem:[#allocation6_spill]] %s5582_s5  ;;  %s5732_s26 = sadd.s32 4294967295, %s5582_s5   ;;  %s5582_s5 = sphi %s5726_s5, %s35_s5  }
  0x17   : > { %6572 = sst [smem:[#allocation7_spill]] %s5732_s26  ;;  %p4449_p0 = scmp.ge.s32.totalorder %s5582_s5, 1 }
  0x18   : > { %p823_p1 = scmp.lt.s32.totalorder %s5582_s5, 3 }
  0x1a   : > { %p824_p2 = pnand %p4449_p0, %p823_p1 }
  0x1c   : > { %827 = sbr.rel (%p824_p2) target bundleno = 3636 (0xe34), region = 116 }
  0x21   : > { %p954_p3 = scmp.lt.s32.totalorder %s5732_s26, 1  ;;  %s6574_s3 = sld [smem:[#allocation11_spill]] }
  0x22   : > { %s6575_s1 = sld [smem:[#allocation13_spill]] }
  0x23   : > { %s5738_s27 = scalar_select %p954_p3, %s5732_s26, 1 }
  0x24   : > { %s6580_s8 = sld [smem:[#allocation17_spill]] }
  0x25   : > { %s5213_s28 = sshll.u32 %s5738_s27, 4  ;;  %s6581_s10 = sld [smem:[#allocation18_spill]] }
  0x26   : > { %s6582_s12 = sld [smem:[#allocation19_spill]]  ;;  %s5218_s26 = sshll.u32 %s5738_s27, 8 }
  0x27   : > { %s958_s25 = scalar_lea.vmem %s6574_s3, %s5213_s28  ;;  %s6584_s16 = sld [smem:[#allocation21_spill]] }
  0x28   : > { %s5751_s5 = scalar_lea.vmem %s6575_s1, %s5213_s28  ;;  %s6585_s17 = sld [smem:[#allocation22_spill]] }
  0x29   : > { %6576 = sst [smem:[#allocation8_spill]] %s5751_s5  ;;  %s5219_s3 = sshll.u32 %s5738_s27, 10 }
  0x2a   : > { %s5768_s4 = scalar_lea.vmem %s6580_s8, %s5213_s28  ;;  %s1022_s5 = scalar_lea.vmem %s6539_s19, %s5738_s27 }
  0x2b   : > { %s5777_s20 = scalar_lea.vmem %s6581_s10, %s5213_s28  ;;  %s6586_s22 = sld [smem:[#allocation23_spill]] }
  0x2c   : > { %s5786_s30 = scalar_lea.vmem %s6582_s12, %s5213_s28 }
  0x2d   : > { %s5804_s2 = scalar_lea.vmem %s6584_s16, %s5218_s26 }
  0x2e   : > { %s5809_s10 = scalar_lea.vmem %s6585_s17, %s5213_s28  ;;  %s6589_s28 = sld [smem:[#allocation7_spill]] }
  0x31   : > { %s5819_s24 = scalar_lea.vmem %s6586_s22, %s5219_s3 }
  0x34   : > { %p4465_p4 = scmp.ne.s32.totalorder %s6589_s28, 0 }
  0x35   : > { %s6590_s7 = sld [smem:[#allocation9_spill]] (!%p4465_p4) }
  0x36   : > { %1033 = sbr.rel (%p4465_p4) target bundleno = 62 (0x3e), region = 120 }
  0x3b   : > { %v1034_v0 = vld [vmem:[%s6590_s7] sm:$0xff]  ;;  %vm1036_vm0 = vcmask 261120   ;;  %v1035_v1 = vld [vmem:[%s6590_s7 + $0x8] sm:$0xff] }
  0x3c   : > { %1037 = vst.msk [vmem:[#allocation2] sm:$0xff] %vm1036_vm0, %v1034_v0 }
  0x3d   : > { %1038 = vst.msk [vmem:[#allocation2 + $0x8] sm:$0xff] %vm1036_vm0, %v1035_v1 }
  0x3e PF: > { %v5221_v2 = vld [vmem:[%s958_s25 + $0x8] sm:$0xff]  ;;  %v5220_v3 = vld [vmem:[%s958_s25] sm:$0xff]  ;;  %vm1062_vm1 = vcmask 261120   ;;  %s6591_s16 = sld [smem:[#allocation12_spill]]  ;;  %s5584_s25 = smov 104   ;;  %vm1084_vm2 = vcmask 64512  }
  0x3f   : > { %1072 = vmatpush.bf16.msra.mxu0 %v5221_v2  ;;  %s5585_s6 = smov 120   ;;  %s5586_s3 = smov 96   ;;  %vm1122_vm3 = vcmask 1043456   ;;  %vm1323_vm4 = vcmask 130048   ;;  %vm1325_vm5 = vcmask 195584  }
  0x40   : > { %s5587_s1 = smov 80   ;;  %s5588_s22 = smov 72  }
  0x41   : > { %s5589_s18 = smov 88   ;;  %s5590_s21 = smov 112  }
  0x42   : > { %s5591_s28 = smov 56   ;;  %s5592_s29 = smov 64  }
  0x43   : > { %v5836_v4 = vld [vmem:[#allocation2] sm:$0xff]  ;;  %1073 = vmatpush.bf16.msra.mxu0 %v5220_v3  ;;  %s5593_s8 = smov 48   ;;  %s5594_s23 = smov 40  }
  0x44   : > { %v5838_v5 = vld [vmem:[#allocation2 + $0x8] sm:$0xff]  ;;  %s6592_s17 = scalar_lea.vmem %s6591_s16, %s5738_s27  ;;  %s6593_s12 = sld [smem:[#allocation8_spill]] }
  0x45   : > { %v1045_v6 = vpack.c.bf16 %v5838_v5, %v5836_v4  ;;  %v5453_v7 = vld [vmem:[%s6592_s17] ss:$0 sm:$0xff]  ;;  %s5595_s15 = smov 8   ;;  %s5596_s16 = smov 16  }
  0x46   : > { %s5597_s17 = smov 24   ;;  %s6600_s0 = sld [smem:[#allocation16_spill]] }
  0x47   : > { %4474 = vmatmul.msk.bf16.vlgmr.msra.gmra.mxu0 %vm1062_vm1, %v1045_v6 }
  0x4c   : > { %s6601_s26 = scalar_lea.vmem %s6600_s0, %s5738_s27  ;;  %s6611_s0 = sld [smem:[#allocation7_spill]] }
  0x52   : > { %p5199_p5 = scmp.ne.s32.totalorder %s6611_s0, 1 }
  0xc4   : > { %v1075_v8 = vpop.f32.mrf.mxu0 }
  0xc5   : > { %v1076_v9 = vadd.f32 %v5453_v7, %v1075_v8 }
  0xc7   : > { %v5848_v10 = vpack.c.bf16 %v1076_v9, %v1076_v9 }
  0xc9   : > { %1253 = vrot.lane.b32.xlu2 %v5848_v10, %s5584_s25  ;;  %1139 = vrot.lane.b32.xlu1 %v5848_v10, %s5585_s6 }
  0xca   : > { %1082 = vrot.lane.b32.xlu0 %v5848_v10, %s5586_s3 }
  0xcc   : > { %v1077_v11 = vpop.f32.mrf.mxu0 }
  0xcd   : > { %v1078_v12 = vadd.f32 %v5453_v7, %v1077_v11 }
  0xcf   : > { %v5862_v13 = vpack.c.bf16 %v1078_v12, %v1078_v12 }
  0xd1   : > { %1198 = vrot.lane.b32.xlu2 %v5848_v10, %s5587_s1  ;;  %1255 = vrot.lane.b32.xlu1 %v5848_v10, %s5588_s22 }
  0xd2   : > { %1141 = vrot.lane.b32.xlu0 %v5848_v10, %s5589_s18 }
  0xd9   : > { %1384 = vrot.lane.b32.xlu2 %v5862_v13, %s5585_s6  ;;  %1196 = vrot.lane.b32.xlu1 %v5848_v10, %s5590_s21 }
  0xda   : > { %1386 = vrot.lane.b32.xlu0 %v5862_v13, %s5589_s18 }
  0xe1   : > { %1498 = vrot.lane.b32.xlu2 %v5862_v13, %s5584_s25  ;;  %1500 = vrot.lane.b32.xlu1 %v5862_v13, %s5588_s22 }
  0xe2   : > { %1329 = vrot.lane.b32.xlu0 %v5862_v13, %s5586_s3 }
  0xe9   : > { %1441 = vrot.lane.b32.xlu1 %v5862_v13, %s5590_s21 }
  0xea   : > { %1443 = vrot.lane.b32.xlu0 %v5862_v13, %s5587_s1 }
  0xf1   : > { %1175 = vrot.lane.b32.xlu1 %v5848_v10, %s5591_s28 }
 0x123   : > { %v1254_v14 = vpop.permute.xlu2 %1253 }
 0x12b   : > { %v1199_v15 = vpop.permute.xlu2 %1198 }
 0x12c   : > { %v1204_v16 = vsel %vm1084_vm2, %v1199_v15, 0 }
 0x12d   : > { %1213 = vmatpush.bf16.xpose.msrb.mxu0 %v1204_v16 }
 0x133   : > { %v1385_v33 = vpop.permute.xlu2 %1384 }
 0x13b   : > { %v1140_v17 = vpop.permute.xlu1 %1139  ;;  %v1499_v35 = vpop.permute.xlu2 %1498 }
 0x13c   : > { %v1083_v18 = vpop.permute.xlu0 %1082 }
 0x13d   : > { %v1089_v19 = vsel %vm1084_vm2, %v1083_v18, 0 }
 0x13e   : > { %1098 = vmatpush.bf16.xpose.msra.mxu1 %v1089_v19 }
 0x143   : > { %v1256_v20 = vpop.permute.xlu1 %1255 }
 0x144   : > { %v1142_v21 = vpop.permute.xlu0 %1141  ;;  %v1261_v22 = vsel %vm1084_vm2, %v1256_v20, 0 }
 0x145   : > { %4475 = vmatmul.msk.bf16.vlgmr.msra.gmra.mxu1 %vm1084_vm2, %v5848_v10  ;;  %v1147_v23 = vsel %vm1084_vm2, %v1142_v21, 0 }
 0x146   : > { %1156 = vmatpush.bf16.xpose.msra.mxu3 %v1147_v23 }
 0x14b   : > { %v1197_v24 = vpop.permute.xlu1 %1196 }
 0x14c   : > { %v1387_v25 = vpop.permute.xlu0 %1386  ;;  %4479 = vmatmul.msk.bf16.vlgmr.msrb.gmra.mxu0 %vm1084_vm2, %v1197_v24 }
 0x14d   : > { %v1392_v26 = vsel %vm1084_vm2, %v1387_v25, 0  ;;  %4477 = vmatmul.msk.bf16.vlgmr.msra.gmra.mxu3 %vm1084_vm2, %v1140_v17 }
 0x14e   : > { %1270 = vmatpush.bf16.xpose.msrb.mxu3 %v1261_v22 }
 0x153   : > { %v1501_v29 = vpop.permute.xlu1 %1500 }
 0x154   : > { %v1330_v27 = vpop.permute.xlu0 %1329  ;;  %v1506_v31 = vsel %vm1084_vm2, %v1501_v29, 0 }
 0x155   : > { %v1335_v28 = vsel %vm1084_vm2, %v1330_v27, 0 }
 0x156   : > { %1401 = vmatpush.bf16.xpose.msra.mxu3 %v1392_v26  ;;  %1344 = vmatpush.bf16.xpose.msra.mxu0 %v1335_v28 }
 0x15b   : > { %v1442_v34 = vpop.permute.xlu1 %1441 }
 0x15c   : > { %v1444_v30 = vpop.permute.xlu0 %1443 }
 0x15d   : > { %v1449_v32 = vsel %vm1084_vm2, %v1444_v30, 0  ;;  %4481 = vmatmul.msk.bf16.vlgmr.msrb.gmra.mxu3 %vm1084_vm2, %v1254_v14  ;;  %4483 = vmatmul.msk.bf16.vlgmr.msra.gmra.mxu0 %vm1084_vm2, %v5862_v13 }
 0x15e   : > { %1515 = vmatpush.bf16.xpose.msrb.mxu3 %v1506_v31  ;;  %1458 = vmatpush.bf16.xpose.msrb.mxu0 %v1449_v32 }
 0x163   : > { %v1176_v17 = vpop.permute.xlu1 %1175 }
 0x164   : > { %v1181_v22 = vsel %vm1122_vm3, %v1176_v17, 0 }
 0x16d   : > { %4485 = vmatmul.msk.bf16.vlgmr.msra.gmra.mxu3 %vm1084_vm2, %v1385_v33  ;;  %4487 = vmatmul.msk.bf16.vlgmr.msrb.gmra.mxu0 %vm1084_vm2, %v1442_v34 }
 0x17d   : > { %4489 = vmatmul.msk.bf16.vlgmr.msrb.gmra.mxu3 %vm1084_vm2, %v1499_v35 }
 0x1c2   : > { %v1100_v36 = vpop.f32.mrf.mxu1 }
 0x1c3   : > { %v1104_v37 = vmul.f32 0.35355338, %v1100_v36 }
 0x1c5   : > { %v1105_v38 = vsel %vm1084_vm2, %v1104_v37, -inf }
 0x1c6   : > { %1106 = vmax.xlane.f32.xlu2 %v1105_v38 }
 0x1c9   : > { %v1215_v39 = vpop.f32.mrf.mxu0 }
 0x1ca   : > { %v1102_v40 = vpop.f32.mrf.mxu1  ;;  %v1219_v41 = vmul.f32 0.35355338, %v1215_v39 }
 0x1cc   : > { %v1220_v42 = vsel %vm1084_vm2, %v1219_v41, -inf }
 0x1ce   : > { %1221 = vmax.xlane.f32.xlu2 %v1220_v42 }
 0x1d0   : > { %v1158_v43 = vpop.f32.mrf.mxu3 }
 0x1d1   : > { %v1162_v44 = vmul.f32 0.35355338, %v1158_v43  ;;  %v1217_v45 = vpop.f32.mrf.mxu0 }
 0x1d3   : > { %v1163_v46 = vsel %vm1084_vm2, %v1162_v44, -inf }
 0x1d4   : > { %1164 = vmax.xlane.f32.xlu0 %v1163_v46 }
 0x1d8   : > { %v1160_v47 = vpop.f32.mrf.mxu3 }
 0x1da   : > { %v1346_v48 = vpop.f32.mrf.mxu0 }
 0x1db   : > { %v5903_v49 = vmul.f32 0.35355338, %v1346_v48 }
 0x1dd   : > { %v1351_v50 = vsel %vm1084_vm2, %v5903_v49, -inf }
 0x1de   : > { %1352 = vmax.xlane.f32.xlu1 %v1351_v50 }
 0x1e0   : > { %v1272_v51 = vpop.f32.mrf.mxu3 }
 0x1e1   : > { %v5907_v52 = vmul.f32 0.35355338, %v1272_v51 }
 0x1e2   : > { %v1348_v53 = vpop.f32.mrf.mxu0 }
 0x1e3   : > { %v1277_v54 = vsel %vm1084_vm2, %v5907_v52, -inf }
 0x1e6   : > { %1117 = vrot.lane.b32.xlu2 %v5848_v10, %s5592_s29  ;;  %1278 = vmax.xlane.f32.xlu1 %v1277_v54 }
 0x1e8   : > { %v1274_v55 = vpop.f32.mrf.mxu3 }
 0x1ea   : > { %v1460_v56 = vpop.f32.mrf.mxu0 }
 0x1eb   : > { %v1464_v57 = vmul.f32 0.35355338, %v1460_v56 }
 0x1ed   : > { %v1465_v58 = vsel %vm1084_vm2, %v1464_v57, -inf }
 0x1ee   : > { %1466 = vmax.xlane.f32.xlu0 %v1465_v58 }
 0x1f0   : > { %v1403_v59 = vpop.f32.mrf.mxu3 }
 0x1f1   : > { %v1407_v2 = vmul.f32 0.35355338, %v1403_v59 }
 0x1f2   : > { %v1462_v60 = vpop.f32.mrf.mxu0 }
 0x1f3   : > { %v1408_v3 = vsel %vm1084_vm2, %v1407_v2, -inf }
 0x1f8   : > { %v1405_v61 = vpop.f32.mrf.mxu3 }
 0x1ff   : > { %1232 = vrot.lane.b32.xlu1 %v5848_v10, %s5593_s8 }
 0x200   : > { %v1517_v62 = vpop.f32.mrf.mxu3 }
 0x201   : > { %v1521_v63 = vmul.f32 0.35355338, %v1517_v62 }
 0x203   : > { %v1522_v0 = vsel %vm1084_vm2, %v1521_v63, -inf }
 0x204   : > { %1523 = vmax.xlane.f32.xlu0 %v1522_v0 }
 0x208   : > { %v1519_v1 = vpop.f32.mrf.mxu3 }
 0x20f   : > { %1409 = vmax.xlane.f32.xlu2 %v1408_v3 }
 0x239   : > { %v1107_v6 = vpop.xlane.xlu2 %1106 }
 0x23a   : > { %v1108_v7 = vsub.f32 %v1104_v37, %v1107_v6 }
 0x23c   : > { %v1109_v8 = vmul.f32 1.442695, %v1108_v7 }
 0x23e   : > { %5465 = vpow2.f32 %v1109_v8 }
 0x241   : > { %v1222_v9 = vpop.xlane.xlu2 %1221 }
 0x242   : > { %v1223_v11 = vsub.f32 %v1219_v41, %v1222_v9 }
 0x244   : > { %v5918_v12 = vpop.eup %5465  ;;  %v1224_v14 = vmul.f32 1.442695, %v1223_v11 }
 0x245   : > { %v1111_v15 = vsel %vm1084_vm2, %v5918_v12, 0.0 }
 0x246   : > { %5467 = vpow2.f32 %v1224_v14  ;;  %1112 = vadd.xlane.f32.xlu0 %v1111_v15 }
 0x247   : > { %v1165_v16 = vpop.xlane.xlu0 %1164 }
 0x248   : > { %v1166_v18 = vsub.f32 %v1162_v44, %v1165_v16 }
 0x249   : > { %v1118_v19 = vpop.permute.xlu2 %1117 }
 0x24a   : > { %v1167_v20 = vmul.f32 1.442695, %v1166_v18  ;;  %v1124_v21 = vsel %vm1122_vm3, %v1118_v19, 0 }
 0x24b   : > { %1133 = vmatpush.bf16.msra.mxu2 %v1124_v21 }
 0x24c   : > { %v5924_v23 = vpop.eup %5467  ;;  %5469 = vpow2.f32 %v1167_v20 }
 0x24d   : > { %v1226_v24 = vsel %vm1084_vm2, %v5924_v23, 0.0 }
 0x24e   : > { %1227 = vadd.xlane.f32.xlu2 %v1226_v24 }
 0x24f   : > { %1190 = vmatpush.bf16.msrb.mxu2 %v1181_v22 }
 0x251   : > { %v1353_v27 = vpop.xlane.xlu1 %1352 }
 0x252   : > { %v5928_v25 = vpop.eup %5469  ;;  %v1354_v30 = vsub.f32 %v5903_v49, %v1353_v27 }
 0x253   : > { %v1169_v26 = vsel %vm1084_vm2, %v5928_v25, 0.0 }
 0x254   : > { %1170 = vadd.xlane.f32.xlu1 %v1169_v26  ;;  %v1355_v32 = vmul.f32 1.442695, %v1354_v30 }
 0x256   : > { %5471 = vpow2.f32 %v1355_v32 }
 0x259   : > { %v1279_v28 = vpop.xlane.xlu1 %1278 }
 0x25a   : > { %1289 = vrot.lane.b32.xlu0 %v5848_v10, %s5594_s23  ;;  %v1280_v34 = vsub.f32 %v5907_v52, %v1279_v28 }
 0x25c   : > { %v1281_v35 = vmul.f32 1.442695, %v1280_v34  ;;  %v5472_v37 = vpop.eup %5471 }
 0x25d   : > { %v1357_v41 = vsel %vm1084_vm2, %v5472_v37, 0.0 }
 0x25e   : > { %5473 = vpow2.f32 %v1281_v35 }
 0x261   : > { %v1467_v33 = vpop.xlane.xlu0 %1466 }
 0x262   : > { %v1468_v10 = vsub.f32 %v1464_v57, %v1467_v33 }
 0x264   : > { %v1469_v38 = vmul.f32 1.442695, %v1468_v10  ;;  %v5474_v44 = vpop.eup %5473 }
 0x265   : > { %v1283_v47 = vsel %vm1084_vm2, %v5474_v44, 0.0 }
 0x266   : > { %1420 = vrot.lane.b32.xlu2 %v5862_v13, %s5591_s28  ;;  %5475 = vpow2.f32 %v1469_v38  ;;  %s6597_s28 = scalar_lea.vmem %s6531_s11, %s5738_s27 }
 0x26c   : > { %v5942_v46 = vpop.eup %5475 }
 0x26d   : > { %1363 = vrot.lane.b32.xlu1 %v5862_v13, %s5592_s29  ;;  %v1471_v48 = vsel %vm1084_vm2, %v5942_v46, 0.0  ;;  %s6596_s29 = sld [smem:[#allocation10_spill]] }
 0x271   : > { %v1233_v29 = vpop.permute.xlu1 %1232 }
 0x272   : > { %v1238_v31 = vsel %vm1122_vm3, %v1233_v29, 0 }
 0x273   : > { %1247 = vmatpush.bf16.msrb.mxu1 %v1238_v31 }
 0x277   : > { %v1524_v36 = vpop.xlane.xlu0 %1523 }
 0x278   : > { %v1525_v39 = vsub.f32 %v1521_v63, %v1524_v36 }
 0x27a   : > { %v1526_v43 = vmul.f32 1.442695, %v1525_v39 }
 0x27c   : > { %5477 = vpow2.f32 %v1526_v43 }
 0x282   : > { %v1410_v40 = vpop.xlane.xlu2 %1409  ;;  %v5947_v49 = vpop.eup %5477 }
 0x283   : > { %v1411_v42 = vsub.f32 %v1407_v2, %v1410_v40  ;;  %v1528_v51 = vsel %vm1084_vm2, %v5947_v49, 0.0 }
 0x284   : > { %1358 = vadd.xlane.f32.xlu0 %v1357_v41 }
 0x285   : > { %v1412_v45 = vmul.f32 1.442695, %v1411_v42 }
 0x287   : > { %5479 = vpow2.f32 %v1412_v45 }
 0x28c   : > { %1284 = vadd.xlane.f32.xlu0 %v1283_v47 }
 0x28d   : > { %v5480_v50 = vpop.eup %5479 }
 0x28e   : > { %v1414_v52 = vsel %vm1084_vm2, %v5480_v50, 0.0 }
 0x28f   : > { %1472 = vadd.xlane.f32.xlu2 %v1471_v48 }
 0x294   : > { %1529 = vadd.xlane.f32.xlu0 %v1528_v51 }
 0x297   : > { %1415 = vadd.xlane.f32.xlu1 %v1414_v52  ;;  %v5223_v52 = vld [vmem:[%s6593_s12 + $0x8] sm:$0xff] }
 0x298   : > { %1600 = vmatpush.bf16.msra.mxu0 %v5223_v52 }
 0x2a8   : > { %1534 = vrot.lane.b32.xlu0 %v5862_v13, %s5594_s23 }
 0x2b0   : > { %1477 = vrot.lane.b32.xlu1 %v5862_v13, %s5593_s8  ;;  %s6594_s8 = sld [smem:[#allocation14_spill]] }
 0x2b6   : > { %s6595_s23 = scalar_lea.vmem %s6594_s8, %s5738_s27  ;;  %s6607_s8 = sld [smem:[#allocation24_spill]] }
 0x2b9   : > { %v1113_v53 = vpop.xlane.xlu0 %1112 }
 0x2ba   : > { %5481 = vrcp.f32 %v1113_v53  ;;  %v5222_v53 = vld [vmem:[%s6593_s12] sm:$0xff] }
 0x2bb   : > { %1601 = vmatpush.bf16.msra.mxu0 %v5222_v53 }
 0x2c0   : > { %v5482_v54 = vpop.eup %5481 }
 0x2c1   : > { %v1228_v55 = vpop.xlane.xlu2 %1227  ;;  %v1115_v56 = vmul.f32 %v5482_v54, %v5918_v12 }
 0x2c2   : > { %5483 = vrcp.f32 %v1228_v55 }
 0x2c3   : > { %v1116_v57 = vpack.c.bf16 %v1115_v56, %v1115_v56 }
 0x2c5   : > { %4476 = vmatmul.msk.bf16.vlgmr.msra.gmra.mxu2 %vm1084_vm2, %v1116_v57 }
 0x2c7   : > { %v1171_v58 = vpop.xlane.xlu1 %1170 }
 0x2c8   : > { %v5484_v59 = vpop.eup %5483  ;;  %5485 = vrcp.f32 %v1171_v58 }
 0x2c9   : > { %v1230_v60 = vmul.f32 %v5484_v59, %v5924_v23  ;;  %v1421_v1 = vpop.permute.xlu2 %1420 }
 0x2ca   : > { %v1426_v3 = vsel %vm1122_vm3, %v1421_v1, 0 }
 0x2cb   : > { %v1231_v61 = vpack.c.bf16 %v1230_v60, %v1230_v60 }
 0x2cc   : > { %v1290_v62 = vpop.permute.xlu0 %1289 }
 0x2cd   : > { %v1295_v63 = vsel %vm1122_vm3, %v1290_v62, 0  ;;  %4480 = vmatmul.msk.bf16.vlgmr.msrb.gmra.mxu1 %vm1084_vm2, %v1231_v61 }
 0x2ce   : > { %v5486_v13 = vpop.eup %5485  ;;  %1304 = vmatpush.bf16.msra.mxu2 %v1295_v63 }
 0x2cf   : > { %v1173_v0 = vmul.f32 %v5486_v13, %v5928_v25 }
 0x2d1   : > { %v1174_v2 = vpack.c.bf16 %v1173_v0, %v1173_v0 }
 0x2d5   : > { %4478 = vmatmul.msk.bf16.vlgmr.msrb.gmra.mxu2 %vm1084_vm2, %v1174_v2 }
 0x2d6   : > { %1435 = vmatpush.bf16.msrb.mxu2 %v1426_v3 }
 0x2df   : > { %v1364_v6 = vpop.permute.xlu1 %1363 }
 0x2e0   : > { %v1369_v7 = vsel %vm1122_vm3, %v1364_v6, 0 }
 0x2e1   : > { %1378 = vmatpush.bf16.msra.mxu1 %v1369_v7  ;;  %v5454_v7 = vld [vmem:[%s6595_s23] ss:$0 sm:$0xff]  ;;  %s6598_s23 = sld [smem:[#allocation15_spill]] }
 0x2f7   : > { %v1359_v8 = vpop.xlane.xlu0 %1358 }
 0x2f8   : > { %5487 = vrcp.f32 %v1359_v8 }
 0x2fe   : > { %v5488_v9 = vpop.eup %5487 }
 0x2ff   : > { %v1361_v11 = vmul.f32 %v5488_v9, %v5472_v37  ;;  %v1285_v12 = vpop.xlane.xlu0 %1284 }
 0x300   : > { %5489 = vrcp.f32 %v1285_v12 }
 0x301   : > { %v1362_v14 = vpack.c.bf16 %v1361_v11, %v1361_v11 }
 0x302   : > { %v1473_v21 = vpop.xlane.xlu2 %1472 }
 0x303   : > { %4484 = vmatmul.msk.bf16.vlgmr.msra.gmra.mxu1 %vm1084_vm2, %v1362_v14 }
 0x306   : > { %v5490_v15 = vpop.eup %5489 }
 0x307   : > { %v1287_v16 = vmul.f32 %v5490_v15, %v5474_v44  ;;  %v1530_v20 = vpop.xlane.xlu0 %1529 }
 0x309   : > { %v1288_v17 = vpack.c.bf16 %v1287_v16, %v1287_v16 }
 0x30a   : > { %v1416_v18 = vpop.xlane.xlu1 %1415 }
 0x30b   : > { %4482 = vmatmul.msk.bf16.vlgmr.msra.gmra.mxu2 %vm1084_vm2, %v1288_v17  ;;  %5491 = vrcp.f32 %v1416_v18  ;;  %v5598_v18 = vmov 32.0  }
 0x30c   : > { %5493 = vrcp.f32 %v1473_v21  ;;  %v5227_v21 = vld [vmem:[%s5777_s20 + $0x8] sm:$0xff] }
 0x30d   : > { %5495 = vrcp.f32 %v1530_v20  ;;  %1743 = vmatpush.bf16.msra.mxu3 %v5227_v21 }
 0x30e   : > { %5497 = vrcp.f32 %v5598_v18 }
 0x311   : > { %v5492_v19 = vpop.eup %5491 }
 0x312   : > { %v1418_v22 = vmul.f32 %v5492_v19, %v5480_v50  ;;  %v5494_v26 = vpop.eup %5493 }
 0x313   : > { %v1475_v27 = vmul.f32 %v5494_v26, %v5942_v46  ;;  %v5496_v28 = vpop.eup %5495 }
 0x314   : > { %v1419_v23 = vpack.c.bf16 %v1418_v22, %v1418_v22  ;;  %v1532_v32 = vmul.f32 %v5496_v28, %v5947_v49  ;;  %v5498_v19 = vpop.eup %5497 }
 0x315   : > { %v1476_v31 = vpack.c.bf16 %v1475_v27, %v1475_v27  ;;  %v1619_v20 = vmul.f32 32.0, %v5498_v19  ;;  %vm1623_vm6 = vweird.f32 %v5498_v19 }
 0x316   : > { %v1533_v33 = vpack.c.bf16 %v1532_v32, %v1532_v32 }
 0x317   : > { %v1620_v22 = vsub.f32 1.0, %v1619_v20 }
 0x31a   : > { %v1535_v24 = vpop.permute.xlu0 %1534 }
 0x31b   : > { %v1540_v25 = vsel %vm1122_vm3, %v1535_v24, 0  ;;  %4486 = vmatmul.msk.bf16.vlgmr.msrb.gmra.mxu2 %vm1084_vm2, %v1419_v23  ;;  %v5226_v23 = vld [vmem:[%s5777_s20] sm:$0xff]  ;;  %v1712_v24 = vld [vmem:[%s6596_s29 + $0x8] sm:$0xff]  ;;  %s6599_s20 = scalar_lea.vmem %s6598_s23, %s5738_s27  ;;  %s6608_s23 = scalar_lea.vmem %s6607_s8, %s5738_s27 }
 0x31c   : > { %1549 = vmatpush.bf16.msra.mxu2 %v1540_v25  ;;  %v1621_v25 = vmul.f32 %v5498_v19, %v1620_v22  ;;  %1744 = vmatpush.bf16.msra.mxu3 %v5226_v23 }
 0x31e   : > { %v1622_v26 = vadd.f32 %v5498_v19, %v1621_v25 }
 0x320   : > { %v6004_v27 = vsel %vm1623_vm6, %v5498_v19, %v1622_v26 }
 0x322   : > { %v1478_v29 = vpop.permute.xlu1 %1477 }
 0x323   : > { %v1483_v30 = vsel %vm1122_vm3, %v1478_v29, 0 }
 0x324   : > { %1492 = vmatpush.bf16.msrb.mxu1 %v1483_v30 }
 0x327   : > { %4488 = vmatmul.msk.bf16.vlgmr.msrb.gmra.mxu1 %vm1084_vm2, %v1476_v31 }
 0x32b   : > { %4490 = vmatmul.msk.bf16.vlgmr.msra.gmra.mxu2 %vm1084_vm2, %v1533_v33 }
 0x348   : > { %v1135_v34 = vpop.f32.mrf.mxu2 }
 0x34a   : > { %v1249_v10 = vpop.f32.mrf.mxu1 }
 0x350   : > { %v1137_v35 = vpop.f32.mrf.mxu2 }
 0x352   : > { %v1251_v36 = vpop.f32.mrf.mxu1 }
 0x358   : > { %v1192_v37 = vpop.f32.mrf.mxu2 }
 0x360   : > { %v1194_v38 = vpop.f32.mrf.mxu2 }
 0x380   : > { %v1380_v39 = vpop.f32.mrf.mxu1 }
 0x388   : > { %v1382_v40 = vpop.f32.mrf.mxu1 }
 0x38e   : > { %v1306_v41 = vpop.f32.mrf.mxu2 }
 0x396   : > { %v1308_v42 = vpop.f32.mrf.mxu2 }
 0x397   : > { %v5457_v42 = vld [vmem:[%s6597_s28] ss:$0 sm:$0xff]  ;;  %s6609_s28 = sld [smem:[#allocation25_spill]] }
 0x39e   : > { %v1437_v43 = vpop.f32.mrf.mxu2 }
 0x39f   : > { %v5428_v44 = vpack.i.bf16 %v1437_v43, %v1192_v37  ;;  %v5225_v37 = vld [vmem:[%s5768_s4 + $0x8] sm:$0xff] }
 0x3a0   : > { %1703 = vmatpush.bf16.msra.mxu1 %v5225_v37 }
 0x3a1   : > { %5429 = vrot.lane.b32.xlu0 %v5428_v44, %s5595_s15 }
 0x3a4   : > { %v1494_v45 = vpop.f32.mrf.mxu1 }
 0x3a5   : > { %v5423_v46 = vpack.i.bf16 %v1494_v45, %v1249_v10 }
 0x3a6   : > { %v1439_v47 = vpop.f32.mrf.mxu2 }
 0x3a7   : > { %5424 = vrot.lane.b32.xlu1 %v5423_v46, %s5596_s16 }
 0x3ac   : > { %v1496_v48 = vpop.f32.mrf.mxu1 }
 0x3ae   : > { %v1551_v49 = vpop.f32.mrf.mxu2 }
 0x3af   : > { %v5433_v50 = vpack.i.bf16 %v1551_v49, %v1306_v41  ;;  %v5224_v41 = vld [vmem:[%s5768_s4] sm:$0xff]  ;;  %s6602_s4 = scalar_lea.vmem %s6529_s9, %s5738_s27 }
 0x3b0   : > { %1704 = vmatpush.bf16.msra.mxu1 %v5224_v41  ;;  %v5458_v18 = vld [vmem:[%s6602_s4] ss:$0 sm:$0xff] }
 0x3b1   : > { %5434 = vrot.lane.b32.xlu0 %v5433_v50, %s5597_s17 }
 0x3b6   : > { %v1553_v51 = vpop.f32.mrf.mxu2 }
 0x413   : > { %v5430_v54 = vpop.permute.xlu0 %5429 }
 0x414   : > { %v5432_v56 = vunpack.i.h.bf16 %v5430_v54  ;;  %v5431_v57 = vunpack.i.l.bf16 %v5430_v54 }
 0x416   : > { %v1567_v61 = vsel %vm1084_vm2, %v1380_v39, %v5432_v56  ;;  %v1322_v62 = vsel %vm1084_vm2, %v1135_v34, %v5431_v57 }
 0x419   : > { %v5425_v55 = vpop.permute.xlu1 %5424 }
 0x41a   : > { %v5427_v58 = vunpack.i.h.bf16 %v5425_v55  ;;  %v5426_v59 = vunpack.i.l.bf16 %v5425_v55 }
 0x41c   : > { %v1324_v0 = vsel %vm1323_vm4, %v1322_v62, %v5426_v59  ;;  %v1568_v1 = vsel %vm1323_vm4, %v1567_v61, %v5427_v58  ;;  %v5455_v62 = vld [vmem:[%s6599_s20] ss:$0 sm:$0xff] }
 0x423   : > { %v5435_v60 = vpop.permute.xlu0 %5434 }
 0x424   : > { %v5437_v63 = vunpack.i.h.bf16 %v5435_v60  ;;  %v5436_v13 = vunpack.i.l.bf16 %v5435_v60 }
 0x426   : > { %v1326_v2 = vsel %vm1325_vm5, %v1324_v0, %v5436_v13  ;;  %v1569_v3 = vsel %vm1325_vm5, %v1568_v1, %v5437_v63  ;;  %v5456_v1 = vld [vmem:[%s6601_s26] ss:$0 sm:$0xff]  ;;  %s6610_s26 = scalar_lea.vmem %s6609_s28, %s5738_s27 }
 0x427   : > { %v1574_v6 = vpack.c.bf16 %v1569_v3, %v1326_v2 }
 0x429   : > { %4499 = vmatmul.msk.bf16.vlgmr.msra.gmra.mxu0 %vm1062_vm1, %v1574_v6 }
 0x4a6   : > { %v1603_v8 = vpop.f32.mrf.mxu0 }
 0x4a7   : > { %v1604_v9 = vadd.f32 %v5454_v7, %v1603_v8 }
 0x4a9   : > { %v1608_v11 = vadd.f32 %v1604_v9, %v5836_v4  ;;  %v1711_v4 = vld [vmem:[%s6596_s29] sm:$0xff] }
 0x4ab   : > { %v1612_v12 = vsel %vm1062_vm1, %v1608_v11, 0.0 }
 0x4ac   : > { %1613 = vadd.xlane.f32.xlu1 %v1612_v12 }
 0x4ae   : > { %v1605_v14 = vpop.f32.mrf.mxu0 }
 0x4af   : > { %v1606_v15 = vadd.f32 %v5454_v7, %v1605_v14 }
 0x4b1   : > { %v1609_v16 = vadd.f32 %v1606_v15, %v5838_v5  ;;  %v1717_v5 = vpack.c.bf16 %v1712_v24, %v1711_v4 }
 0x4b3   : > { %v1615_v17 = vsel %vm1062_vm1, %v1609_v16, 0.0  ;;  %4517 = vmatmul.msk.bf16.vlgmr.msra.gmra.mxu3 %vm1062_vm1, %v1717_v5 }
 0x4b4   : > { %1616 = vadd.xlane.f32.xlu2 %v1615_v17 }
 0x51f   : > { %v1614_v28 = vpop.xlane.xlu1 %1613 }
 0x520   : > { %v1625_v29 = vmul.f32 %v6004_v27, %v1614_v28 }
 0x522   : > { %v1627_v30 = vsub.f32 %v1608_v11, %v1625_v29 }
 0x524   : > { %v1629_v31 = vmul.f32 %v1627_v30, %v1627_v30 }
 0x526   : > { %v1631_v32 = vsel %vm1062_vm1, %v1629_v31, 0.0 }
 0x527   : > { %v1617_v33 = vpop.xlane.xlu2 %1616  ;;  %1632 = vadd.xlane.f32.xlu0 %v1631_v32 }
 0x528   : > { %v1626_v34 = vmul.f32 %v6004_v27, %v1617_v33 }
 0x52a   : > { %v1628_v10 = vsub.f32 %v1609_v16, %v1626_v34 }
 0x52c   : > { %v1630_v35 = vmul.f32 %v1628_v10, %v1628_v10 }
 0x52e   : > { %v1634_v36 = vsel %vm1062_vm1, %v1630_v35, 0.0  ;;  %v1751_v35 = vlaneseq }
 0x52f   : > { %1635 = vadd.xlane.f32.xlu2 %v1634_v36 }
 0x530   : > { %v6078_v36 = vand.u32 127, %v1751_v35 }
 0x532   : > { %vm1753_vm13 = vcmp.lt.s32.totalorder %v6078_v36, 6 }
 0x536   : > { %v1746_v43 = vpop.f32.mrf.mxu3 }
 0x537   : > { %v1747_v46 = vadd.f32 %v5457_v42, %v1746_v43 }
 0x539   : > { %v6019_v49 = vpack.c.bf16 %v1747_v46, %v1747_v46 }
 0x53b   : > { %v1760_v51 = vsel %vm1084_vm2, %v6019_v49, 0  ;;  %1930 = vrot.lane.b32.xlu0 %v6019_v49, %s5584_s25 }
 0x53c   : > { %1769 = vmatpush.bf16.xpose.msrb.mxu2 %v1760_v51 }
 0x53e   : > { %v1748_v16 = vpop.f32.mrf.mxu3 }
 0x53f   : > { %v1749_v17 = vadd.f32 %v5457_v42, %v1748_v16 }
 0x541   : > { %v6053_v20 = vpack.c.bf16 %v1749_v17, %v1749_v17 }
 0x543   : > { %v2007_v23 = vsel %vm1084_vm2, %v6053_v20, 0 }
 0x547   : > { %1814 = vrot.lane.b32.xlu2 %v6019_v49, %s5585_s6 }
 0x54f   : > { %1872 = vrot.lane.b32.xlu2 %v6019_v49, %s5590_s21 }
 0x59a   : > { %v1633_v38 = vpop.xlane.xlu0 %1632 }
 0x59b   : > { %v1637_v39 = vmul.f32 %v1633_v38, %v6004_v27 }
 0x59d   : > { %v1639_v40 = vadd.f32 1e-05, %v1637_v39 }
 0x59f   : > { %5499 = vrsqrt.f32 %v1639_v40  ;;  %vm1647_vm8 = vweird.f32 %v1639_v40 }
 0x5a2   : > { %v1636_v44 = vpop.xlane.xlu2 %1635 }
 0x5a3   : > { %v1638_v45 = vmul.f32 %v1636_v44, %v6004_v27 }
 0x5a5   : > { %v5500_v47 = vpop.eup %5499  ;;  %v1640_v48 = vadd.f32 1e-05, %v1638_v45 }
 0x5a6   : > { %v1642_v50 = vmul.f32 %v5500_v47, %v1639_v40  ;;  %vm1648_vm7 = vweird.f32 %v5500_v47 }
 0x5a7   : > { %5501 = vrsqrt.f32 %v1640_v48  ;;  %vm1649_vm9 = vmor %vm1647_vm8, %vm1648_vm7  ;;  %vm1657_vm11 = vweird.f32 %v1640_v48 }
 0x5a8   : > { %v1643_v52 = vmul.f32 %v5500_v47, %v1642_v50 }
 0x5aa   : > { %v1644_v53 = vmul.f32 0.5, %v1643_v52  ;;  %v1815_v11 = vpop.permute.xlu2 %1814 }
 0x5ab   : > { %v1820_v12 = vsel %vm1084_vm2, %v1815_v11, 0 }
 0x5ac   : > { %v1645_v54 = vsub.f32 1.5, %v1644_v53  ;;  %1829 = vmatpush.bf16.xpose.msrb.mxu1 %v1820_v12 }
 0x5ad   : > { %v5502_v55 = vpop.eup %5501  ;;  %v1931_v25 = vpop.permute.xlu0 %1930 }
 0x5ae   : > { %v1646_v56 = vmul.f32 %v5500_v47, %v1645_v54  ;;  %v1652_v57 = vmul.f32 %v5502_v55, %v1640_v48  ;;  %vm1658_vm10 = vweird.f32 %v5502_v55  ;;  %v1936_v26 = vsel %vm1084_vm2, %v1931_v25, 0 }
 0x5af   : > { %vm1659_vm12 = vmor %vm1657_vm11, %vm1658_vm10 }
 0x5b0   : > { %v1653_v58 = vmul.f32 %v5502_v55, %v1652_v57  ;;  %v1650_v59 = vsel %vm1649_vm9, %v5500_v47, %v1646_v56 }
 0x5b1   : > { %v1661_v63 = vmul.f32 %v1650_v59, %v1627_v30 }
 0x5b2   : > { %v1654_v60 = vmul.f32 0.5, %v1653_v58  ;;  %v1873_v14 = vpop.permute.xlu2 %1872 }
 0x5b3   : > { %v1666_v2 = vmul.f32 %v5455_v62, %v1661_v63  ;;  %v1878_v15 = vsel %vm1084_vm2, %v1873_v14, 0 }
 0x5b4   : > { %v1655_v61 = vsub.f32 1.5, %v1654_v60  ;;  %1887 = vmatpush.bf16.xpose.msra.mxu2 %v1878_v15 }
 0x5b5   : > { %v6039_v7 = vadd.f32 %v5456_v1, %v1666_v2 }
 0x5b6   : > { %v1656_v13 = vmul.f32 %v5502_v55, %v1655_v61 }
 0x5b8   : > { %v1660_v0 = vsel %vm1659_vm12, %v5502_v55, %v1656_v13 }
 0x5b9   : > { %v1662_v3 = vmul.f32 %v1660_v0, %v1628_v10 }
 0x5bb   : > { %v1667_v6 = vmul.f32 %v5455_v62, %v1662_v3 }
 0x5bd   : > { %v6041_v8 = vadd.f32 %v5456_v1, %v1667_v6 }
 0x5bf   : > { %v1677_v9 = vpack.c.bf16 %v6041_v8, %v6039_v7 }
 0x5c1   : > { %4508 = vmatmul.msk.bf16.vlgmr.msra.gmra.mxu1 %vm1062_vm1, %v1677_v9 }
 0x5c2   : > { %1945 = vmatpush.bf16.xpose.msra.mxu1 %v1936_v26 }
 0x63e   : > { %v1706_v19 = vpop.f32.mrf.mxu1 }
 0x63f   : > { %v1707_v21 = vadd.f32 %v5458_v18, %v1706_v19 }
 0x641   : > { %v1754_v22 = vpack.c.bf16 %v1707_v21, %v1707_v21 }
 0x643   : > { %1870 = vrot.lane.b32.xlu2 %v1754_v22, %s5590_s21  ;;  %1812 = vrot.lane.b32.xlu1 %v1754_v22, %s5585_s6 }
 0x644   : > { %4518 = vmatmul.msk.bf16.vlgmr.msrb.gmra.mxu2 %vm1084_vm2, %v1754_v22 }
 0x645   : > { %2016 = vmatpush.bf16.xpose.msrb.mxu2 %v2007_v23 }
 0x646   : > { %v1708_v4 = vpop.f32.mrf.mxu1 }
 0x647   : > { %v1709_v24 = vadd.f32 %v5458_v18, %v1708_v4 }
 0x649   : > { %v2001_v5 = vpack.c.bf16 %v1709_v24, %v1709_v24 }
 0x64b   : > { %2059 = vrot.lane.b32.xlu0 %v2001_v5, %s5585_s6  ;;  %1928 = vrot.lane.b32.xlu2 %v1754_v22, %s5584_s25 }
 0x64c   : > { %2061 = vrot.lane.b32.xlu1 %v6053_v20, %s5585_s6  ;;  %s6603_s6 = scalar_lea.vmem %s6533_s13, %s5738_s27 }
 0x653   : > { %2117 = vrot.lane.b32.xlu0 %v2001_v5, %s5590_s21  ;;  %2119 = vrot.lane.b32.xlu2 %v6053_v20, %s5590_s21 }
 0x654   : > { %2177 = vrot.lane.b32.xlu1 %v6053_v20, %s5584_s25 }
 0x65b   : > { %1849 = vrot.lane.b32.xlu0 %v6019_v49, %s5589_s18  ;;  %2175 = vrot.lane.b32.xlu2 %v2001_v5, %s5584_s25 }
 0x69d   : > { %v1871_v28 = vpop.permute.xlu2 %1870 }
 0x69e   : > { %4522 = vmatmul.msk.bf16.vlgmr.msra.gmra.mxu2 %vm1084_vm2, %v1871_v28 }
 0x6a5   : > { %v1929_v29 = vpop.permute.xlu2 %1928 }
 0x6ad   : > { %v2120_v30 = vpop.permute.xlu2 %2119 }
 0x6ae   : > { %v2125_v31 = vsel %vm1084_vm2, %v2120_v30, 0  ;;  %4526 = vmatmul.msk.bf16.vlgmr.msrb.gmra.mxu2 %vm1084_vm2, %v2001_v5 }
 0x6af   : > { %2134 = vmatpush.bf16.xpose.msra.mxu2 %v2125_v31 }
 0x6b5   : > { %v1813_v32 = vpop.permute.xlu1 %1812  ;;  %v2176_v47 = vpop.permute.xlu2 %2175 }
 0x6b6   : > { %4520 = vmatmul.msk.bf16.vlgmr.msrb.gmra.mxu1 %vm1084_vm2, %v1813_v32 }
 0x6bd   : > { %v2060_v33 = vpop.permute.xlu0 %2059 }
 0x6be   : > { %v2062_v34 = vpop.permute.xlu1 %2061 }
 0x6bf   : > { %v2067_v10 = vsel %vm1084_vm2, %v2062_v34, 0 }
 0x6c0   : > { %2076 = vmatpush.bf16.xpose.msrb.mxu1 %v2067_v10 }
 0x6c5   : > { %v2118_v37 = vpop.permute.xlu0 %2117 }
 0x6c6   : > { %v2178_v38 = vpop.permute.xlu1 %2177  ;;  %4524 = vmatmul.msk.bf16.vlgmr.msra.gmra.mxu1 %vm1084_vm2, %v1929_v29  ;;  %4530 = vmatmul.msk.bf16.vlgmr.msra.gmra.mxu2 %vm1084_vm2, %v2118_v37 }
 0x6c7   : > { %v2183_v39 = vsel %vm1084_vm2, %v2178_v38, 0  ;;  %v1771_v40 = vpop.f32.mrf.mxu2 }
 0x6c8   : > { %v1775_v41 = vmul.f32 0.35355338, %v1771_v40  ;;  %2192 = vmatpush.bf16.xpose.msra.mxu1 %v2183_v39 }
 0x6ca   : > { %v1776_v42 = vsel %vm1753_vm13, %v1775_v41, -1e+30 }
 0x6cb   : > { %v1777_v43 = vsel %vm1084_vm2, %v1776_v42, -inf }
 0x6cc   : > { %1778 = vmax.xlane.f32.xlu0 %v1777_v43 }
 0x6cd   : > { %v1850_v44 = vpop.permute.xlu0 %1849 }
 0x6ce   : > { %v1855_v45 = vsel %vm1122_vm3, %v1850_v44, 0 }
 0x6cf   : > { %v1773_v46 = vpop.f32.mrf.mxu2  ;;  %1864 = vmatpush.bf16.msrb.mxu3 %v1855_v45 }
 0x6d6   : > { %4528 = vmatmul.msk.bf16.vlgmr.msrb.gmra.mxu1 %vm1084_vm2, %v2060_v33 }
 0x6e6   : > { %4532 = vmatmul.msk.bf16.vlgmr.msra.gmra.mxu1 %vm1084_vm2, %v2176_v47 }
 0x721   : > { %v1889_v48 = vpop.f32.mrf.mxu2 }
 0x722   : > { %v1893_v56 = vmul.f32 0.35355338, %v1889_v48 }
 0x724   : > { %v1894_v59 = vsel %vm1753_vm13, %v1893_v56, -1e+30 }
 0x725   : > { %v1895_v61 = vsel %vm1084_vm2, %v1894_v59, -inf }
 0x729   : > { %v1891_v50 = vpop.f32.mrf.mxu2 }
 0x731   : > { %v2018_v51 = vpop.f32.mrf.mxu2 }
 0x732   : > { %v2022_v3 = vmul.f32 0.35355338, %v2018_v51 }
 0x733   : > { %v1831_v52 = vpop.f32.mrf.mxu1 }
 0x734   : > { %v1835_v53 = vmul.f32 0.35355338, %v1831_v52  ;;  %v6102_v14 = vsel %vm1753_vm13, %v2022_v3, -1e+30 }
 0x735   : > { %v2024_v15 = vsel %vm1084_vm2, %v6102_v14, -inf }
 0x736   : > { %v1836_v54 = vsel %vm1753_vm13, %v1835_v53, -1e+30 }
 0x737   : > { %v1837_v55 = vsel %vm1084_vm2, %v1836_v54, -inf }
 0x738   : > { %1838 = vmax.xlane.f32.xlu1 %v1837_v55 }
 0x739   : > { %v2020_v57 = vpop.f32.mrf.mxu2 }
 0x73b   : > { %v1833_v58 = vpop.f32.mrf.mxu1 }
 0x73f   : > { %v1779_v60 = vpop.xlane.xlu0 %1778 }
 0x740   : > { %v1780_v62 = vsub.f32 %v1776_v42, %v1779_v60  ;;  %1896 = vmax.xlane.f32.xlu1 %v1895_v61 }
 0x742   : > { %v1781_v63 = vmul.f32 1.442695, %v1780_v62 }
 0x743   : > { %v1947_v13 = vpop.f32.mrf.mxu1 }
 0x744   : > { %5503 = vpow2.f32 %v1781_v63  ;;  %v1951_v0 = vmul.f32 0.35355338, %v1947_v13 }
 0x746   : > { %v1952_v1 = vsel %vm1753_vm13, %v1951_v0, -1e+30 }
 0x747   : > { %v1953_v2 = vsel %vm1084_vm2, %v1952_v1, -inf }
 0x748   : > { %1954 = vmax.xlane.f32.xlu2 %v1953_v2 }
 0x749   : > { %v2136_v6 = vpop.f32.mrf.mxu2 }
 0x74a   : > { %v5504_v9 = vpop.eup %5503  ;;  %v2140_v16 = vmul.f32 0.35355338, %v2136_v6 }
 0x74b   : > { %v1949_v11 = vpop.f32.mrf.mxu1  ;;  %v1783_v12 = vsel %vm1084_vm2, %v5504_v9, 0.0 }
 0x74c   : > { %1784 = vadd.xlane.f32.xlu1 %v1783_v12  ;;  %v2141_v21 = vsel %vm1753_vm13, %v2140_v16, -1e+30 }
 0x74d   : > { %v2142_v4 = vsel %vm1084_vm2, %v2141_v21, -inf }
 0x750   : > { %2025 = vmax.xlane.f32.xlu2 %v2024_v15 }
 0x751   : > { %v2138_v17 = vpop.f32.mrf.mxu2 }
 0x753   : > { %v2078_v18 = vpop.f32.mrf.mxu1 }
 0x754   : > { %v2082_v19 = vmul.f32 0.35355338, %v2078_v18 }
 0x756   : > { %v2083_v22 = vsel %vm1753_vm13, %v2082_v19, -1e+30 }
 0x757   : > { %v2084_v23 = vsel %vm1084_vm2, %v2083_v22, -inf }
 0x758   : > { %2085 = vmax.xlane.f32.xlu0 %v2084_v23  ;;  %2143 = vmax.xlane.f32.xlu2 %v2142_v4 }
 0x75b   : > { %v2080_v24 = vpop.f32.mrf.mxu1 }
 0x763   : > { %v2194_v5 = vpop.f32.mrf.mxu1 }
 0x764   : > { %v2198_v25 = vmul.f32 0.35355338, %v2194_v5 }
 0x766   : > { %v6114_v26 = vsel %vm1753_vm13, %v2198_v25, -1e+30 }
 0x767   : > { %v2200_v28 = vsel %vm1084_vm2, %v6114_v26, -inf }
 0x768   : > { %2201 = vmax.xlane.f32.xlu1 %v2200_v28 }
 0x76b   : > { %v2196_v29 = vpop.f32.mrf.mxu1 }
 0x770   : > { %1790 = vrot.lane.b32.xlu2 %v6019_v49, %s5586_s3 }
 0x781   : > { %1907 = vrot.lane.b32.xlu1 %v6019_v49, %s5587_s1 }
 0x789   : > { %2096 = vrot.lane.b32.xlu1 %v6053_v20, %s5589_s18 }
 0x7ab   : > { %v1839_v30 = vpop.xlane.xlu1 %1838 }
 0x7ac   : > { %v1840_v31 = vsub.f32 %v1836_v54, %v1839_v30 }
 0x7ae   : > { %v1841_v32 = vmul.f32 1.442695, %v1840_v31 }
 0x7b0   : > { %5505 = vpow2.f32 %v1841_v32 }
 0x7b3   : > { %v1897_v33 = vpop.xlane.xlu1 %1896 }
 0x7b4   : > { %v1898_v34 = vsub.f32 %v1894_v59, %v1897_v33 }
 0x7b6   : > { %v6124_v10 = vpop.eup %5505  ;;  %v1899_v35 = vmul.f32 1.442695, %v1898_v34 }
 0x7b7   : > { %v1843_v36 = vsel %vm1084_vm2, %v6124_v10, 0.0 }
 0x7b8   : > { %5507 = vpow2.f32 %v1899_v35  ;;  %1844 = vadd.xlane.f32.xlu0 %v1843_v36 }
 0x7bb   : > { %v1955_v37 = vpop.xlane.xlu2 %1954 }
 0x7bc   : > { %v1956_v38 = vsub.f32 %v1952_v1, %v1955_v37 }
 0x7be   : > { %v5508_v39 = vpop.eup %5507  ;;  %v1957_v40 = vmul.f32 1.442695, %v1956_v38 }
 0x7bf   : > { %v1901_v41 = vsel %vm1084_vm2, %v5508_v39, 0.0  ;;  %v1785_v44 = vpop.xlane.xlu1 %1784 }
 0x7c0   : > { %5509 = vpow2.f32 %v1957_v40  ;;  %1902 = vadd.xlane.f32.xlu1 %v1901_v41 }
 0x7c1   : > { %5511 = vrcp.f32 %v1785_v44 }
 0x7c3   : > { %v2026_v42 = vpop.xlane.xlu2 %2025 }
 0x7c4   : > { %v2027_v61 = vsub.f32 %v6102_v14, %v2026_v42 }
 0x7c6   : > { %v6129_v43 = vpop.eup %5509  ;;  %v2028_v62 = vmul.f32 1.442695, %v2027_v61 }
 0x7c7   : > { %v1959_v45 = vsel %vm1084_vm2, %v6129_v43, 0.0  ;;  %v5512_v51 = vpop.eup %5511 }
 0x7c8   : > { %1960 = vadd.xlane.f32.xlu1 %v1959_v45  ;;  %v1787_v53 = vmul.f32 %v5512_v51, %v5504_v9 }
 0x7ca   : > { %v1788_v57 = vpack.c.bf16 %v1787_v53, %v1787_v53 }
 0x7cb   : > { %v2144_v46 = vpop.xlane.xlu2 %2143  ;;  %v2086_v47 = vpop.xlane.xlu0 %2085 }
 0x7cc   : > { %v2087_v48 = vsub.f32 %v2083_v22, %v2086_v47  ;;  %1965 = vrot.lane.b32.xlu0 %v6019_v49, %s5588_s22  ;;  %v2145_v52 = vsub.f32 %v2141_v21, %v2144_v46 }
 0x7ce   : > { %v2088_v50 = vmul.f32 1.442695, %v2087_v48  ;;  %v2146_v54 = vmul.f32 1.442695, %v2145_v52 }
 0x7d0   : > { %5513 = vpow2.f32 %v2088_v50 }
 0x7d1   : > { %5515 = vpow2.f32 %v2146_v54 }
 0x7d2   : > { %5517 = vpow2.f32 %v2028_v62 }
 0x7d3   : > { %v1791_v55 = vpop.permute.xlu2 %1790 }
 0x7d4   : > { %v1796_v56 = vsel %vm1122_vm3, %v1791_v55, 0 }
 0x7d5   : > { %1805 = vmatpush.bf16.msrb.mxu0 %v1796_v56 }
 0x7d6   : > { %v5514_v58 = vpop.eup %5513 }
 0x7d7   : > { %v2090_v59 = vsel %vm1084_vm2, %v5514_v58, 0.0  ;;  %v6138_v60 = vpop.eup %5515 }
 0x7d8   : > { %4519 = vmatmul.msk.bf16.vlgmr.msrb.gmra.mxu0 %vm1084_vm2, %v1788_v57  ;;  %2091 = vadd.xlane.f32.xlu2 %v2090_v59  ;;  %v2148_v49 = vsel %vm1084_vm2, %v6138_v60, 0.0  ;;  %v5518_v13 = vpop.eup %5517 }
 0x7d9   : > { %v2030_v2 = vsel %vm1084_vm2, %v5518_v13, 0.0 }
 0x7db   : > { %v2202_v63 = vpop.xlane.xlu1 %2201 }
 0x7dc   : > { %v2203_v3 = vsub.f32 %v6114_v26, %v2202_v63 }
 0x7de   : > { %v2204_v6 = vmul.f32 1.442695, %v2203_v3  ;;  %v5229_v3 = vld [vmem:[%s5786_s30 + $0x8] sm:$0xff] }
 0x7df   : > { %2278 = vmatpush.bf16.msrb.mxu2 %v5229_v3 }
 0x7e0   : > { %2149 = vadd.xlane.f32.xlu2 %v2148_v49  ;;  %5519 = vpow2.f32 %v2204_v6  ;;  %v5228_v6 = vld [vmem:[%s5786_s30] sm:$0xff]  ;;  %s6612_s30 = sld [smem:[#allocation26_spill]] (!%p5199_p5) }
 0x7e1   : > { %2037 = vrot.lane.b32.xlu1 %v6053_v20, %s5586_s3 }
 0x7e3   : > { %2279 = vmatpush.bf16.msrb.mxu2 %v5228_v6 }
 0x7e6   : > { %v5520_v9 = vpop.eup %5519 }
 0x7e7   : > { %v2206_v11 = vsel %vm1084_vm2, %v5520_v9, 0.0 }
 0x7f3   : > { %v1908_v0 = vpop.permute.xlu1 %1907 }
 0x7f4   : > { %v1913_v1 = vsel %vm1122_vm3, %v1908_v0, 0 }
 0x7f5   : > { %1922 = vmatpush.bf16.msra.mxu0 %v1913_v1 }
 0x7f6   : > { %2031 = vadd.xlane.f32.xlu0 %v2030_v2 }
 0x7f8   : > { %2154 = vrot.lane.b32.xlu2 %v6053_v20, %s5587_s1 }
 0x7fb   : > { %v2097_v12 = vpop.permute.xlu1 %2096 }
 0x7fc   : > { %v2102_v24 = vsel %vm1122_vm3, %v2097_v12, 0 }
 0x80a   : > { %2212 = vrot.lane.b32.xlu0 %v6053_v20, %s5588_s22  ;;  %s6604_s22 = scalar_lea.vmem %s6534_s14, %s5738_s27 }
 0x80b   : > { %2207 = vadd.xlane.f32.xlu1 %v2206_v11 }
 0x82b   : > { %v1845_v14 = vpop.xlane.xlu0 %1844 }
 0x82c   : > { %5521 = vrcp.f32 %v1845_v14 }
 0x832   : > { %v5522_v15 = vpop.eup %5521 }
 0x833   : > { %v1847_v16 = vmul.f32 %v5522_v15, %v6124_v10  ;;  %v1903_v17 = vpop.xlane.xlu1 %1902 }
 0x834   : > { %5523 = vrcp.f32 %v1903_v17 }
 0x835   : > { %v1848_v18 = vpack.c.bf16 %v1847_v16, %v1847_v16 }
 0x837   : > { %4521 = vmatmul.msk.bf16.vlgmr.msrb.gmra.mxu3 %vm1084_vm2, %v1848_v18 }
 0x83a   : > { %v5524_v19 = vpop.eup %5523 }
 0x83b   : > { %v1905_v21 = vmul.f32 %v5524_v19, %v5508_v39  ;;  %v1961_v22 = vpop.xlane.xlu1 %1960 }
 0x83c   : > { %5525 = vrcp.f32 %v1961_v22 }
 0x83d   : > { %v1906_v23 = vpack.c.bf16 %v1905_v21, %v1905_v21 }
 0x83e   : > { %v1966_v20 = vpop.permute.xlu0 %1965 }
 0x83f   : > { %v1971_v4 = vsel %vm1122_vm3, %v1966_v20, 0  ;;  %4523 = vmatmul.msk.bf16.vlgmr.msra.gmra.mxu0 %vm1084_vm2, %v1906_v23 }
 0x840   : > { %1980 = vmatpush.bf16.msra.mxu3 %v1971_v4 }
 0x842   : > { %v5526_v5 = vpop.eup %5525 }
 0x843   : > { %v1963_v25 = vmul.f32 %v5526_v5, %v6129_v43 }
 0x844   : > { %2111 = vmatpush.bf16.msrb.mxu3 %v2102_v24 }
 0x845   : > { %v1964_v26 = vpack.c.bf16 %v1963_v25, %v1963_v25  ;;  %v5459_v25 = vld [vmem:[%s6603_s6] ss:$0 sm:$0xff] }
 0x847   : > { %4525 = vmatmul.msk.bf16.vlgmr.msra.gmra.mxu3 %vm1084_vm2, %v1964_v26 }
 0x84b   : > { %v2092_v28 = vpop.xlane.xlu2 %2091 }
 0x84c   : > { %5527 = vrcp.f32 %v2092_v28 }
 0x852   : > { %v5528_v29 = vpop.eup %5527 }
 0x853   : > { %v2038_v30 = vpop.permute.xlu1 %2037  ;;  %v2094_v31 = vmul.f32 %v5528_v29, %v5514_v58  ;;  %v2150_v33 = vpop.xlane.xlu2 %2149 }
 0x854   : > { %v2043_v32 = vsel %vm1122_vm3, %v2038_v30, 0 }
 0x855   : > { %v1807_v34 = vpop.f32.mrf.mxu0  ;;  %2052 = vmatpush.bf16.msrb.mxu0 %v2043_v32  ;;  %v2095_v10 = vpack.c.bf16 %v2094_v31, %v2094_v31 }
 0x857   : > { %4529 = vmatmul.msk.bf16.vlgmr.msrb.gmra.mxu3 %vm1084_vm2, %v2095_v10 }
 0x85b   : > { %v2155_v35 = vpop.permute.xlu2 %2154 }
 0x85c   : > { %v2160_v36 = vsel %vm1122_vm3, %v2155_v35, 0 }
 0x85d   : > { %v1809_v37 = vpop.f32.mrf.mxu0  ;;  %2169 = vmatpush.bf16.msra.mxu0 %v2160_v36 }
 0x869   : > { %v2032_v38 = vpop.xlane.xlu0 %2031 }
 0x86a   : > { %5529 = vrcp.f32 %v2032_v38 }
 0x86b   : > { %5531 = vrcp.f32 %v2150_v33 }
 0x870   : > { %v5530_v39 = vpop.eup %5529 }
 0x871   : > { %v2034_v40 = vmul.f32 %v5530_v39, %v5518_v13  ;;  %v5532_v42 = vpop.eup %5531 }
 0x872   : > { %v2152_v46 = vmul.f32 %v5532_v42, %v6138_v60  ;;  %v4609_v42 = vld [vmem:[%s5804_s2 + $0x80] sm:$0xf] }
 0x873   : > { %v2035_v41 = vpack.c.bf16 %v2034_v40, %v2034_v40 }
 0x874   : > { %v2153_v47 = vpack.c.bf16 %v2152_v46, %v2152_v46 }
 0x875   : > { %4527 = vmatmul.msk.bf16.vlgmr.msrb.gmra.mxu0 %vm1084_vm2, %v2035_v41 }
 0x87c   : > { %v2213_v43 = vpop.permute.xlu0 %2212 }
 0x87d   : > { %v2218_v44 = vsel %vm1122_vm3, %v2213_v43, 0  ;;  %v5254_v43 = vld [vmem:[%s5804_s2 + $0xbc] sm:$0xf0] }
 0x87e   : > { %v2208_v45 = vpop.xlane.xlu1 %2207  ;;  %2227 = vmatpush.bf16.msra.mxu3 %v2218_v44  ;;  %v5246_v44 = vld [vmem:[%s5804_s2 + $0x84] sm:$0xf]  ;;  %v4610_v46 = vor.u32 %v5254_v43, %v4609_v42 }
 0x87f   : > { %5533 = vrcp.f32 %v2208_v45 }
 0x880   : > { %2582 = vmatpush.bf16.msrb.mxu0 %v4610_v46 }
 0x885   : > { %v5534_v48 = vpop.eup %5533  ;;  %4531 = vmatmul.msk.bf16.vlgmr.msra.gmra.mxu0 %vm1084_vm2, %v2153_v47  ;;  %v4611_v47 = vld [vmem:[%s5804_s2 + $0xc0] sm:$0xf0] }
 0x886   : > { %v2210_v50 = vmul.f32 %v5534_v48, %v5520_v9  ;;  %v4617_v48 = vld [vmem:[%s5804_s2 + $0x88] sm:$0xf] }
 0x888   : > { %v2211_v51 = vpack.c.bf16 %v2210_v50, %v2210_v50  ;;  %v5255_v50 = vld [vmem:[%s5804_s2 + $0xc4] sm:$0xf0] }
 0x88a   : > { %4533 = vmatmul.msk.bf16.vlgmr.msra.gmra.mxu3 %vm1084_vm2, %v2211_v51 }
 0x8ba   : > { %v1866_v52 = vpop.f32.mrf.mxu3 }
 0x8bc   : > { %v1924_v53 = vpop.f32.mrf.mxu0 }
 0x8c2   : > { %v1868_v54 = vpop.f32.mrf.mxu3 }
 0x8c3   : > { %v5247_v54 = vld [vmem:[%s5804_s2 + $0x8c] sm:$0xf] }
 0x8c4   : > { %v1926_v55 = vpop.f32.mrf.mxu0 }
 0x8c5   : > { %v4619_v55 = vld [vmem:[%s5804_s2 + $0xc8] sm:$0xf0] }
 0x8ca   : > { %v1982_v56 = vpop.f32.mrf.mxu3 }
 0x8d2   : > { %v1984_v57 = vpop.f32.mrf.mxu3 }
 0x8da   : > { %v2113_v58 = vpop.f32.mrf.mxu3 }
 0x8db   : > { %v5438_v59 = vpack.i.bf16 %v2113_v58, %v1866_v52  ;;  %v4614_v52 = vor.u32 %v5246_v44, %v4611_v47  ;;  %v4545_v58 = vld [vmem:[%s5804_s2] sm:$0xf] }
 0x8dc   : > { %v5460_v47 = vld [vmem:[%s6604_s22] ss:$0 sm:$0xff]  ;;  %s6613_s22 = sld [smem:[#allocation27_spill]] (!%p5199_p5) }
 0x8dd   : > { %5439 = vrot.lane.b32.xlu0 %v5438_v59, %s5595_s15  ;;  %2596 = vmatpush.bf16.msrb.mxu1 %v4614_v52  ;;  %v5238_v59 = vld [vmem:[%s5804_s2 + $0x3c] sm:$0xf0] }
 0x8e2   : > { %v2115_v60 = vpop.f32.mrf.mxu3 }
 0x8e3   : > { %v4546_v60 = vor.u32 %v5238_v59, %v4545_v58  ;;  %v4643_v58 = vld [vmem:[%s5804_s2 + $0xe0] sm:$0xf0]  ;;  %v4649_v59 = vld [vmem:[%s5804_s2 + $0xa8] sm:$0xf] }
 0x8e5   : > { %2583 = vmatpush.bf16.msrb.mxu0 %v4546_v60 }
 0x8f2   : > { %v2054_v49 = vpop.f32.mrf.mxu0 }
 0x8fa   : > { %v2056_v61 = vpop.f32.mrf.mxu0 }
 0x8fb   : > { %v4547_v61 = vld [vmem:[%s5804_s2 + $0x40] sm:$0xf0] }
 0x902   : > { %v2171_v62 = vpop.f32.mrf.mxu0 }
 0x903   : > { %v5443_v63 = vpack.i.bf16 %v2171_v62, %v1924_v53  ;;  %v4618_v53 = vor.u32 %v5255_v50, %v4617_v48  ;;  %v4553_v62 = vld [vmem:[%s5804_s2 + $0x8] sm:$0xf] }
 0x905   : > { %5444 = vrot.lane.b32.xlu2 %v5443_v63, %s5596_s16  ;;  %2610 = vmatpush.bf16.msrb.mxu3 %v4618_v53  ;;  %s6605_s16 = sld [smem:[#allocation20_spill]] }
 0x90a   : > { %v2173_v13 = vpop.f32.mrf.mxu0 }
 0x90b   : > { %v5239_v13 = vld [vmem:[%s5804_s2 + $0x44] sm:$0xf0] }
 0x90d   : > { %v2229_v0 = vpop.f32.mrf.mxu3 }
 0x90e   : > { %v5448_v1 = vpack.i.bf16 %v2229_v0, %v1982_v56  ;;  %v4622_v56 = vor.u32 %v5247_v54, %v4619_v55  ;;  %v5231_v0 = vld [vmem:[%s5804_s2 + $0xc] sm:$0xf] }
 0x910   : > { %5449 = vrot.lane.b32.xlu0 %v5448_v1, %s5597_s17  ;;  %2624 = vmatpush.bf16.msra.mxu2 %v4622_v56  ;;  %v4555_v1 = vld [vmem:[%s5804_s2 + $0x48] sm:$0xf0]  ;;  %s6606_s17 = scalar_lea.vmem %s6605_s16, %s5738_s27  ;;  %v4641_v56 = vld [vmem:[%s5804_s2 + $0xa0] sm:$0xf] }
 0x911   : > { %v4558_v3 = vor.u32 %v5231_v0, %v4555_v1  ;;  %v5461_v52 = vld [vmem:[%s6606_s17] ss:$0 sm:$0xff] }
 0x912   : > { %v4577_v1 = vld [vmem:[%s5804_s2 + $0x20] sm:$0xf] }
 0x914   : > { %2625 = vmatpush.bf16.msra.mxu2 %v4558_v3 }
 0x915   : > { %v2231_v2 = vpop.f32.mrf.mxu3 }
 0x916   : > { %v4554_v2 = vor.u32 %v5239_v13, %v4553_v62  ;;  %v5251_v62 = vld [vmem:[%s5804_s2 + $0xac] sm:$0xf] }
 0x918   : > { %2611 = vmatpush.bf16.msrb.mxu3 %v4554_v2  ;;  %v5242_v2 = vld [vmem:[%s5804_s2 + $0x5c] sm:$0xf0] }
 0x94f   : > { %v5440_v9 = vpop.permute.xlu0 %5439 }
 0x950   : > { %v5442_v12 = vunpack.i.h.bf16 %v5440_v9  ;;  %v5441_v14 = vunpack.i.l.bf16 %v5440_v9  ;;  %v4625_v9 = vld [vmem:[%s5804_s2 + $0x90] sm:$0xf] }
 0x952   : > { %v2245_v18 = vsel %vm1084_vm2, %v2054_v49, %v5442_v12  ;;  %v1998_v19 = vsel %vm1084_vm2, %v1807_v34, %v5441_v14  ;;  %v5230_v49 = vld [vmem:[%s5804_s2 + $0x4] sm:$0xf]  ;;  %v5248_v12 = vld [vmem:[%s5804_s2 + $0x94] sm:$0xf] }
 0x953   : > { %v4550_v63 = vor.u32 %v5230_v49, %v4547_v61  ;;  %v5259_v61 = vld [vmem:[%s5804_s2 + $0xe4] sm:$0xf0] }
 0x954   : > { %v4650_v3 = vor.u32 %v5259_v61, %v4649_v59  ;;  %v5265_v59 = vld [vmem:[%s5819_s24 + $0x18] sm:$0xff] }
 0x955   : > { %2597 = vmatpush.bf16.msrb.mxu1 %v4550_v63  ;;  %v5273_v61 = vld [vmem:[%s5819_s24 + $0x58] sm:$0xff] }
 0x95f   : > { %v5445_v11 = vpop.permute.xlu2 %5444 }
 0x960   : > { %v5447_v15 = vunpack.i.h.bf16 %v5445_v11  ;;  %v5446_v16 = vunpack.i.l.bf16 %v5445_v11  ;;  %v5256_v11 = vld [vmem:[%s5804_s2 + $0xcc] sm:$0xf0] }
 0x962   : > { %v1999_v23 = vsel %vm1323_vm4, %v1998_v19, %v5446_v16  ;;  %v2246_v20 = vsel %vm1323_vm4, %v2245_v18, %v5447_v15  ;;  %v4626_v15 = vor.u32 %v5256_v11, %v4625_v9  ;;  %v4627_v16 = vld [vmem:[%s5804_s2 + $0xd0] sm:$0xf0]  ;;  %v5257_v18 = vld [vmem:[%s5804_s2 + $0xd4] sm:$0xf0]  ;;  %v5234_v9 = vld [vmem:[%s5804_s2 + $0x24] sm:$0xf] }
 0x963   : > { %v4630_v19 = vor.u32 %v5248_v12, %v4627_v16  ;;  %v4579_v11 = vld [vmem:[%s5804_s2 + $0x60] sm:$0xf0]  ;;  %v4585_v12 = vld [vmem:[%s5804_s2 + $0x28] sm:$0xf]  ;;  %v4587_v16 = vld [vmem:[%s5804_s2 + $0x68] sm:$0xf0] }
 0x964   : > { %2638 = vmatpush.bf16.msra.mxu0 %v4626_v15  ;;  %v5235_v15 = vld [vmem:[%s5804_s2 + $0x2c] sm:$0xf] }
 0x965   : > { %2652 = vmatpush.bf16.msra.mxu1 %v4630_v19 }
 0x982   : > { %v5450_v17 = vpop.permute.xlu0 %5449 }
 0x983   : > { %v5452_v21 = vunpack.i.h.bf16 %v5450_v17  ;;  %v5451_v22 = vunpack.i.l.bf16 %v5450_v17  ;;  %v4633_v17 = vld [vmem:[%s5804_s2 + $0x98] sm:$0xf] }
 0x985   : > { %v2000_v4 = vsel %vm1325_vm5, %v1999_v23, %v5451_v22  ;;  %v2247_v24 = vsel %vm1325_vm5, %v2246_v20, %v5452_v21  ;;  %v4634_v21 = vor.u32 %v5257_v18, %v4633_v17  ;;  %v5249_v22 = vld [vmem:[%s5804_s2 + $0x9c] sm:$0xf]  ;;  %v4561_v20 = vld [vmem:[%s5804_s2 + $0x10] sm:$0xf]  ;;  %v4578_v17 = vor.u32 %v5242_v2, %v4577_v1 }
 0x986   : > { %v2252_v5 = vpack.c.bf16 %v2247_v24, %v2000_v4  ;;  %v4635_v23 = vld [vmem:[%s5804_s2 + $0xd8] sm:$0xf0]  ;;  %v4582_v18 = vor.u32 %v5234_v9, %v4579_v11  ;;  %v5280_v1 = vld [vmem:[%s5819_s24 + $0x90] sm:$0xff]  ;;  %v5287_v9 = vld [vmem:[%s5819_s24 + $0xc8] sm:$0xff] }
 0x987   : > { %2666 = vmatpush.bf16.msra.mxu3 %v4634_v21  ;;  %v4590_v21 = vor.u32 %v5235_v15, %v4587_v16  ;;  %v5288_v2 = vld [vmem:[%s5819_s24 + $0xd0] sm:$0xff]  ;;  %v5262_v11 = vld [vmem:[%s5819_s24] sm:$0xff]  ;;  %v5309_v15 = vld [vmem:[%s5819_s24 + $0x178] sm:$0xff] }
 0x988   : > { %4542 = vmatmul.msk.bf16.vlgmr.msrb.gmra.mxu2 %vm1062_vm1, %v2252_v5  ;;  %v4638_v5 = vor.u32 %v5249_v22, %v4635_v23  ;;  %v4657_v22 = vld [vmem:[%s5804_s2 + $0xb0] sm:$0xf]  ;;  %v5278_v16 = vld [vmem:[%s5819_s24 + $0x80] sm:$0xff] }
 0x989   : > { %v5260_v23 = vld [vmem:[%s5804_s2 + $0xec] sm:$0xf0] }
 0x98a   : > { %2680 = vmatpush.bf16.msrb.mxu2 %v4638_v5  ;;  %v5261_v5 = vld [vmem:[%s5804_s2 + $0xf4] sm:$0xf0] }
 0xa0b   : > { %v2281_v26 = vpop.f32.mrf.mxu2 }
 0xa0c   : > { %v2282_v28 = vadd.f32 %v5459_v25, %v2281_v26  ;;  %v5232_v26 = vld [vmem:[%s5804_s2 + $0x14] sm:$0xf] }
 0xa0e   : > { %v2286_v29 = vadd.f32 %v2282_v28, %v6039_v7 }
 0xa10   : > { %v2290_v30 = vsel %vm1062_vm1, %v2286_v29, 0.0 }
 0xa11   : > { %2291 = vadd.xlane.f32.xlu2 %v2290_v30  ;;  %v4563_v30 = vld [vmem:[%s5804_s2 + $0x50] sm:$0xf0] }
 0xa13   : > { %v2283_v31 = vpop.f32.mrf.mxu2 }
 0xa14   : > { %v2284_v32 = vadd.f32 %v5459_v25, %v2283_v31  ;;  %v5240_v25 = vld [vmem:[%s5804_s2 + $0x4c] sm:$0xf0]  ;;  %v4569_v31 = vld [vmem:[%s5804_s2 + $0x18] sm:$0xf] }
 0xa16   : > { %v2287_v33 = vadd.f32 %v2284_v32, %v6041_v8  ;;  %v5241_v32 = vld [vmem:[%s5804_s2 + $0x54] sm:$0xf0] }
 0xa18   : > { %v2293_v34 = vsel %vm1062_vm1, %v2287_v33, 0.0 }
 0xa19   : > { %2294 = vadd.xlane.f32.xlu0 %v2293_v34  ;;  %v4570_v34 = vor.u32 %v5241_v32, %v4569_v31  ;;  %v5244_v31 = vld [vmem:[%s5804_s2 + $0x6c] sm:$0xf0] }
 0xa1b   : > { %2667 = vmatpush.bf16.msra.mxu3 %v4570_v34  ;;  %v5236_v34 = vld [vmem:[%s5804_s2 + $0x34] sm:$0xf] }
 0xa84   : > { %v2292_v10 = vpop.xlane.xlu2 %2291 }
 0xa85   : > { %v2296_v35 = vmul.f32 %v2292_v10, %v6004_v27  ;;  %v5233_v10 = vld [vmem:[%s5804_s2 + $0x1c] sm:$0xf] }
 0xa87   : > { %v6190_v36 = vsub.f32 %v2286_v29, %v2296_v35  ;;  %v4562_v29 = vor.u32 %v5240_v25, %v4561_v20  ;;  %v4571_v35 = vld [vmem:[%s5804_s2 + $0x58] sm:$0xf0]  ;;  %v5252_v20 = vld [vmem:[%s5804_s2 + $0xb4] sm:$0xf] }
 0xa88   : > { %v5253_v25 = vld [vmem:[%s5804_s2 + $0xbc] sm:$0xf] }
 0xa89   : > { %v2300_v7 = vmul.f32 %v6190_v36, %v6190_v36  ;;  %2639 = vmatpush.bf16.msra.mxu0 %v4562_v29 }
 0xa8b   : > { %v2302_v37 = vsel %vm1062_vm1, %v2300_v7, 0.0 }
 0xa8c   : > { %v2295_v38 = vpop.xlane.xlu0 %2294  ;;  %2303 = vadd.xlane.f32.xlu1 %v2302_v37  ;;  %v4574_v37 = vor.u32 %v5233_v10, %v4571_v35  ;;  %v4595_v10 = vld [vmem:[%s5804_s2 + $0x70] sm:$0xf0]  ;;  %v4601_v35 = vld [vmem:[%s5804_s2 + $0x38] sm:$0xf] }
 0xa8d   : > { %v2297_v8 = vmul.f32 %v2295_v38, %v6004_v27 }
 0xa8e   : > { %2681 = vmatpush.bf16.msrb.mxu2 %v4574_v37  ;;  %v5237_v37 = vld [vmem:[%s5804_s2 + $0x3c] sm:$0xf] }
 0xa8f   : > { %v6196_v39 = vsub.f32 %v2287_v33, %v2297_v8  ;;  %v4566_v33 = vor.u32 %v5232_v26, %v4563_v30  ;;  %v4667_v26 = vld [vmem:[%s5804_s2 + $0xf8] sm:$0xf0]  ;;  %v4593_v30 = vld [vmem:[%s5804_s2 + $0x30] sm:$0xf] }
 0xa91   : > { %v2301_v40 = vmul.f32 %v6196_v39, %v6196_v39  ;;  %2653 = vmatpush.bf16.msra.mxu1 %v4566_v33  ;;  %v4670_v33 = vor.u32 %v5253_v25, %v4667_v26  ;;  %v5306_v25 = vld [vmem:[%s5819_s24 + $0x160] sm:$0xff]  ;;  %v5315_v26 = vld [vmem:[%s5819_s24 + $0x1a8] sm:$0xff] }
 0xa93   : > { %v2305_v41 = vsel %vm1062_vm1, %v2301_v40, 0.0 }
 0xa94   : > { %2306 = vadd.xlane.f32.xlu1 %v2305_v41 }
 0xaff   : > { %v2304_v45 = vpop.xlane.xlu1 %2303 }
 0xb00   : > { %v2308_v51 = vmul.f32 %v2304_v45, %v6004_v27 }
 0xb02   : > { %v6210_v57 = vadd.f32 1e-05, %v2308_v51 }
 0xb04   : > { %5535 = vrsqrt.f32 %v6210_v57  ;;  %vm2318_vm15 = vweird.f32 %v6210_v57 }
 0xb07   : > { %v2307_v6 = vpop.xlane.xlu1 %2306 }
 0xb08   : > { %v2309_v14 = vmul.f32 %v2307_v6, %v6004_v27 }
 0xb0a   : > { %v5536_v4 = vpop.eup %5535  ;;  %v2311_v24 = vadd.f32 1e-05, %v2309_v14  ;;  %v5243_v14 = vld [vmem:[%s5804_s2 + $0x64] sm:$0xf0] }
 0xb0b   : > { %v2313_v28 = vmul.f32 %v5536_v4, %v6210_v57  ;;  %vm2319_vm14 = vweird.f32 %v5536_v4  ;;  %v5250_v57 = vld [vmem:[%s5804_s2 + $0xa4] sm:$0xf]  ;;  %v4586_v19 = vor.u32 %v5243_v14, %v4585_v12  ;;  %v5301_v14 = vld [vmem:[%s5819_s24 + $0x138] sm:$0xff] }
 0xb0c   : > { %5537 = vrsqrt.f32 %v2311_v24  ;;  %vm2320_vm0 = vmor %vm2318_vm15, %vm2319_vm14  ;;  %vm2328_vm3 = vweird.f32 %v2311_v24  ;;  %v4646_v0 = vor.u32 %v5250_v57, %v4643_v58  ;;  %v5282_v57 = vld [vmem:[%s5819_s24 + $0xa0] sm:$0xff] }
 0xb0d   : > { %v2314_v7 = vmul.f32 %v5536_v4, %v2313_v28  ;;  %v4658_v28 = vor.u32 %v5260_v23, %v4657_v22  ;;  %v5290_v58 = vld [vmem:[%s5819_s24 + $0xe0] sm:$0xff]  ;;  %v5308_v22 = vld [vmem:[%s5819_s24 + $0x170] sm:$0xff] }
 0xb0e   : > { %v5270_v12 = vld [vmem:[%s5819_s24 + $0x40] sm:$0xff]  ;;  %v5316_v23 = vld [vmem:[%s5819_s24 + $0x1b0] sm:$0xff] }
 0xb0f   : > { %v2315_v38 = vmul.f32 0.5, %v2314_v7  ;;  %v5245_v7 = vld [vmem:[%s5804_s2 + $0x74] sm:$0xf0] }
 0xb11   : > { %v2316_v8 = vsub.f32 1.5, %v2315_v38  ;;  %v4603_v38 = vld [vmem:[%s5804_s2 + $0x78] sm:$0xf0] }
 0xb12   : > { %v5538_v40 = vpop.eup %5537 }
 0xb13   : > { %v2317_v41 = vmul.f32 %v5536_v4, %v2316_v8  ;;  %v2323_v42 = vmul.f32 %v5538_v40, %v2311_v24  ;;  %vm2329_vm2 = vweird.f32 %v5538_v40  ;;  %v4665_v24 = vld [vmem:[%s5804_s2 + $0xb8] sm:$0xf]  ;;  %v4594_v8 = vor.u32 %v5244_v31, %v4593_v30  ;;  %v5314_v31 = vld [vmem:[%s5819_s24 + $0x1a0] sm:$0xff] }
 0xb14   : > { %vm2330_vm4 = vmor %vm2328_vm3, %vm2329_vm2  ;;  %v4666_v32 = vor.u32 %v5261_v5, %v4665_v24  ;;  %v5307_v24 = vld [vmem:[%s5819_s24 + $0x168] sm:$0xff]  ;;  %v5298_v5 = vld [vmem:[%s5819_s24 + $0x120] sm:$0xff] }
 0xb15   : > { %v2324_v43 = vmul.f32 %v5538_v40, %v2323_v42  ;;  %v2321_v44 = vsel %vm2320_vm0, %v5536_v4, %v2317_v41  ;;  %v4659_v4 = vld [vmem:[%s5804_s2 + $0xf0] sm:$0xf0]  ;;  %v4602_v41 = vor.u32 %v5245_v7, %v4601_v35  ;;  %v4606_v42 = vor.u32 %v5237_v37, %v4603_v38  ;;  %v5305_v30 = vld [vmem:[%s5819_s24 + $0x158] sm:$0xff]  ;;  %v5295_v7 = vld [vmem:[%s5819_s24 + $0x108] sm:$0xff] }
 0xb16   : > { %v2332_v48 = vmul.f32 %v2321_v44, %v6190_v36  ;;  %v5258_v36 = vld [vmem:[%s5804_s2 + $0xdc] sm:$0xf0]  ;;  %v4662_v29 = vor.u32 %v5252_v20, %v4659_v4  ;;  %v5277_v44 = vld [vmem:[%s5819_s24 + $0x78] sm:$0xff]  ;;  %v5324_v20 = vld [vmem:[%s5819_s24 + $0x1f0] sm:$0xff] }
 0xb17   : > { %v2325_v45 = vmul.f32 0.5, %v2324_v43  ;;  %v4642_v13 = vor.u32 %v5258_v36, %v4641_v56  ;;  %v5269_v43 = vld [vmem:[%s5819_s24 + $0x38] sm:$0xff]  ;;  %v5266_v56 = vld [vmem:[%s5819_s24 + $0x20] sm:$0xff]  ;;  %v5299_v4 = vld [vmem:[%s5819_s24 + $0x128] sm:$0xff] }
 0xb18   : > { %v2337_v53 = vmul.f32 %v5460_v47, %v2332_v48  ;;  %v5276_v48 = vld [vmem:[%s5819_s24 + $0x70] sm:$0xff]  ;;  %v5274_v36 = vld [vmem:[%s5819_s24 + $0x60] sm:$0xff]  ;;  %v5321_v35 = vld [vmem:[%s5819_s24 + $0x1d8] sm:$0xff] }
 0xb19   : > { %v2326_v46 = vsub.f32 1.5, %v2325_v45  ;;  %v5285_v45 = vld [vmem:[%s5819_s24 + $0xb8] sm:$0xff]  ;;  %v5303_v37 = vld [vmem:[%s5819_s24 + $0x148] sm:$0xff]  ;;  %v5312_v38 = vld [vmem:[%s5819_s24 + $0x190] sm:$0xff] }
 0xb1a   : > { %v6257_v60 = vadd.f32 %v5461_v52, %v2337_v53  ;;  %v5275_v53 = vld [vmem:[%s5819_s24 + $0x68] sm:$0xff] }
 0xb1b   : > { %v2327_v50 = vmul.f32 %v5538_v40, %v2326_v46  ;;  %v5293_v46 = vld [vmem:[%s5819_s24 + $0xf8] sm:$0xff] }
 0xb1d   : > { %v2331_v51 = vsel %vm2330_vm4, %v5538_v40, %v2327_v50  ;;  %v4598_v40 = vor.u32 %v5236_v34, %v4595_v10  ;;  %v5284_v50 = vld [vmem:[%s5819_s24 + $0xb0] sm:$0xff]  ;;  %v5313_v10 = vld [vmem:[%s5819_s24 + $0x198] sm:$0xff] }
 0xb1e   : > { %v2333_v54 = vmul.f32 %v2331_v51, %v6196_v39  ;;  %v4651_v39 = vld [vmem:[%s5804_s2 + $0xe8] sm:$0xf0]  ;;  %v5292_v51 = vld [vmem:[%s5819_s24 + $0xf0] sm:$0xff] }
 0xb1f   : > { %v4654_v6 = vor.u32 %v5251_v62, %v4651_v39  ;;  %v5281_v62 = vld [vmem:[%s5819_s24 + $0x98] sm:$0xff]  ;;  %v5304_v34 = vld [vmem:[%s5819_s24 + $0x150] sm:$0xff] }
 0xb20   : > { %v2338_v55 = vmul.f32 %v5460_v47, %v2333_v54  ;;  %v5268_v47 = vld [vmem:[%s5819_s24 + $0x30] sm:$0xff]  ;;  %v5283_v54 = vld [vmem:[%s5819_s24 + $0xa8] sm:$0xff]  ;;  %v5289_v39 = vld [vmem:[%s5819_s24 + $0xd8] sm:$0xff] }
 0xb22   : > { %v6259_v49 = vadd.f32 %v5461_v52, %v2338_v55  ;;  %v5267_v52 = vld [vmem:[%s5819_s24 + $0x28] sm:$0xff] }
 0xb23   : > { %v5291_v55 = vld [vmem:[%s5819_s24 + $0xe8] sm:$0xff] }
 0xb24   : > { %v6266_v63 = vpack.c.bf16 %v6259_v49, %v6257_v60 }
 0xb26   : > { %4671 = vmatmul.msk.bf16.vlgmr.msrb.gmra.mxu0 %vm1062_vm1, %v6266_v63  ;;  %4672 = vmatmul.msk.bf16.vlgmr.msrb.gmra.mxu1 %vm1062_vm1, %v6266_v63 }
 0xb27   : > { %4673 = vmatmul.msk.bf16.vlgmr.msrb.gmra.mxu3 %vm1062_vm1, %v6266_v63  ;;  %4674 = vmatmul.msk.bf16.vlgmr.msra.gmra.mxu2 %vm1062_vm1, %v6266_v63 }
 0xb28   : > { %2694 = vmatpush.bf16.msrb.mxu0 %v4642_v13  ;;  %2708 = vmatpush.bf16.msrb.mxu1 %v4646_v0  ;;  %v5264_v13 = vld [vmem:[%s5819_s24 + $0x10] sm:$0xff] }
 0xb29   : > { %2722 = vmatpush.bf16.msrb.mxu3 %v4650_v3  ;;  %2736 = vmatpush.bf16.msra.mxu2 %v4654_v6  ;;  %v5272_v0 = vld [vmem:[%s5819_s24 + $0x50] sm:$0xff]  ;;  %v5263_v3 = vld [vmem:[%s5819_s24 + $0x8] sm:$0xff] }
 0xb2a   : > { %v5279_v6 = vld [vmem:[%s5819_s24 + $0x88] sm:$0xff] }
 0xb2c   : > { %2695 = vmatpush.bf16.msrb.mxu0 %v4578_v17  ;;  %2709 = vmatpush.bf16.msrb.mxu1 %v4582_v18  ;;  %v5286_v17 = vld [vmem:[%s5819_s24 + $0xc0] sm:$0xff]  ;;  %v5317_v18 = vld [vmem:[%s5819_s24 + $0x1b8] sm:$0xff] }
 0xb2d   : > { %2723 = vmatpush.bf16.msrb.mxu3 %v4586_v19  ;;  %2737 = vmatpush.bf16.msra.mxu2 %v4590_v21  ;;  %v5325_v19 = vld [vmem:[%s5819_s24 + $0x1f8] sm:$0xff]  ;;  %v5300_v21 = vld [vmem:[%s5819_s24 + $0x130] sm:$0xff] }
 0xb36   : > { %4675 = vmatmul.msk.bf16.vlgmr.msra.gmra.mxu0 %vm1062_vm1, %v6266_v63  ;;  %4676 = vmatmul.msk.bf16.vlgmr.msra.gmra.mxu1 %vm1062_vm1, %v6266_v63 }
 0xb37   : > { %4677 = vmatmul.msk.bf16.vlgmr.msra.gmra.mxu3 %vm1062_vm1, %v6266_v63  ;;  %4678 = vmatmul.msk.bf16.vlgmr.msrb.gmra.mxu2 %vm1062_vm1, %v6266_v63 }
 0xb38   : > { %2750 = vmatpush.bf16.msra.mxu0 %v4658_v28  ;;  %2764 = vmatpush.bf16.msra.mxu1 %v4662_v29  ;;  %v5323_v28 = vld [vmem:[%s5819_s24 + $0x1e8] sm:$0xff]  ;;  %v5297_v29 = vld [vmem:[%s5819_s24 + $0x118] sm:$0xff] }
 0xb39   : > { %2778 = vmatpush.bf16.msra.mxu3 %v4666_v32  ;;  %2792 = vmatpush.bf16.msrb.mxu2 %v4670_v33  ;;  %v5322_v32 = vld [vmem:[%s5819_s24 + $0x1e0] sm:$0xff]  ;;  %v5296_v33 = vld [vmem:[%s5819_s24 + $0x110] sm:$0xff] }
 0xb3c   : > { %2751 = vmatpush.bf16.msra.mxu0 %v4594_v8  ;;  %2765 = vmatpush.bf16.msra.mxu1 %v4598_v40  ;;  %v5320_v8 = vld [vmem:[%s5819_s24 + $0x1d0] sm:$0xff]  ;;  %v5294_v40 = vld [vmem:[%s5819_s24 + $0x100] sm:$0xff] }
 0xb3d   : > { %2779 = vmatpush.bf16.msra.mxu3 %v4602_v41  ;;  %2793 = vmatpush.bf16.msrb.mxu2 %v4606_v42  ;;  %v5302_v41 = vld [vmem:[%s5819_s24 + $0x140] sm:$0xff]  ;;  %v5311_v42 = vld [vmem:[%s5819_s24 + $0x188] sm:$0xff] }
 0xb46   : > { %4679 = vmatmul.msk.bf16.vlgmr.msrb.gmra.mxu0 %vm1062_vm1, %v6266_v63  ;;  %4680 = vmatmul.msk.bf16.vlgmr.msrb.gmra.mxu1 %vm1062_vm1, %v6266_v63 }
 0xb47   : > { %4681 = vmatmul.msk.bf16.vlgmr.msrb.gmra.mxu3 %vm1062_vm1, %v6266_v63  ;;  %4682 = vmatmul.msk.bf16.vlgmr.msra.gmra.mxu2 %vm1062_vm1, %v6266_v63 }
 0xb48   : > { %3876 = vmatpush.bf16.msrb.mxu0 %v5269_v43  ;;  %3890 = vmatpush.bf16.msrb.mxu1 %v5277_v44  ;;  %v5319_v43 = vld [vmem:[%s5819_s24 + $0x1c8] sm:$0xff]  ;;  %v5310_v44 = vld [vmem:[%s5819_s24 + $0x180] sm:$0xff] }
 0xb49   : > { %3904 = vmatpush.bf16.msrb.mxu3 %v5285_v45  ;;  %3918 = vmatpush.bf16.msra.mxu2 %v5293_v46  ;;  %v5318_v45 = vld [vmem:[%s5819_s24 + $0x1c0] sm:$0xff] }
 0xb4a   : > { %v6389_v46 = vld [vmem:[%s5809_s10] sm:$0xff] }
 0xb4c   : > { %3877 = vmatpush.bf16.msrb.mxu0 %v5268_v47  ;;  %3891 = vmatpush.bf16.msrb.mxu1 %v5276_v48 }
 0xb4d   : > { %3905 = vmatpush.bf16.msrb.mxu3 %v5284_v50  ;;  %3919 = vmatpush.bf16.msra.mxu2 %v5292_v51  ;;  %v2381_v50 = vperm.slane %v6389_v46, 0  ;;  %v2382_v51 = vperm.slane %v6389_v46, 1 }
 0xb50   : > { %3878 = vmatpush.bf16.msrb.mxu0 %v5267_v52  ;;  %3892 = vmatpush.bf16.msrb.mxu1 %v5275_v53 }
 0xb51   : > { %3906 = vmatpush.bf16.msrb.mxu3 %v5283_v54  ;;  %3920 = vmatpush.bf16.msra.mxu2 %v5291_v55 }
 0xb54   : > { %3879 = vmatpush.bf16.msrb.mxu0 %v5266_v56  ;;  %3893 = vmatpush.bf16.msrb.mxu1 %v5274_v36 }
 0xb55   : > { %3907 = vmatpush.bf16.msrb.mxu3 %v5282_v57  ;;  %3921 = vmatpush.bf16.msra.mxu2 %v5290_v58 }
 0xb56   : > { %4683 = vmatmul.msk.bf16.vlgmr.msra.gmra.mxu0 %vm1062_vm1, %v6266_v63  ;;  %4684 = vmatmul.msk.bf16.vlgmr.msra.gmra.mxu1 %vm1062_vm1, %v6266_v63 }
 0xb57   : > { %4685 = vmatmul.msk.bf16.vlgmr.msra.gmra.mxu3 %vm1062_vm1, %v6266_v63  ;;  %4686 = vmatmul.msk.bf16.vlgmr.msrb.gmra.mxu2 %vm1062_vm1, %v6266_v63  ;;  %v5271_v63 = vld [vmem:[%s5819_s24 + $0x48] sm:$0xff] }
 0xb58   : > { %3880 = vmatpush.bf16.msrb.mxu0 %v5265_v59  ;;  %3894 = vmatpush.bf16.msrb.mxu1 %v5273_v61  ;;  %v2383_v59 = vperm.slane %v6389_v46, 2  ;;  %v2384_v61 = vperm.slane %v6389_v46, 3 }
 0xb59   : > { %3908 = vmatpush.bf16.msrb.mxu3 %v5281_v62  ;;  %3922 = vmatpush.bf16.msra.mxu2 %v5289_v39 }
 0xb5c   : > { %3881 = vmatpush.bf16.msrb.mxu0 %v5264_v13  ;;  %3895 = vmatpush.bf16.msrb.mxu1 %v5272_v0 }
 0xb5d   : > { %3909 = vmatpush.bf16.msrb.mxu3 %v5280_v1  ;;  %3923 = vmatpush.bf16.msra.mxu2 %v5288_v2  ;;  %v5333_v1 = vld [vmem:[%s5819_s24 + $0x238] sm:$0xff] }
 0xb5e   : > { %v5341_v2 = vld [vmem:[%s5819_s24 + $0x278] sm:$0xff] }
 0xb60   : > { %3882 = vmatpush.bf16.msrb.mxu0 %v5263_v3  ;;  %3896 = vmatpush.bf16.msrb.mxu1 %v5271_v63 }
 0xb61   : > { %3910 = vmatpush.bf16.msrb.mxu3 %v5279_v6  ;;  %3924 = vmatpush.bf16.msra.mxu2 %v5287_v9 }
 0xb64   : > { %3883 = vmatpush.bf16.msrb.mxu0 %v5262_v11  ;;  %3897 = vmatpush.bf16.msrb.mxu1 %v5270_v12 }
 0xb65   : > { %3911 = vmatpush.bf16.msrb.mxu3 %v5278_v16  ;;  %3925 = vmatpush.bf16.msra.mxu2 %v5286_v17 }
 0xb68   : > { %3932 = vmatpush.bf16.msra.mxu0 %v5301_v14  ;;  %3946 = vmatpush.bf16.msra.mxu1 %v5309_v15 }
 0xb69   : > { %3960 = vmatpush.bf16.msra.mxu3 %v5317_v18  ;;  %3974 = vmatpush.bf16.msrb.mxu2 %v5325_v19  ;;  %v5332_v18 = vld [vmem:[%s5819_s24 + $0x230] sm:$0xff] }
 0xb6a   : > { %v5340_v19 = vld [vmem:[%s5819_s24 + $0x270] sm:$0xff] }
 0xb6c   : > { %3933 = vmatpush.bf16.msra.mxu0 %v5300_v21  ;;  %3947 = vmatpush.bf16.msra.mxu1 %v5308_v22 }
 0xb6d   : > { %3961 = vmatpush.bf16.msra.mxu3 %v5316_v23  ;;  %3975 = vmatpush.bf16.msrb.mxu2 %v5324_v20 }
 0xb70   : > { %3934 = vmatpush.bf16.msra.mxu0 %v5299_v4  ;;  %3948 = vmatpush.bf16.msra.mxu1 %v5307_v24  ;;  %v2385_v4 = vperm.slane %v6389_v46, 4  ;;  %v2386_v24 = vperm.slane %v6389_v46, 5 }
 0xb71   : > { %3962 = vmatpush.bf16.msra.mxu3 %v5315_v26  ;;  %3976 = vmatpush.bf16.msrb.mxu2 %v5323_v28 }
 0xb74   : > { %3935 = vmatpush.bf16.msra.mxu0 %v5298_v5  ;;  %3949 = vmatpush.bf16.msra.mxu1 %v5306_v25  ;;  %v5349_v5 = vld [vmem:[%s5819_s24 + $0x2b8] sm:$0xff] }
 0xb75   : > { %3963 = vmatpush.bf16.msra.mxu3 %v5314_v31  ;;  %3977 = vmatpush.bf16.msrb.mxu2 %v5322_v32  ;;  %v5357_v25 = vld [vmem:[%s5819_s24 + $0x2f8] sm:$0xff] }
 0xb78   : > { %3936 = vmatpush.bf16.msra.mxu0 %v5297_v29  ;;  %3950 = vmatpush.bf16.msra.mxu1 %v5305_v30  ;;  %v5331_v29 = vld [vmem:[%s5819_s24 + $0x228] sm:$0xff] }
 0xb79   : > { %3964 = vmatpush.bf16.msra.mxu3 %v5313_v10  ;;  %3978 = vmatpush.bf16.msrb.mxu2 %v5321_v35  ;;  %v5339_v30 = vld [vmem:[%s5819_s24 + $0x268] sm:$0xff]  ;;  %v5348_v10 = vld [vmem:[%s5819_s24 + $0x2b0] sm:$0xff] }
 0xb7a   : > { %v5356_v35 = vld [vmem:[%s5819_s24 + $0x2f0] sm:$0xff] }
 0xb7c   : > { %3937 = vmatpush.bf16.msra.mxu0 %v5296_v33  ;;  %3951 = vmatpush.bf16.msra.mxu1 %v5304_v34 }
 0xb7d   : > { %3965 = vmatpush.bf16.msra.mxu3 %v5312_v38  ;;  %3979 = vmatpush.bf16.msrb.mxu2 %v5320_v8  ;;  %v5330_v38 = vld [vmem:[%s5819_s24 + $0x220] sm:$0xff] }
 0xb7e   : > { %v5338_v8 = vld [vmem:[%s5819_s24 + $0x260] sm:$0xff] }
 0xb80   : > { %3938 = vmatpush.bf16.msra.mxu0 %v5295_v7  ;;  %3952 = vmatpush.bf16.msra.mxu1 %v5303_v37 }
 0xb81   : > { %3966 = vmatpush.bf16.msra.mxu3 %v5311_v42  ;;  %3980 = vmatpush.bf16.msrb.mxu2 %v5319_v43  ;;  %v2387_v42 = vperm.slane %v6389_v46, 6  ;;  %v2388_v43 = vperm.slane %v6389_v46, 7 }
 0xb84   : > { %3939 = vmatpush.bf16.msra.mxu0 %v5294_v40  ;;  %3953 = vmatpush.bf16.msra.mxu1 %v5302_v41 }
 0xb85   : > { %3967 = vmatpush.bf16.msra.mxu3 %v5310_v44  ;;  %3981 = vmatpush.bf16.msrb.mxu2 %v5318_v45 }
 0xba3   : > { %v2585_v47 = vpop.f32.mrf.mxu0  ;;  %v2599_v48 = vpop.f32.mrf.mxu1 }
 0xba4   : > { %v2586_v52 = vadd.f32 %v2585_v47, %v2381_v50  ;;  %v2600_v53 = vadd.f32 %v2599_v48, %v2382_v51 }
 0xba6   : > { %v2800_v62 = vmax.f32 %v2586_v52, 0.0  ;;  %v2801_v39 = vmax.f32 %v2600_v53, 0.0 }
 0xbaa   : > { %v2613_v54 = vpop.f32.mrf.mxu3  ;;  %v2627_v55 = vpop.f32.mrf.mxu2 }
 0xbab   : > { %v2587_v56 = vpop.f32.mrf.mxu0  ;;  %v2601_v36 = vpop.f32.mrf.mxu1  ;;  %v2614_v6 = vadd.f32 %v2613_v54, %v2383_v59  ;;  %v2628_v9 = vadd.f32 %v2627_v55, %v2384_v61  ;;  %v5329_v54 = vld [vmem:[%s5819_s24 + $0x218] sm:$0xff] }
 0xbac   : > { %v2588_v57 = vadd.f32 %v2587_v56, %v2381_v50  ;;  %v2602_v58 = vadd.f32 %v2601_v36, %v2382_v51  ;;  %v5347_v50 = vld [vmem:[%s5819_s24 + $0x2a8] sm:$0xff]  ;;  %v5337_v55 = vld [vmem:[%s5819_s24 + $0x258] sm:$0xff] }
 0xbad   : > { %v2802_v21 = vmax.f32 %v2614_v6, 0.0  ;;  %v2803_v22 = vmax.f32 %v2628_v9, 0.0  ;;  %v5355_v51 = vld [vmem:[%s5819_s24 + $0x2e8] sm:$0xff] }
 0xbae   : > { %v2816_v13 = vmax.f32 %v2588_v57, 0.0  ;;  %v2817_v0 = vmax.f32 %v2602_v58, 0.0  ;;  %v5346_v58 = vld [vmem:[%s5819_s24 + $0x2a0] sm:$0xff] }
 0xbb0   : > { %v3088_v3 = vpack.c.bf16 %v2816_v13, %v2800_v62  ;;  %v3089_v63 = vpack.c.bf16 %v2817_v0, %v2801_v39  ;;  %v6418_v39 = vld [vmem:[%s5809_s10 + $0x8] sm:$0xff] }
 0xbb2   : > { %v2615_v11 = vpop.f32.mrf.mxu3  ;;  %v2629_v12 = vpop.f32.mrf.mxu2  ;;  %3884 = vmatmul.bf16.vlgmr.msrb.gmra.mxu0 %v3088_v3  ;;  %3898 = vmatmul.bf16.vlgmr.msrb.gmra.mxu1 %v3089_v63 }
 0xbb3   : > { %v2616_v14 = vadd.f32 %v2615_v11, %v2383_v59  ;;  %v2630_v15 = vadd.f32 %v2629_v12, %v2384_v61  ;;  %3988 = vmatpush.bf16.msrb.mxu0 %v5333_v1  ;;  %4002 = vmatpush.bf16.msrb.mxu1 %v5341_v2  ;;  %v2641_v16 = vpop.f32.mrf.mxu0  ;;  %v2655_v17 = vpop.f32.mrf.mxu1  ;;  %v5354_v59 = vld [vmem:[%s5819_s24 + $0x2e0] sm:$0xff]  ;;  %v5328_v1 = vld [vmem:[%s5819_s24 + $0x210] sm:$0xff]  ;;  %v2389_v11 = vperm.slane %v6418_v39, 0  ;;  %v2390_v12 = vperm.slane %v6418_v39, 1 }
 0xbb4   : > { %v2642_v31 = vadd.f32 %v2641_v16, %v2385_v4  ;;  %v2656_v32 = vadd.f32 %v2655_v17, %v2386_v24  ;;  %v5336_v2 = vld [vmem:[%s5819_s24 + $0x250] sm:$0xff] }
 0xbb5   : > { %v2818_v23 = vmax.f32 %v2616_v14, 0.0  ;;  %v2819_v20 = vmax.f32 %v2630_v15, 0.0  ;;  %v5345_v14 = vld [vmem:[%s5819_s24 + $0x298] sm:$0xff] }
 0xbb6   : > { %v2804_v44 = vmax.f32 %v2642_v31, 0.0  ;;  %v2805_v45 = vmax.f32 %v2656_v32, 0.0  ;;  %v5353_v15 = vld [vmem:[%s5819_s24 + $0x2d8] sm:$0xff]  ;;  %v2391_v31 = vperm.slane %v6418_v39, 2  ;;  %v2392_v32 = vperm.slane %v6418_v39, 3 }
 0xbb7   : > { %v3090_v26 = vpack.c.bf16 %v2818_v23, %v2802_v21  ;;  %v3091_v28 = vpack.c.bf16 %v2819_v20, %v2803_v22  ;;  %3989 = vmatpush.bf16.msrb.mxu0 %v5332_v18  ;;  %4003 = vmatpush.bf16.msrb.mxu1 %v5340_v19  ;;  %v5327_v18 = vld [vmem:[%s5819_s24 + $0x208] sm:$0xff] }
 0xbb8   : > { %v5335_v19 = vld [vmem:[%s5819_s24 + $0x248] sm:$0xff] }
 0xbb9   : > { %3912 = vmatmul.bf16.vlgmr.msrb.gmra.mxu3 %v3090_v26  ;;  %3926 = vmatmul.bf16.vlgmr.msra.gmra.mxu2 %v3091_v28 }
 0xbba   : > { %4016 = vmatpush.bf16.msrb.mxu3 %v5349_v5  ;;  %4030 = vmatpush.bf16.msra.mxu2 %v5357_v25  ;;  %v2669_v33 = vpop.f32.mrf.mxu3  ;;  %v2683_v34 = vpop.f32.mrf.mxu2 }
 0xbbb   : > { %3990 = vmatpush.bf16.msrb.mxu0 %v5331_v29  ;;  %4004 = vmatpush.bf16.msrb.mxu1 %v5339_v30  ;;  %v2643_v7 = vpop.f32.mrf.mxu0  ;;  %v2657_v37 = vpop.f32.mrf.mxu1  ;;  %v2670_v56 = vadd.f32 %v2669_v33, %v2387_v42  ;;  %v2684_v36 = vadd.f32 %v2683_v34, %v2388_v43  ;;  %v5326_v29 = vld [vmem:[%s5819_s24 + $0x200] sm:$0xff]  ;;  %v5365_v33 = vld [vmem:[%s5819_s24 + $0x338] sm:$0xff] }
 0xbbc   : > { %v2644_v40 = vadd.f32 %v2643_v7, %v2385_v4  ;;  %v2658_v41 = vadd.f32 %v2657_v37, %v2386_v24  ;;  %v5344_v4 = vld [vmem:[%s5819_s24 + $0x290] sm:$0xff]  ;;  %v5334_v30 = vld [vmem:[%s5819_s24 + $0x240] sm:$0xff]  ;;  %v5373_v34 = vld [vmem:[%s5819_s24 + $0x378] sm:$0xff] }
 0xbbd   : > { %v2806_v3 = vmax.f32 %v2670_v56, 0.0  ;;  %v2807_v63 = vmax.f32 %v2684_v36, 0.0  ;;  %v5352_v24 = vld [vmem:[%s5819_s24 + $0x2d0] sm:$0xff] }
 0xbbe   : > { %v2820_v47 = vmax.f32 %v2644_v40, 0.0  ;;  %v2821_v48 = vmax.f32 %v2658_v41, 0.0  ;;  %4017 = vmatpush.bf16.msrb.mxu3 %v5348_v10  ;;  %4031 = vmatpush.bf16.msra.mxu2 %v5356_v35 }
 0xbbf   : > { %3991 = vmatpush.bf16.msrb.mxu0 %v5330_v38  ;;  %4005 = vmatpush.bf16.msrb.mxu1 %v5338_v8  ;;  %v5343_v38 = vld [vmem:[%s5819_s24 + $0x288] sm:$0xff] }
 0xbc0   : > { %v3092_v52 = vpack.c.bf16 %v2820_v47, %v2804_v44  ;;  %v3093_v53 = vpack.c.bf16 %v2821_v48, %v2805_v45  ;;  %v5351_v8 = vld [vmem:[%s5819_s24 + $0x2c8] sm:$0xff]  ;;  %v5364_v44 = vld [vmem:[%s5819_s24 + $0x330] sm:$0xff] }
 0xbc1   : > { %v5372_v45 = vld [vmem:[%s5819_s24 + $0x370] sm:$0xff] }
 0xbc2   : > { %4018 = vmatpush.bf16.msrb.mxu3 %v5347_v50  ;;  %4032 = vmatpush.bf16.msra.mxu2 %v5355_v51  ;;  %v2671_v46 = vpop.f32.mrf.mxu3  ;;  %v2685_v57 = vpop.f32.mrf.mxu2  ;;  %v5342_v50 = vld [vmem:[%s5819_s24 + $0x280] sm:$0xff] }
 0xbc3   : > { %v2672_v61 = vadd.f32 %v2671_v46, %v2387_v42  ;;  %v2686_v62 = vadd.f32 %v2685_v57, %v2388_v43  ;;  %3940 = vmatmul.bf16.vlgmr.msra.gmra.mxu0 %v3092_v52  ;;  %3954 = vmatmul.bf16.vlgmr.msra.gmra.mxu1 %v3093_v53  ;;  %v2697_v13 = vpop.f32.mrf.mxu0  ;;  %v2711_v0 = vpop.f32.mrf.mxu1  ;;  %v5350_v51 = vld [vmem:[%s5819_s24 + $0x2c0] sm:$0xff] }
 0xbc4   : > { %3992 = vmatpush.bf16.msrb.mxu0 %v5329_v54  ;;  %4006 = vmatpush.bf16.msrb.mxu1 %v5337_v55  ;;  %v2698_v21 = vadd.f32 %v2697_v13, %v2389_v11  ;;  %v2712_v22 = vadd.f32 %v2711_v0, %v2390_v12  ;;  %v5381_v54 = vld [vmem:[%s5819_s24 + $0x3b8] sm:$0xff]  ;;  %v5380_v13 = vld [vmem:[%s5819_s24 + $0x3b0] sm:$0xff] }
 0xbc5   : > { %v2822_v6 = vmax.f32 %v2672_v61, 0.0  ;;  %v2823_v9 = vmax.f32 %v2686_v62, 0.0  ;;  %v5389_v55 = vld [vmem:[%s5819_s24 + $0x3f8] sm:$0xff]  ;;  %v5388_v0 = vld [vmem:[%s5819_s24 + $0x3f0] sm:$0xff] }
 0xbc6   : > { %4019 = vmatpush.bf16.msrb.mxu3 %v5346_v58  ;;  %4033 = vmatpush.bf16.msra.mxu2 %v5354_v59  ;;  %v2808_v10 = vmax.f32 %v2698_v21, 0.0  ;;  %v2809_v35 = vmax.f32 %v2712_v22, 0.0  ;;  %v5363_v58 = vld [vmem:[%s5819_s24 + $0x328] sm:$0xff] }
 0xbc7   : > { %v3094_v16 = vpack.c.bf16 %v2822_v6, %v2806_v3  ;;  %v3095_v17 = vpack.c.bf16 %v2823_v9, %v2807_v63  ;;  %v5371_v59 = vld [vmem:[%s5819_s24 + $0x368] sm:$0xff]  ;;  %v5362_v3 = vld [vmem:[%s5819_s24 + $0x320] sm:$0xff] }
 0xbc8   : > { %3993 = vmatpush.bf16.msrb.mxu0 %v5328_v1  ;;  %4007 = vmatpush.bf16.msrb.mxu1 %v5336_v2  ;;  %v5370_v63 = vld [vmem:[%s5819_s24 + $0x360] sm:$0xff]  ;;  %v5379_v6 = vld [vmem:[%s5819_s24 + $0x3a8] sm:$0xff] }
 0xbc9   : > { %3968 = vmatmul.bf16.vlgmr.msra.gmra.mxu3 %v3094_v16  ;;  %3982 = vmatmul.bf16.vlgmr.msrb.gmra.mxu2 %v3095_v17  ;;  %v5387_v9 = vld [vmem:[%s5819_s24 + $0x3e8] sm:$0xff]  ;;  %v5378_v16 = vld [vmem:[%s5819_s24 + $0x3a0] sm:$0xff] }
 0xbca   : > { %4020 = vmatpush.bf16.msrb.mxu3 %v5345_v14  ;;  %4034 = vmatpush.bf16.msra.mxu2 %v5353_v15  ;;  %v2725_v23 = vpop.f32.mrf.mxu3  ;;  %v2739_v20 = vpop.f32.mrf.mxu2  ;;  %v5386_v17 = vld [vmem:[%s5819_s24 + $0x3e0] sm:$0xff] }
 0xbcb   : > { %v2699_v5 = vpop.f32.mrf.mxu0  ;;  %v2713_v25 = vpop.f32.mrf.mxu1  ;;  %v2726_v42 = vadd.f32 %v2725_v23, %v2391_v31  ;;  %v2740_v43 = vadd.f32 %v2739_v20, %v2392_v32  ;;  %v5377_v23 = vld [vmem:[%s5819_s24 + $0x398] sm:$0xff] }
 0xbcc   : > { %3994 = vmatpush.bf16.msrb.mxu0 %v5327_v18  ;;  %4008 = vmatpush.bf16.msrb.mxu1 %v5335_v19  ;;  %v2700_v26 = vadd.f32 %v2699_v5, %v2389_v11  ;;  %v2714_v28 = vadd.f32 %v2713_v25, %v2390_v12  ;;  %v5361_v11 = vld [vmem:[%s5819_s24 + $0x318] sm:$0xff]  ;;  %v5360_v18 = vld [vmem:[%s5819_s24 + $0x310] sm:$0xff]  ;;  %v5359_v5 = vld [vmem:[%s5819_s24 + $0x308] sm:$0xff] }
 0xbcd   : > { %v2810_v56 = vmax.f32 %v2726_v42, 0.0  ;;  %v2811_v36 = vmax.f32 %v2740_v43, 0.0  ;;  %v5369_v12 = vld [vmem:[%s5819_s24 + $0x358] sm:$0xff]  ;;  %v5368_v19 = vld [vmem:[%s5819_s24 + $0x350] sm:$0xff]  ;;  %v5367_v25 = vld [vmem:[%s5819_s24 + $0x348] sm:$0xff] }
 0xbce   : > { %v2824_v7 = vmax.f32 %v2700_v26, 0.0  ;;  %v2825_v37 = vmax.f32 %v2714_v28, 0.0  ;;  %4021 = vmatpush.bf16.msrb.mxu3 %v5344_v4  ;;  %4035 = vmatpush.bf16.msra.mxu2 %v5352_v24  ;;  %v5385_v20 = vld [vmem:[%s5819_s24 + $0x3d8] sm:$0xff]  ;;  %v2393_v4 = vperm.slane %v6418_v39, 4  ;;  %v2394_v24 = vperm.slane %v6418_v39, 5 }
 0xbd0   : > { %v3096_v40 = vpack.c.bf16 %v2824_v7, %v2808_v10  ;;  %v3097_v41 = vpack.c.bf16 %v2825_v37, %v2809_v35  ;;  %3995 = vmatpush.bf16.msrb.mxu0 %v5326_v29  ;;  %4009 = vmatpush.bf16.msrb.mxu1 %v5334_v30  ;;  %v5376_v29 = vld [vmem:[%s5819_s24 + $0x390] sm:$0xff]  ;;  %v5358_v10 = vld [vmem:[%s5819_s24 + $0x300] sm:$0xff]  ;;  %v2395_v7 = vperm.slane %v6418_v39, 6  ;;  %v2396_v37 = vperm.slane %v6418_v39, 7 }
 0xbd1   : > { %v5384_v30 = vld [vmem:[%s5819_s24 + $0x3d0] sm:$0xff]  ;;  %v5366_v35 = vld [vmem:[%s5819_s24 + $0x340] sm:$0xff] }
 0xbd2   : > { %4022 = vmatpush.bf16.msrb.mxu3 %v5343_v38  ;;  %4036 = vmatpush.bf16.msra.mxu2 %v5351_v8  ;;  %v2727_v47 = vpop.f32.mrf.mxu3  ;;  %v2741_v48 = vpop.f32.mrf.mxu2  ;;  %v5374_v39 = vld [vmem:[%s5819_s24 + $0x380] sm:$0xff] }
 0xbd3   : > { %v2728_v52 = vadd.f32 %v2727_v47, %v2391_v31  ;;  %v2742_v53 = vadd.f32 %v2741_v48, %v2392_v32  ;;  %3996 = vmatmul.bf16.vlgmr.msrb.gmra.mxu0 %v3096_v40  ;;  %4010 = vmatmul.bf16.vlgmr.msrb.gmra.mxu1 %v3097_v41  ;;  %v2753_v1 = vpop.f32.mrf.mxu0  ;;  %v2767_v2 = vpop.f32.mrf.mxu1  ;;  %v5375_v40 = vld [vmem:[%s5819_s24 + $0x388] sm:$0xff] }
 0xbd4   : > { %4044 = vmatpush.bf16.msra.mxu0 %v5365_v33  ;;  %4058 = vmatpush.bf16.msra.mxu1 %v5373_v34  ;;  %v2754_v31 = vadd.f32 %v2753_v1, %v2393_v4  ;;  %v2768_v32 = vadd.f32 %v2767_v2, %v2394_v24  ;;  %v5383_v41 = vld [vmem:[%s5819_s24 + $0x3c8] sm:$0xff] }
 0xbd5   : > { %v2826_v46 = vmax.f32 %v2728_v52, 0.0  ;;  %v2827_v57 = vmax.f32 %v2742_v53, 0.0  ;;  %v5382_v52 = vld [vmem:[%s5819_s24 + $0x3c0] sm:$0xff] }
 0xbd6   : > { %4023 = vmatpush.bf16.msrb.mxu3 %v5342_v50  ;;  %4037 = vmatpush.bf16.msra.mxu2 %v5350_v51  ;;  %v2812_v42 = vmax.f32 %v2754_v31, 0.0  ;;  %v2813_v43 = vmax.f32 %v2768_v32, 0.0 }
 0xbd7   : > { %v3098_v61 = vpack.c.bf16 %v2826_v46, %v2810_v56  ;;  %v3099_v62 = vpack.c.bf16 %v2827_v57, %v2811_v36 }
 0xbd8   : > { %4045 = vmatpush.bf16.msra.mxu0 %v5364_v44  ;;  %4059 = vmatpush.bf16.msra.mxu1 %v5372_v45 }
 0xbd9   : > { %4024 = vmatmul.bf16.vlgmr.msrb.gmra.mxu3 %v3098_v61  ;;  %4038 = vmatmul.bf16.vlgmr.msra.gmra.mxu2 %v3099_v62 }
 0xbda   : > { %4072 = vmatpush.bf16.msra.mxu3 %v5381_v54  ;;  %4086 = vmatpush.bf16.msrb.mxu2 %v5389_v55  ;;  %v2781_v14 = vpop.f32.mrf.mxu3  ;;  %v2795_v15 = vpop.f32.mrf.mxu2 }
 0xbdb   : > { %v2755_v21 = vpop.f32.mrf.mxu0  ;;  %v2769_v22 = vpop.f32.mrf.mxu1  ;;  %v2782_v47 = vadd.f32 %v2781_v14, %v2395_v7  ;;  %v2796_v48 = vadd.f32 %v2795_v15, %v2396_v37 }
 0xbdc   : > { %4046 = vmatpush.bf16.msra.mxu0 %v5363_v58  ;;  %4060 = vmatpush.bf16.msra.mxu1 %v5371_v59  ;;  %v2756_v26 = vadd.f32 %v2755_v21, %v2393_v4  ;;  %v2770_v28 = vadd.f32 %v2769_v22, %v2394_v24 }
 0xbdd   : > { %v2814_v55 = vmax.f32 %v2782_v47, 0.0  ;;  %v2815_v56 = vmax.f32 %v2796_v48, 0.0 }
 0xbde   : > { %4073 = vmatpush.bf16.msra.mxu3 %v5380_v13  ;;  %4087 = vmatpush.bf16.msrb.mxu2 %v5388_v0  ;;  %v2828_v38 = vmax.f32 %v2756_v26, 0.0  ;;  %v2829_v8 = vmax.f32 %v2770_v28, 0.0  ;;  %v5462_v0 = vld [vmem:[%s1022_s5] ss:$0 sm:$0xff] }
 0xbe0   : > { %4047 = vmatpush.bf16.msra.mxu0 %v5362_v3  ;;  %4061 = vmatpush.bf16.msra.mxu1 %v5370_v63  ;;  %v3100_v50 = vpack.c.bf16 %v2828_v38, %v2812_v42  ;;  %v3101_v51 = vpack.c.bf16 %v2829_v8, %v2813_v43 }
 0xbe2   : > { %4074 = vmatpush.bf16.msra.mxu3 %v5379_v6  ;;  %4088 = vmatpush.bf16.msrb.mxu2 %v5387_v9  ;;  %v2783_v33 = vpop.f32.mrf.mxu3  ;;  %v2797_v34 = vpop.f32.mrf.mxu2 }
 0xbe3   : > { %v2784_v44 = vadd.f32 %v2783_v33, %v2395_v7  ;;  %v2798_v45 = vadd.f32 %v2797_v34, %v2396_v37 }
 0xbe4   : > { %4048 = vmatpush.bf16.msra.mxu0 %v5361_v11  ;;  %4062 = vmatpush.bf16.msra.mxu1 %v5369_v12 }
 0xbe5   : > { %v2830_v53 = vmax.f32 %v2784_v44, 0.0  ;;  %v2831_v54 = vmax.f32 %v2798_v45, 0.0 }
 0xbe6   : > { %4075 = vmatpush.bf16.msra.mxu3 %v5378_v16  ;;  %4089 = vmatpush.bf16.msrb.mxu2 %v5386_v17 }
 0xbe7   : > { %v3102_v36 = vpack.c.bf16 %v2830_v53, %v2814_v55  ;;  %v3103_v46 = vpack.c.bf16 %v2831_v54, %v2815_v56 }
 0xbe8   : > { %4049 = vmatpush.bf16.msra.mxu0 %v5360_v18  ;;  %4063 = vmatpush.bf16.msra.mxu1 %v5368_v19 }
 0xbea   : > { %4076 = vmatpush.bf16.msra.mxu3 %v5377_v23  ;;  %4090 = vmatpush.bf16.msrb.mxu2 %v5385_v20 }
 0xbec   : > { %4050 = vmatpush.bf16.msra.mxu0 %v5359_v5  ;;  %4064 = vmatpush.bf16.msra.mxu1 %v5367_v25 }
 0xbee   : > { %4077 = vmatpush.bf16.msra.mxu3 %v5376_v29  ;;  %4091 = vmatpush.bf16.msrb.mxu2 %v5384_v30 }
 0xbf0   : > { %4051 = vmatpush.bf16.msra.mxu0 %v5358_v10  ;;  %4065 = vmatpush.bf16.msra.mxu1 %v5366_v35 }
 0xbf2   : > { %4078 = vmatpush.bf16.msra.mxu3 %v5375_v40  ;;  %4092 = vmatpush.bf16.msrb.mxu2 %v5383_v41 }
 0xbf3   : > { %4052 = vmatmul.bf16.vlgmr.msra.gmra.mxu0 %v3100_v50  ;;  %4066 = vmatmul.bf16.vlgmr.msra.gmra.mxu1 %v3101_v51 }
 0xbf6   : > { %4079 = vmatpush.bf16.msra.mxu3 %v5374_v39  ;;  %4093 = vmatpush.bf16.msrb.mxu2 %v5382_v52 }
 0xbf9   : > { %4080 = vmatmul.bf16.vlgmr.msra.gmra.mxu3 %v3102_v36  ;;  %4094 = vmatmul.bf16.vlgmr.msrb.gmra.mxu2 %v3103_v46 }
 0xc2f   : > { %v3885_v57 = vpop.f32.mrf.mxu0  ;;  %v3899_v58 = vpop.f32.mrf.mxu1 }
 0xc30   : > { %v3886_v63 = vadd.f32 %v5462_v0, %v3885_v57 }
 0xc32   : > { %v3900_v9 = vadd.f32 %v3899_v58, %v3886_v63 }
 0xc37   : > { %v3887_v59 = vpop.f32.mrf.mxu0  ;;  %v3901_v13 = vpop.f32.mrf.mxu1 }
 0xc38   : > { %v3888_v16 = vadd.f32 %v5462_v0, %v3887_v59 }
 0xc3a   : > { %v3902_v18 = vadd.f32 %v3901_v13, %v3888_v16 }
 0xc3c   : > { %v3913_v61 = vpop.f32.mrf.mxu3  ;;  %v3927_v62 = vpop.f32.mrf.mxu2 }
 0xc3d   : > { %v3914_v11 = vadd.f32 %v3913_v61, %v3900_v9 }
 0xc3f   : > { %v3928_v17 = vadd.f32 %v3927_v62, %v3914_v11 }
 0xc40   : > { %v3941_v1 = vpop.f32.mrf.mxu0  ;;  %v3955_v6 = vpop.f32.mrf.mxu1 }
 0xc41   : > { %v3942_v21 = vadd.f32 %v3941_v1, %v3928_v17 }
 0xc43   : > { %v3956_v24 = vadd.f32 %v3955_v6, %v3942_v21 }
 0xc44   : > { %v3915_v2 = vpop.f32.mrf.mxu3  ;;  %v3929_v3 = vpop.f32.mrf.mxu2 }
 0xc45   : > { %v3916_v22 = vadd.f32 %v3915_v2, %v3902_v18 }
 0xc47   : > { %v3930_v5 = vadd.f32 %v3929_v3, %v3916_v22 }
 0xc48   : > { %v3943_v12 = vpop.f32.mrf.mxu0  ;;  %v3957_v19 = vpop.f32.mrf.mxu1 }
 0xc49   : > { %v3944_v26 = vadd.f32 %v3943_v12, %v3930_v5 }
 0xc4b   : > { %v3958_v30 = vadd.f32 %v3957_v19, %v3944_v26 }
 0xc4c   : > { %v3969_v14 = vpop.f32.mrf.mxu3  ;;  %v3983_v15 = vpop.f32.mrf.mxu2 }
 0xc4d   : > { %v3970_v25 = vadd.f32 %v3969_v14, %v3956_v24 }
 0xc4f   : > { %v3984_v29 = vadd.f32 %v3983_v15, %v3970_v25 }
 0xc50   : > { %v3997_v23 = vpop.f32.mrf.mxu0  ;;  %v4011_v28 = vpop.f32.mrf.mxu1 }
 0xc51   : > { %v3998_v34 = vadd.f32 %v3997_v23, %v3984_v29 }
 0xc53   : > { %v4012_v35 = vadd.f32 %v4011_v28, %v3998_v34  ;;  %v5463_v28 = vld [vmem:[%s6608_s23] ss:$0 sm:$0xff] }
 0xc54   : > { %v3971_v20 = vpop.f32.mrf.mxu3  ;;  %v3985_v4 = vpop.f32.mrf.mxu2 }
 0xc55   : > { %v3972_v10 = vadd.f32 %v3971_v20, %v3958_v30  ;;  %v5464_v30 = vld [vmem:[%s6610_s26] ss:$0 sm:$0xff] }
 0xc57   : > { %v3986_v7 = vadd.f32 %v3985_v4, %v3972_v10 }
 0xc58   : > { %v3999_v31 = vpop.f32.mrf.mxu0  ;;  %v4013_v37 = vpop.f32.mrf.mxu1 }
 0xc59   : > { %v4000_v40 = vadd.f32 %v3999_v31, %v3986_v7 }
 0xc5b   : > { %v4014_v44 = vadd.f32 %v4013_v37, %v4000_v40 }
 0xc5c   : > { %v4025_v32 = vpop.f32.mrf.mxu3  ;;  %v4039_v33 = vpop.f32.mrf.mxu2 }
 0xc5d   : > { %v4026_v38 = vadd.f32 %v4025_v32, %v4012_v35 }
 0xc5f   : > { %v4040_v43 = vadd.f32 %v4039_v33, %v4026_v38 }
 0xc64   : > { %v4027_v41 = vpop.f32.mrf.mxu3  ;;  %v4041_v42 = vpop.f32.mrf.mxu2 }
 0xc65   : > { %v4028_v48 = vadd.f32 %v4027_v41, %v4014_v44 }
 0xc67   : > { %v4042_v53 = vadd.f32 %v4041_v42, %v4028_v48 }
 0xc70   : > { %v4053_v8 = vpop.f32.mrf.mxu0  ;;  %v4067_v47 = vpop.f32.mrf.mxu1 }
 0xc71   : > { %v4054_v45 = vadd.f32 %v4053_v8, %v4040_v43 }
 0xc73   : > { %v4068_v50 = vadd.f32 %v4067_v47, %v4054_v45 }
 0xc78   : > { %v4055_v51 = vpop.f32.mrf.mxu0  ;;  %v4069_v46 = vpop.f32.mrf.mxu1 }
 0xc79   : > { %v4056_v55 = vadd.f32 %v4055_v51, %v4042_v53 }
 0xc7b   : > { %v4070_v57 = vadd.f32 %v4069_v46, %v4056_v55 }
 0xc7c   : > { %v4081_v39 = vpop.f32.mrf.mxu3  ;;  %v4095_v52 = vpop.f32.mrf.mxu2 }
 0xc7d   : > { %v4082_v54 = vadd.f32 %v4081_v39, %v4068_v50 }
 0xc7f   : > { %v4096_v56 = vadd.f32 %v4095_v52, %v4082_v54 }
 0xc81   : > { %v4100_v36 = vadd.f32 %v4096_v56, %v6257_v60 }
 0xc83   : > { %v4104_v58 = vsel %vm1062_vm1, %v4100_v36, 0.0 }
 0xc84   : > { %v4083_v59 = vpop.f32.mrf.mxu3  ;;  %4105 = vadd.xlane.f32.xlu1 %v4104_v58  ;;  %v4097_v62 = vpop.f32.mrf.mxu2 }
 0xc85   : > { %v4084_v61 = vadd.f32 %v4083_v59, %v4070_v57 }
 0xc87   : > { %v4098_v13 = vadd.f32 %v4097_v62, %v4084_v61 }
 0xc89   : > { %v4101_v0 = vadd.f32 %v4098_v13, %v6259_v49 }
 0xc8b   : > { %v4107_v1 = vsel %vm1062_vm1, %v4101_v0, 0.0 }
 0xc8c   : > { %4108 = vadd.xlane.f32.xlu1 %v4107_v1 }
 0xcf7   : > { %v4106_v2 = vpop.xlane.xlu1 %4105 }
 0xcf8   : > { %v4110_v3 = vmul.f32 %v4106_v2, %v6004_v27 }
 0xcfa   : > { %v4112_v63 = vsub.f32 %v4100_v36, %v4110_v3 }
 0xcfc   : > { %v4114_v6 = vmul.f32 %v4112_v63, %v4112_v63 }
 0xcfe   : > { %v4116_v60 = vsel %vm1062_vm1, %v4114_v6, 0.0 }
 0xcff   : > { %4117 = vadd.xlane.f32.xlu1 %v4116_v60  ;;  %v4109_v9 = vpop.xlane.xlu1 %4108 }
 0xd00   : > { %v4111_v11 = vmul.f32 %v4109_v9, %v6004_v27 }
 0xd02   : > { %v4113_v12 = vsub.f32 %v4101_v0, %v4111_v11 }
 0xd04   : > { %v4115_v14 = vmul.f32 %v4113_v12, %v4113_v12 }
 0xd06   : > { %v4119_v15 = vsel %vm1062_vm1, %v4115_v14, 0.0 }
 0xd07   : > { %4120 = vadd.xlane.f32.xlu1 %v4119_v15 }
 0xd72   : > { %v4118_v49 = vpop.xlane.xlu1 %4117 }
 0xd73   : > { %v4122_v16 = vmul.f32 %v4118_v49, %v6004_v27 }
 0xd75   : > { %v4124_v17 = vadd.f32 1e-05, %v4122_v16 }
 0xd77   : > { %5539 = vrsqrt.f32 %v4124_v17  ;;  %vm4132_vm6 = vweird.f32 %v4124_v17 }
 0xd7a   : > { %v4121_v18 = vpop.xlane.xlu1 %4120 }
 0xd7b   : > { %v4123_v19 = vmul.f32 %v4121_v18, %v6004_v27 }
 0xd7d   : > { %v5540_v21 = vpop.eup %5539  ;;  %v4125_v22 = vadd.f32 1e-05, %v4123_v19 }
 0xd7e   : > { %v4127_v23 = vmul.f32 %v5540_v21, %v4124_v17  ;;  %vm4133_vm5 = vweird.f32 %v5540_v21 }
 0xd7f   : > { %5541 = vrsqrt.f32 %v4125_v22  ;;  %vm4134_vm7 = vmor %vm4132_vm6, %vm4133_vm5  ;;  %vm4142_vm9 = vweird.f32 %v4125_v22 }
 0xd80   : > { %v4128_v20 = vmul.f32 %v5540_v21, %v4127_v23 }
 0xd82   : > { %v4129_v4 = vmul.f32 0.5, %v4128_v20 }
 0xd84   : > { %v4130_v24 = vsub.f32 1.5, %v4129_v4 }
 0xd85   : > { %v5542_v5 = vpop.eup %5541 }
 0xd86   : > { %v4131_v25 = vmul.f32 %v5540_v21, %v4130_v24  ;;  %v4137_v26 = vmul.f32 %v5542_v5, %v4125_v22  ;;  %vm4143_vm8 = vweird.f32 %v5542_v5 }
 0xd87   : > { %vm4144_vm10 = vmor %vm4142_vm9, %vm4143_vm8 }
 0xd88   : > { %v4135_v27 = vsel %vm4134_vm7, %v5540_v21, %v4131_v25  ;;  %v4138_v29 = vmul.f32 %v5542_v5, %v4137_v26 }
 0xd89   : > { %v4146_v31 = vmul.f32 %v4135_v27, %v4112_v63 }
 0xd8a   : > { %v4139_v32 = vmul.f32 0.5, %v4138_v29 }
 0xd8b   : > { %v4151_v33 = vmul.f32 %v5463_v28, %v4146_v31 }
 0xd8c   : > { %v4140_v34 = vsub.f32 1.5, %v4139_v32 }
 0xd8d   : > { %v4156_v10 = vadd.f32 %v5464_v30, %v4151_v33 }
 0xd8e   : > { %v4141_v35 = vmul.f32 %v5542_v5, %v4140_v34 }
 0xd8f   : > { %4158 = vst.msk [vmem:[#allocation2] sm:$0xff] %vm1062_vm1, %v4156_v10 }
 0xd90   : > { %v4145_v7 = vsel %vm4144_vm10, %v5542_v5, %v4141_v35 }
 0xd91   : > { %v4147_v37 = vmul.f32 %v4145_v7, %v4113_v12 }
 0xd93   : > { %v4152_v38 = vmul.f32 %v5463_v28, %v4147_v37  ;;  %4163 = sbr.rel (%p5199_p5) target bundleno = 3625 (0xe29), region = 124 }
 0xd95   : > { %v4157_v8 = vadd.f32 %v5464_v30, %v4152_v38 }
 0xd97   : > { %4159 = vst.msk [vmem:[#allocation2 + $0x8] sm:$0xff] %vm1062_vm1, %v4157_v8 }
 0xd98   : > { %v5391_v40 = vld [vmem:[%s6612_s30 + $0x8] sm:$0xff]  ;;  %v5390_v41 = vld [vmem:[%s6612_s30] sm:$0xff]  ;;  %v4168_v42 = vpack.c.bf16 %v4157_v8, %v4156_v10 }
 0xd99   : > { %4194 = vmatpush.bf16.msra.mxu0 %v5391_v40  ;;  %v5543_v43 = vld [vmem:[%s6613_s22] ss:$0 sm:$0xff] }
 0xd9d   : > { %4195 = vmatpush.bf16.msra.mxu0 %v5390_v41 }
 0xda0   : > { %5208 = vmatmul.msk.bf16.vlgmr.msra.gmra.mxu0 %vm1062_vm1, %v4168_v42 }
 0xe1d   : > { %v4197_v44 = vpop.f32.mrf.mxu0 }
 0xe1e   : > { %v4198_v45 = vadd.f32 %v5543_v43, %v4197_v44 }
 0xe20   : > { %4202 = vst [vmem:[#allocation3] sm:$0xff] %v4198_v45 }
 0xe25   : > { %v4199_v47 = vpop.f32.mrf.mxu0 }
 0xe26   : > { %v4200_v48 = vadd.f32 %v5543_v43, %v4199_v47 }
 0xe28   : > { %4203 = vst [vmem:[#allocation3 + $0x8] sm:$0xff] %v4200_v48 }
 0xe29 PF: > { %s6614_s18 = sld [smem:[#allocation7_spill]]  ;;  %s5599_s21 = smov [#allocation3]  }
 0xe2a   : > { %s4209_s16 = sshll.u32 %s5599_s21, 4  ;;  %s6615_s2 = sld [smem:[#allocation28_spill]]  ;;  %s4210_s16 = int_to_ptr.vmem [resolvable:$true] %s4209_s16 }
 0xe2b   : > { %s5600_s24 = smov 128  }
 0xe2f   : > { %p5396_p6 = scmp.eq.s32.totalorder %s6614_s18, 1 }
 0xe30   : > { %s4211_s5 = sshll.u32 %s6615_s2, 4  ;;  %s4212_s5 = int_to_ptr.hbm [resolvable:$true] %s4211_s5 }
 0xe31   : > { %5393 = dma.vmem_to_hbm [thread:$0]  (%p5396_p6), %s4210_s16, 256, %s4212_s5, [#allocation4], %s5600_s24, %s5600_s24, %s5595_s15  }
 0xe32   : > { %5577 = dma.done.wait (%p5396_p6), [#allocation4], 256  }
 0xe33   : > { %5579 = vsyncadd (%p5396_p6), [#allocation4], 4294967040 }
 0xe34 PF: > { %s6616_s8 = sld [smem:[#allocation6_spill]] }
 0xe3a   : > { %s35_s5 = sadd.s32 1, %s6616_s8  }
 0xe3b   : > { %p32_p7 = scmp.ge.s32.totalorder %s35_s5, 4  }
 0xe3d   :  { %34 = sbr.rel (!%p32_p7) target bundleno = 22 (0x16), region = 208 }
 0xe42   :  { %4228 = vsyncpa [#allocation4], 1 }
 0xe43   :  { %4230 = vsyncpa [#allocation4 + $0x1], 1 }

</bundles_post_ra>
